<compile_context>
chip_gen: v7x
topology: tpu7x:2x2x1
jax: 0.10.0
libtpu: 0.0.40
codegen_flags: <defaults>
</compile_context>

<pallas_src>
import functools

import jax
import jax.numpy as jnp
from jax.experimental import pallas as pl
from jax.experimental.pallas import tpu as pltpu

_BN_EPS = 1e-5
_VMEM_LIMIT = 32 * 1024 * 1024


def _round_up(x, m):
    return ((x + m - 1) // m) * m


# ----------------------------------------------------------------------------
# Kernels
# ----------------------------------------------------------------------------
def _conv1_pool_kernel(a_ref, w_ref, shift_ref, o_ref):
    """Fused conv1 (Cin=1) + folded BN + ReLU + 2x2 max-pool.

    a_ref : (tm, 16) bf16 -- 4x4 input patch per pooled output position,
                              column index = py*4 + px
    w_ref : (64, 64) bf16 -- rows [corner*16 + py*4 + px]; the 3x3 kernel is
                              embedded at the corner's offset, zeros elsewhere
    shift : (1, 64)  f32
    o_ref : (tm, 64) bf16
    """
    a = a_ref[...]
    m = jnp.dot(a, w_ref[0:16, :], preferred_element_type=jnp.float32)
    for k in range(1, 4):                                   # running max
        m = jnp.maximum(
            m, jnp.dot(a, w_ref[k * 16:(k + 1) * 16, :],
                       preferred_element_type=jnp.float32))
    # TODO(synk): conv1's 64-lane output lowers to masked stores; acceptable
    # since this stage is tiny, see review note on lane-dense out_specs.
    o_ref[...] = jnp.maximum(m + shift_ref[...], 0.0).astype(o_ref.dtype)


def _conv_pool_plane_kernel(p00, p01, p10, p11, w_ref, shift_ref, o_ref, *,
                            wo, l_rows, pitch, bt, cin):
    """Fused conv (3x3, pad 1) + folded BN + ReLU + 2x2 max-pool, in-kernel im2col.

    p?? : (bt*pitch, cin) bf16 -- parity plane (pu, pv) of the padded input,
          row index (per batch item) q = a*(wo+1) + v, zero-padded to `pitch`.
    w_ref : (9*cin, cout) bf16 -- rows (dy*3+dx)*cin + ci, BN scale folded in.
    shift : (1, cout) f32
    o_ref : (bt*pitch, cout) bf16 -- valid rows: b*pitch + i*(wo+1) + j, j<wo.

    For corner (r,c) and tap (dy,dx) the needed plane rows start at the static
    offset r0 = ((r+dy)//2)*(wo+1) + ((c+dx)//2) and are CONTIGUOUS in the
    flattened plane, so each tap is one (lb, cin) x (cin, cout) matmul.
    """
    planes = (p00, p01, p10, p11)
    lb = (bt - 1) * pitch + l_rows
    cached = {}

    def plane_slab(pidx, r0):
        key = (pidx, r0)
        if key not in cached:                               # dedupe loads
            cached[key] = planes[pidx][r0:r0 + lb, :]
        return cached[key]

    m = None
    for r in range(2):
        for c in range(2):
            acc = None
            for dy in range(3):
                for dx in range(3):
                    pu, pv = (r + dy) % 2, (c + dx) % 2
                    r0 = ((r + dy) // 2) * (wo + 1) + ((c + dx) // 2)
                    a = plane_slab(pu * 2 + pv, r0)
                    k = dy * 3 + dx
                    wk = w_ref[k * cin:(k + 1) * cin, :]
                    t = jnp.dot(a, wk, preferred_element_type=jnp.float32)
                    acc = t if acc is None else acc + t
            m = acc if m is None else jnp.maximum(m, acc)   # running corner max
    y = jnp.maximum(m + shift_ref[...], 0.0).astype(o_ref.dtype)
    o_ref[0:lb, :] = y
    o_ref[lb:, :] = jnp.zeros((bt * pitch - lb, o_ref.shape[1]), o_ref.dtype)


def _fc_chain_kernel(x_ref, w1, t1, w2, t2, w3, t3, w4, b4, o_ref):
    """fc1+bn4+relu -> fc2+bn5+relu -> fc3+bn6+relu -> fc4, fully in-VMEM.

    Dropout is identity (eval). BN scales folded into weights. fc4 is padded
    to 128 output lanes so the final store is lane-dense.
    """
    h = x_ref[...]
    h = jnp.maximum(jnp.dot(h, w1[...],
                            preferred_element_type=jnp.float32) + t1[...], 0.0)
    h = jnp.maximum(jnp.dot(h.astype(jnp.bfloat16), w2[...],
                            preferred_element_type=jnp.float32) + t2[...], 0.0)
    h = jnp.maximum(jnp.dot(h.astype(jnp.bfloat16), w3[...],
                            preferred_element_type=jnp.float32) + t3[...], 0.0)
    o_ref[...] = jnp.dot(h.astype(jnp.bfloat16), w4[...],
                         preferred_element_type=jnp.float32) + b4[...]


# ----------------------------------------------------------------------------
# Wrappers
# ----------------------------------------------------------------------------
def _pick_row_tile(m, cap=1024):
    """Largest multiple-of-8 tile dividing m with grid>=2 when possible; else pad."""
    limit = min(cap, m // 2) if m >= 16 else min(cap, m)
    best = 0
    for t in range(8, limit + 1, 8):
        if m % t == 0:
            best = t
    if best:
        return best, m // best, m
    t = min(cap, _round_up(max(m // 2, 8) if m >= 16 else m, 8))
    mp = _round_up(m, t)
    return t, mp // t, mp


def conv1_bn_relu_pool(x_nhwc, w_stacked, shift):
    """x: (B, H, W, 1) -> (B, H//2, W//2, 64)."""
    B, H, W, _ = x_nhwc.shape
    Ho, Wo = H // 2, W // 2
    xp = jnp.pad(x_nhwc[..., 0], ((0, 0), (1, 1), (1, 1)))
    taps = [xp[:, dy:dy + 2 * Ho:2, dx:dx + 2 * Wo:2]
            for dy in range(4) for dx in range(4)]
    patches = jnp.stack(taps, axis=-1).reshape(B * Ho * Wo, 16).astype(jnp.bfloat16)

    M = B * Ho * Wo
    tm, grid_m, Mp = _pick_row_tile(M, cap=1024)
    if Mp != M:
        patches = jnp.pad(patches, ((0, Mp - M), (0, 0)))

    out = pl.pallas_call(
        _conv1_pool_kernel,
        out_shape=jax.ShapeDtypeStruct((Mp, 64), jnp.bfloat16),
        grid=(grid_m,),
        in_specs=[pl.BlockSpec((tm, 16), lambda i: (i, 0)),
                  pl.BlockSpec((64, 64), lambda i: (0, 0)),
                  pl.BlockSpec((1, 64), lambda i: (0, 0))],
        out_specs=pl.BlockSpec((tm, 64), lambda i: (i, 0)),
        compiler_params=pltpu.CompilerParams(
            dimension_semantics=("parallel",),
            vmem_limit_bytes=_VMEM_LIMIT),
    )(patches, w_stacked, shift)
    if Mp != M:
        out = out[:M]
    return out.reshape(B, Ho, Wo, 64)


def conv_bn_relu_pool(x_nhwc, w, shift, *, max_rows=2048):
    """x: (B, H, W, C) -> (B, H//2, W//2, Cout) via in-kernel im2col on parity planes."""
    B, H, W, C = x_nhwc.shape
    Cout = w.shape[-1]
    Ho, Wo = H // 2, W // 2
    S = (Ho + 1) * (Wo + 1)
    P = _round_up(S, 8)
    L = Ho * (Wo + 1) - 1

    xp = jnp.pad(x_nhwc, ((0, 0), (1, 1), (1, 1), (0, 0)))
    planes = []
    for pu in range(2):
        for pv in range(2):
            pp = xp[:, pu::2, pv::2, :][:, :Ho + 1, :Wo + 1, :]
            pp = pp.reshape(B, S, C)
            if P != S:
                pp = jnp.pad(pp, ((0, 0), (0, P - S), (0, 0)))
            planes.append(pp.reshape(B * P, C).astype(jnp.bfloat16))

    # Batch tile: largest divisor of B under max_rows rows, keeping grid >= 2.
    bt = 1
    for cand in range(1, B + 1):
        if B % cand == 0 and cand * P <= max_rows and (B // cand >= 2 or B == 1):
            bt = cand
    grid = (B // bt,)

    kernel = functools.partial(_conv_pool_plane_kernel, wo=Wo, l_rows=L,
                               pitch=P, bt=bt, cin=C)
    out = pl.pallas_call(
        kernel,
        out_shape=jax.ShapeDtypeStruct((B * P, Cout), jnp.bfloat16),
        grid=grid,
        in_specs=[pl.BlockSpec((bt * P, C), lambda i: (i, 0)) for _ in range(4)]
        + [pl.BlockSpec((9 * C, Cout), lambda i: (0, 0)),
           pl.BlockSpec((1, Cout), lambda i: (0, 0))],
        out_specs=pl.BlockSpec((bt * P, Cout), lambda i: (i, 0)),
        compiler_params=pltpu.CompilerParams(
            dimension_semantics=("parallel",),
            vmem_limit_bytes=_VMEM_LIMIT),
    )(*planes, w, shift)

    # Re-assemble NHWC: valid rows are b*P + i*(Wo+1) + j with j < Wo.
    out = out.reshape(B, P, Cout)[:, :Ho * (Wo + 1), :]
    out = out.reshape(B, Ho, Wo + 1, Cout)[:, :, :Wo, :]
    return out


def fc_chain(x, p, num_classes):
    """x: (B, 2304) bf16 -> logits (B, num_classes) f32, one fused kernel."""
    B, K = x.shape
    n_pad = p["fw4"].shape[-1]                      # 128, lane-dense
    tb = 8 if B <= 256 else 128
    Bp = _round_up(max(B, 2 * tb), tb)              # always >= 2 grid steps
    if Bp != B:
        x = jnp.pad(x, ((0, Bp - B), (0, 0)))

    out = pl.pallas_call(
        _fc_chain_kernel,
        out_shape=jax.ShapeDtypeStruct((Bp, n_pad), jnp.float32),
        grid=(Bp // tb,),
        in_specs=[pl.BlockSpec((tb, K), lambda i: (i, 0))]
        + [pl.BlockSpec(p[k].shape, lambda i: (0, 0))
           for k in ("fw1", "ft1", "fw2", "ft2", "fw3", "ft3", "fw4", "fb4")],
        out_specs=pl.BlockSpec((tb, n_pad), lambda i: (i, 0)),
        compiler_params=pltpu.CompilerParams(
            dimension_semantics=("parallel",),
            vmem_limit_bytes=_VMEM_LIMIT),
    )(x, p["fw1"], p["ft1"], p["fw2"], p["ft2"], p["fw3"], p["ft3"],
      p["fw4"], p["fb4"])
    return out[:B, :num_classes]


# ----------------------------------------------------------------------------
# Parameters (deterministic synthetic; eval-mode BN folded into weights/shift)
# ----------------------------------------------------------------------------
def _bn_fold(bias, cout):
    gamma = jnp.ones((cout,), jnp.float32)
    beta = jnp.zeros((cout,), jnp.float32)
    mean = jnp.zeros((cout,), jnp.float32)
    var = jnp.ones((cout,), jnp.float32)
    scale = gamma / jnp.sqrt(var + _BN_EPS)
    shift = beta + (bias - mean) * scale
    return scale, shift


def init_params(key, num_classes=10):
    ks = jax.random.split(key, 14)
    p = {}

    # conv1: corner-embedded 4x4-window weights (rows corner*16 + py*4 + px).
    w1 = jax.random.normal(ks[0], (3, 3, 1, 64), jnp.float32) / 3.0
    b1 = 0.01 * jax.random.normal(ks[1], (64,), jnp.float32)
    scale1, shift1 = _bn_fold(b1, 64)
    blocks = []
    for r in range(2):
        for c in range(2):
            wk = jnp.zeros((4, 4, 64), jnp.float32)
            wk = wk.at[r:r + 3, c:c + 3, :].set(w1[:, :, 0, :])
            blocks.append(wk.reshape(16, 64))
    p["w1"] = (jnp.concatenate(blocks, axis=0) * scale1[None, :]).astype(jnp.bfloat16)
    p["t1"] = shift1.reshape(1, 64)

    def conv_layer(kw, kb, cin, cout):
        w = jax.random.normal(kw, (3, 3, cin, cout), jnp.float32) / jnp.sqrt(9.0 * cin)
        b = 0.01 * jax.random.normal(kb, (cout,), jnp.float32)
        scale, shift = _bn_fold(b, cout)
        w = (w * scale[None, None, None, :]).reshape(9 * cin, cout)  # rows k*cin+ci
        return w.astype(jnp.bfloat16), shift.reshape(1, cout)

    p["w2"], p["t2"] = conv_layer(ks[2], ks[3], 64, 128)
    p["w3"], p["t3"] = conv_layer(ks[4], ks[5], 128, 256)

    def fc_layer(kw, kb, fin, fout, bn=True, pad_to=None):
        w = jax.random.normal(kw, (fin, fout), jnp.float32) / jnp.sqrt(fin)
        b = 0.01 * jax.random.normal(kb, (fout,), jnp.float32)
        if bn:
            scale, shift = _bn_fold(b, fout)
            w, bias = w * scale[None, :], shift
        else:
            bias = b
        if pad_to is not None and pad_to > fout:
            w = jnp.pad(w, ((0, 0), (0, pad_to - fout)))
            bias = jnp.pad(bias, ((0, pad_to - fout),))
            fout = pad_to
        return w.astype(jnp.bfloat16), bias.reshape(1, fout).astype(jnp.float32)

    # fc1 rows are in NHWC flatten order (i, j, c); see module docstring.
    p["fw1"], p["ft1"] = fc_layer(ks[6], ks[7], 256 * 3 * 3, 256)
    p["fw2"], p["ft2"] = fc_layer(ks[8], ks[9], 256, 128)
    p["fw3"], p["ft3"] = fc_layer(ks[10], ks[11], 128, 64)
    p["fw4"], p["fb4"] = fc_layer(ks[12], ks[13], 64, num_classes, bn=False, pad_to=128)
    return p


# ----------------------------------------------------------------------------
# Forward pass (mirrors Net.forward, eval mode)
# ----------------------------------------------------------------------------
def forward(params, x_nchw, num_classes=10):
    B = x_nchw.shape[0]
    x = jnp.transpose(x_nchw, (0, 2, 3, 1))                 # NCHW -> NHWC

    h = conv1_bn_relu_pool(x, params["w1"], params["t1"])   # (B,14,14,64)
    h = conv_bn_relu_pool(h, params["w2"], params["t2"])    # (B,7,7,128)
    h = conv_bn_relu_pool(h, params["w3"], params["t3"])    # (B,3,3,256)

    h = h.reshape(B, 3 * 3 * 256)                           # NHWC flatten
    return fc_chain(h, params, num_classes)


if __name__ == "__main__":
    key = jax.random.PRNGKey(0)
    kx, kp = jax.random.split(key)
    x = jax.random.normal(kx, (2, 1, 28, 28), jnp.float32)  # NCHW, MNIST-sized
    params = init_params(kp, num_classes=10)

    out = jax.jit(forward)(params, x)
    out = jax.block_until_ready(out)
    assert out.shape == (2, 10) and out.dtype == jnp.float32
    assert bool(jnp.all(jnp.isfinite(out)))
    print("KERNEL_OK")
</pallas_src>

<mosaic_0001>
module attributes {stable_mosaic.version = 11 : i64} {
  func.func @_conv1_pool_kernel(%arg0: i32, %arg1: memref<56x16xbf16, #tpu.memory_space<vmem>>, %arg2: memref<64x64xbf16, #tpu.memory_space<vmem>>, %arg3: memref<1x64xf32, #tpu.memory_space<vmem>>, %arg4: memref<56x64xbf16, #tpu.memory_space<vmem>>) attributes {dimension_semantics = [#tpu.dimension_semantics<parallel>], iteration_bounds = array<i64: 7>, scalar_prefetch = 0 : i64, scratch_operands = 0 : i64, tpu.core_type = #tpu.core_type<tc>, window_params = [{transform_indices = @transform_0, window_bounds = array<i64: 56, 16>}, {pipeline_mode = #tpu.pipeline_mode<synchronous>, transform_indices = @transform_1, window_bounds = array<i64: 64, 64>}, {pipeline_mode = #tpu.pipeline_mode<synchronous>, transform_indices = @transform_2, window_bounds = array<i64: 1, 64>}, {transform_indices = @transform_3, window_bounds = array<i64: 56, 64>}]} {
    %c0 = arith.constant 0 : index
    %c0_0 = arith.constant 0 : index
    %0 = vector.load %arg1[%c0, %c0_0] : memref<56x16xbf16, #tpu.memory_space<vmem>>, vector<56x16xbf16>
    %c0_1 = arith.constant 0 : index
    %c0_2 = arith.constant 0 : index
    %1 = vector.load %arg2[%c0_1, %c0_2] : memref<64x64xbf16, #tpu.memory_space<vmem>>, vector<16x64xbf16>
    %cst = arith.constant dense<0.000000e+00> : vector<56x64xf32>
    %2 = tpu.matmul %0, %1, %cst {dimension_numbers = #tpu.dot_dimension_numbers<[1], [0], [0], [1], [0, 0, 1, 1], [], []>} : vector<56x16xbf16>, vector<16x64xbf16>, vector<56x64xf32> -> vector<56x64xf32>
    %c16 = arith.constant 16 : index
    %c0_3 = arith.constant 0 : index
    %3 = vector.load %arg2[%c16, %c0_3] : memref<64x64xbf16, #tpu.memory_space<vmem>>, vector<16x64xbf16>
    %cst_4 = arith.constant dense<0.000000e+00> : vector<56x64xf32>
    %4 = tpu.matmul %0, %3, %cst_4 {dimension_numbers = #tpu.dot_dimension_numbers<[1], [0], [0], [1], [0, 0, 1, 1], [], []>} : vector<56x16xbf16>, vector<16x64xbf16>, vector<56x64xf32> -> vector<56x64xf32>
    %5 = arith.maximumf %2, %4 : vector<56x64xf32>
    %c32 = arith.constant 32 : index
    %c0_5 = arith.constant 0 : index
    %6 = vector.load %arg2[%c32, %c0_5] : memref<64x64xbf16, #tpu.memory_space<vmem>>, vector<16x64xbf16>
    %cst_6 = arith.constant dense<0.000000e+00> : vector<56x64xf32>
    %7 = tpu.matmul %0, %6, %cst_6 {dimension_numbers = #tpu.dot_dimension_numbers<[1], [0], [0], [1], [0, 0, 1, 1], [], []>} : vector<56x16xbf16>, vector<16x64xbf16>, vector<56x64xf32> -> vector<56x64xf32>
    %8 = arith.maximumf %5, %7 : vector<56x64xf32>
    %c48 = arith.constant 48 : index
    %c0_7 = arith.constant 0 : index
    %9 = vector.load %arg2[%c48, %c0_7] : memref<64x64xbf16, #tpu.memory_space<vmem>>, vector<16x64xbf16>
    %cst_8 = arith.constant dense<0.000000e+00> : vector<56x64xf32>
    %10 = tpu.matmul %0, %9, %cst_8 {dimension_numbers = #tpu.dot_dimension_numbers<[1], [0], [0], [1], [0, 0, 1, 1], [], []>} : vector<56x16xbf16>, vector<16x64xbf16>, vector<56x64xf32> -> vector<56x64xf32>
    %11 = arith.maximumf %8, %10 : vector<56x64xf32>
    %c0_9 = arith.constant 0 : index
    %c0_10 = arith.constant 0 : index
    %12 = vector.load %arg3[%c0_9, %c0_10] : memref<1x64xf32, #tpu.memory_space<vmem>>, vector<1x64xf32>
    %13 = vector.broadcast %12 : vector<1x64xf32> to vector<56x64xf32>
    %14 = arith.addf %11, %13 : vector<56x64xf32>
    %cst_11 = arith.constant 0.000000e+00 : f32
    %15 = vector.broadcast %cst_11 : f32 to vector<56x64xf32>
    %16 = arith.maximumf %14, %15 : vector<56x64xf32>
    %17 = arith.truncf %16 : vector<56x64xf32> to vector<56x64xbf16>
    %c0_12 = arith.constant 0 : index
    %c0_13 = arith.constant 0 : index
    %18 = vector.load %arg4[%c0_12, %c0_13] : memref<56x64xbf16, #tpu.memory_space<vmem>>, vector<56x64xbf16>
    tpu.vector_store %arg4[%c0_12, %c0_13], %17 {strides = array<i32>} : memref<56x64xbf16, #tpu.memory_space<vmem>>, vector<56x64xbf16>,
    return
  }
  func.func @transform_0(%arg0: i32) -> (i32, i32) {
    %c0_i32 = arith.constant 0 : i32
    %c0_i32_0 = arith.constant 0 : i32
    return %arg0, %c0_i32 : i32, i32
  }
  func.func @transform_1(%arg0: i32) -> (i32, i32) {
    %c0_i32 = arith.constant 0 : i32
    %c0_i32_0 = arith.constant 0 : i32
    %c0_i32_1 = arith.constant 0 : i32
    return %c0_i32, %c0_i32_0 : i32, i32
  }
  func.func @transform_2(%arg0: i32) -> (i32, i32) {
    %c0_i32 = arith.constant 0 : i32
    %c0_i32_0 = arith.constant 0 : i32
    %c0_i32_1 = arith.constant 0 : i32
    return %c0_i32, %c0_i32_0 : i32, i32
  }
  func.func @transform_3(%arg0: i32) -> (i32, i32) {
    %c0_i32 = arith.constant 0 : i32
    %c0_i32_0 = arith.constant 0 : i32
    return %arg0, %c0_i32 : i32, i32
  }
}

module attributes {stable_mosaic.version = 11 : i64} {
  func.func @_conv_pool_plane_kernel(%arg0: i32, %arg1: memref<64x64xbf16, #tpu.memory_space<vmem>>, %arg2: memref<64x64xbf16, #tpu.memory_space<vmem>>, %arg3: memref<64x64xbf16, #tpu.memory_space<vmem>>, %arg4: memref<64x64xbf16, #tpu.memory_space<vmem>>, %arg5: memref<576x128xbf16, #tpu.memory_space<vmem>>, %arg6: memref<1x128xf32, #tpu.memory_space<vmem>>, %arg7: memref<64x128xbf16, #tpu.memory_space<vmem>>) attributes {dimension_semantics = [#tpu.dimension_semantics<parallel>], iteration_bounds = array<i64: 2>, scalar_prefetch = 0 : i64, scratch_operands = 0 : i64, tpu.core_type = #tpu.core_type<tc>, window_params = [{transform_indices = @transform_0, window_bounds = array<i64: 64, 64>}, {transform_indices = @transform_1, window_bounds = array<i64: 64, 64>}, {transform_indices = @transform_2, window_bounds = array<i64: 64, 64>}, {transform_indices = @transform_3, window_bounds = array<i64: 64, 64>}, {pipeline_mode = #tpu.pipeline_mode<synchronous>, transform_indices = @transform_4, window_bounds = array<i64: 576, 128>}, {pipeline_mode = #tpu.pipeline_mode<synchronous>, transform_indices = @transform_5, window_bounds = array<i64: 1, 128>}, {transform_indices = @transform_6, window_bounds = array<i64: 64, 128>}]} {
    %c0 = arith.constant 0 : index
    %c0_0 = arith.constant 0 : index
    %0 = vector.load %arg1[%c0, %c0_0] : memref<64x64xbf16, #tpu.memory_space<vmem>>, vector<55x64xbf16>
    %c0_1 = arith.constant 0 : index
    %c0_2 = arith.constant 0 : index
    %1 = vector.load %arg5[%c0_1, %c0_2] : memref<576x128xbf16, #tpu.memory_space<vmem>>, vector<64x128xbf16>
    %cst = arith.constant dense<0.000000e+00> : vector<55x128xf32>
    %2 = tpu.matmul %0, %1, %cst {dimension_numbers = #tpu.dot_dimension_numbers<[1], [0], [0], [1], [0, 0, 1, 1], [], []>} : vector<55x64xbf16>, vector<64x128xbf16>, vector<55x128xf32> -> vector<55x128xf32>
    %c0_3 = arith.constant 0 : index
    %c0_4 = arith.constant 0 : index
    %3 = vector.load %arg2[%c0_3, %c0_4] : memref<64x64xbf16, #tpu.memory_space<vmem>>, vector<55x64xbf16>
    %c64 = arith.constant 64 : index
    %c0_5 = arith.constant 0 : index
    %4 = vector.load %arg5[%c64, %c0_5] : memref<576x128xbf16, #tpu.memory_space<vmem>>, vector<64x128xbf16>
    %cst_6 = arith.constant dense<0.000000e+00> : vector<55x128xf32>
    %5 = tpu.matmul %3, %4, %cst_6 {dimension_numbers = #tpu.dot_dimension_numbers<[1], [0], [0], [1], [0, 0, 1, 1], [], []>} : vector<55x64xbf16>, vector<64x128xbf16>, vector<55x128xf32> -> vector<55x128xf32>
    %6 = arith.addf %2, %5 : vector<55x128xf32>
    %c1 = arith.constant 1 : index
    %c0_7 = arith.constant 0 : index
    %7 = vector.load %arg1[%c1, %c0_7] : memref<64x64xbf16, #tpu.memory_space<vmem>>, vector<55x64xbf16>
    %c128 = arith.constant 128 : index
    %c0_8 = arith.constant 0 : index
    %8 = vector.load %arg5[%c128, %c0_8] : memref<576x128xbf16, #tpu.memory_space<vmem>>, vector<64x128xbf16>
    %cst_9 = arith.constant dense<0.000000e+00> : vector<55x128xf32>
    %9 = tpu.matmul %7, %8, %cst_9 {dimension_numbers = #tpu.dot_dimension_numbers<[1], [0], [0], [1], [0, 0, 1, 1], [], []>} : vector<55x64xbf16>, vector<64x128xbf16>, vector<55x128xf32> -> vector<55x128xf32>
    %10 = arith.addf %6, %9 : vector<55x128xf32>
    %c0_10 = arith.constant 0 : index
    %c0_11 = arith.constant 0 : index
    %11 = vector.load %arg3[%c0_10, %c0_11] : memref<64x64xbf16, #tpu.memory_space<vmem>>, vector<55x64xbf16>
    %c192 = arith.constant 192 : index
    %c0_12 = arith.constant 0 : index
    %12 = vector.load %arg5[%c192, %c0_12] : memref<576x128xbf16, #tpu.memory_space<vmem>>, vector<64x128xbf16>
    %cst_13 = arith.constant dense<0.000000e+00> : vector<55x128xf32>
    %13 = tpu.matmul %11, %12, %cst_13 {dimension_numbers = #tpu.dot_dimension_numbers<[1], [0], [0], [1], [0, 0, 1, 1], [], []>} : vector<55x64xbf16>, vector<64x128xbf16>, vector<55x128xf32> -> vector<55x128xf32>
    %14 = arith.addf %10, %13 : vector<55x128xf32>
    %c0_14 = arith.constant 0 : index
    %c0_15 = arith.constant 0 : index
    %15 = vector.load %arg4[%c0_14, %c0_15] : memref<64x64xbf16, #tpu.memory_space<vmem>>, vector<55x64xbf16>
    %c256 = arith.constant 256 : index
    %c0_16 = arith.constant 0 : index
    %16 = vector.load %arg5[%c256, %c0_16] : memref<576x128xbf16, #tpu.memory_space<vmem>>, vector<64x128xbf16>
    %cst_17 = arith.constant dense<0.000000e+00> : vector<55x128xf32>
    %17 = tpu.matmul %15, %16, %cst_17 {dimension_numbers = #tpu.dot_dimension_numbers<[1], [0], [0], [1], [0, 0, 1, 1], [], []>} : vector<55x64xbf16>, vector<64x128xbf16>, vector<55x128xf32> -> vector<55x128xf32>
    %18 = arith.addf %14, %17 : vector<55x128xf32>
    %c1_18 = arith.constant 1 : index
    %c0_19 = arith.constant 0 : index
    %19 = vector.load %arg3[%c1_18, %c0_19] : memref<64x64xbf16, #tpu.memory_space<vmem>>, vector<55x64xbf16>
    %c320 = arith.constant 320 : index
    %c0_20 = arith.constant 0 : index
    %20 = vector.load %arg5[%c320, %c0_20] : memref<576x128xbf16, #tpu.memory_space<vmem>>, vector<64x128xbf16>
    %cst_21 = arith.constant dense<0.000000e+00> : vector<55x128xf32>
    %21 = tpu.matmul %19, %20, %cst_21 {dimension_numbers = #tpu.dot_dimension_numbers<[1], [0], [0], [1], [0, 0, 1, 1], [], []>} : vector<55x64xbf16>, vector<64x128xbf16>, vector<55x128xf32> -> vector<55x128xf32>
    %22 = arith.addf %18, %21 : vector<55x128xf32>
    %c8 = arith.constant 8 : index
    %c0_22 = arith.constant 0 : index
    %23 = vector.load %arg1[%c8, %c0_22] : memref<64x64xbf16, #tpu.memory_space<vmem>>, vector<55x64xbf16>
    %c384 = arith.constant 384 : index
    %c0_23 = arith.constant 0 : index
    %24 = vector.load %arg5[%c384, %c0_23] : memref<576x128xbf16, #tpu.memory_space<vmem>>, vector<64x128xbf16>
    %cst_24 = arith.constant dense<0.000000e+00> : vector<55x128xf32>
    %25 = tpu.matmul %23, %24, %cst_24 {dimension_numbers = #tpu.dot_dimension_numbers<[1], [0], [0], [1], [0, 0, 1, 1], [], []>} : vector<55x64xbf16>, vector<64x128xbf16>, vector<55x128xf32> -> vector<55x128xf32>
    %26 = arith.addf %22, %25 : vector<55x128xf32>
    %c8_25 = arith.constant 8 : index
    %c0_26 = arith.constant 0 : index
    %27 = vector.load %arg2[%c8_25, %c0_26] : memref<64x64xbf16, #tpu.memory_space<vmem>>, vector<55x64xbf16>
    %c448 = arith.constant 448 : index
    %c0_27 = arith.constant 0 : index
    %28 = vector.load %arg5[%c448, %c0_27] : memref<576x128xbf16, #tpu.memory_space<vmem>>, vector<64x128xbf16>
    %cst_28 = arith.constant dense<0.000000e+00> : vector<55x128xf32>
    %29 = tpu.matmul %27, %28, %cst_28 {dimension_numbers = #tpu.dot_dimension_numbers<[1], [0], [0], [1], [0, 0, 1, 1], [], []>} : vector<55x64xbf16>, vector<64x128xbf16>, vector<55x128xf32> -> vector<55x128xf32>
    %30 = arith.addf %26, %29 : vector<55x128xf32>
    %c9 = arith.constant 9 : index
    %c0_29 = arith.constant 0 : index
    %31 = vector.load %arg1[%c9, %c0_29] : memref<64x64xbf16, #tpu.memory_space<vmem>>, vector<55x64xbf16>
    %c512 = arith.constant 512 : index
    %c0_30 = arith.constant 0 : index
    %32 = vector.load %arg5[%c512, %c0_30] : memref<576x128xbf16, #tpu.memory_space<vmem>>, vector<64x128xbf16>
    %cst_31 = arith.constant dense<0.000000e+00> : vector<55x128xf32>
    %33 = tpu.matmul %31, %32, %cst_31 {dimension_numbers = #tpu.dot_dimension_numbers<[1], [0], [0], [1], [0, 0, 1, 1], [], []>} : vector<55x64xbf16>, vector<64x128xbf16>, vector<55x128xf32> -> vector<55x128xf32>
    %34 = arith.addf %30, %33 : vector<55x128xf32>
    %c0_32 = arith.constant 0 : index
    %c0_33 = arith.constant 0 : index
    %35 = vector.load %arg5[%c0_32, %c0_33] : memref<576x128xbf16, #tpu.memory_space<vmem>>, vector<64x128xbf16>
    %cst_34 = arith.constant dense<0.000000e+00> : vector<55x128xf32>
    %36 = tpu.matmul %3, %35, %cst_34 {dimension_numbers = #tpu.dot_dimension_numbers<[1], [0], [0], [1], [0, 0, 1, 1], [], []>} : vector<55x64xbf16>, vector<64x128xbf16>, vector<55x128xf32> -> vector<55x128xf32>
    %c64_35 = arith.constant 64 : index
    %c0_36 = arith.constant 0 : index
    %37 = vector.load %arg5[%c64_35, %c0_36] : memref<576x128xbf16, #tpu.memory_space<vmem>>, vector<64x128xbf16>
    %cst_37 = arith.constant dense<0.000000e+00> : vector<55x128xf32>
    %38 = tpu.matmul %7, %37, %cst_37 {dimension_numbers = #tpu.dot_dimension_numbers<[1], [0], [0], [1], [0, 0, 1, 1], [], []>} : vector<55x64xbf16>, vector<64x128xbf16>, vector<55x128xf32> -> vector<55x128xf32>
    %39 = arith.addf %36, %38 : vector<55x128xf32>
    %c1_38 = arith.constant 1 : index
    %c0_39 = arith.constant 0 : index
    %40 = vector.load %arg2[%c1_38, %c0_39] : memref<64x64xbf16, #tpu.memory_space<vmem>>, vector<55x64xbf16>
    %c128_40 = arith.constant 128 : index
    %c0_41 = arith.constant 0 : index
    %41 = vector.load %arg5[%c128_40, %c0_41] : memref<576x128xbf16, #tpu.memory_space<vmem>>, vector<64x128xbf16>
    %cst_42 = arith.constant dense<0.000000e+00> : vector<55x128xf32>
    %42 = tpu.matmul %40, %41, %cst_42 {dimension_numbers = #tpu.dot_dimension_numbers<[1], [0], [0], [1], [0, 0, 1, 1], [], []>} : vector<55x64xbf16>, vector<64x128xbf16>, vector<55x128xf32> -> vector<55x128xf32>
    %43 = arith.addf %39, %42 : vector<55x128xf32>
    %c192_43 = arith.constant 192 : index
    %c0_44 = arith.constant 0 : index
    %44 = vector.load %arg5[%c192_43, %c0_44] : memref<576x128xbf16, #tpu.memory_space<vmem>>, vector<64x128xbf16>
    %cst_45 = arith.constant dense<0.000000e+00> : vector<55x128xf32>
    %45 = tpu.matmul %15, %44, %cst_45 {dimension_numbers = #tpu.dot_dimension_numbers<[1], [0], [0], [1], [0, 0, 1, 1], [], []>} : vector<55x64xbf16>, vector<64x128xbf16>, vector<55x128xf32> -> vector<55x128xf32>
    %46 = arith.addf %43, %45 : vector<55x128xf32>
    %c256_46 = arith.constant 256 : index
    %c0_47 = arith.constant 0 : index
    %47 = vector.load %arg5[%c256_46, %c0_47] : memref<576x128xbf16, #tpu.memory_space<vmem>>, vector<64x128xbf16>
    %cst_48 = arith.constant dense<0.000000e+00> : vector<55x128xf32>
    %48 = tpu.matmul %19, %47, %cst_48 {dimension_numbers = #tpu.dot_dimension_numbers<[1], [0], [0], [1], [0, 0, 1, 1], [], []>} : vector<55x64xbf16>, vector<64x128xbf16>, vector<55x128xf32> -> vector<55x128xf32>
    %49 = arith.addf %46, %48 : vector<55x128xf32>
    %c1_49 = arith.constant 1 : index
    %c0_50 = arith.constant 0 : index
    %50 = vector.load %arg4[%c1_49, %c0_50] : memref<64x64xbf16, #tpu.memory_space<vmem>>, vector<55x64xbf16>
    %c320_51 = arith.constant 320 : index
    %c0_52 = arith.constant 0 : index
    %51 = vector.load %arg5[%c320_51, %c0_52] : memref<576x128xbf16, #tpu.memory_space<vmem>>, vector<64x128xbf16>
    %cst_53 = arith.constant dense<0.000000e+00> : vector<55x128xf32>
    %52 = tpu.matmul %50, %51, %cst_53 {dimension_numbers = #tpu.dot_dimension_numbers<[1], [0], [0], [1], [0, 0, 1, 1], [], []>} : vector<55x64xbf16>, vector<64x128xbf16>, vector<55x128xf32> -> vector<55x128xf32>
    %53 = arith.addf %49, %52 : vector<55x128xf32>
    %c384_54 = arith.constant 384 : index
    %c0_55 = arith.constant 0 : index
    %54 = vector.load %arg5[%c384_54, %c0_55] : memref<576x128xbf16, #tpu.memory_space<vmem>>, vector<64x128xbf16>
    %cst_56 = arith.constant dense<0.000000e+00> : vector<55x128xf32>
    %55 = tpu.matmul %27, %54, %cst_56 {dimension_numbers = #tpu.dot_dimension_numbers<[1], [0], [0], [1], [0, 0, 1, 1], [], []>} : vector<55x64xbf16>, vector<64x128xbf16>, vector<55x128xf32> -> vector<55x128xf32>
    %56 = arith.addf %53, %55 : vector<55x128xf32>
    %c448_57 = arith.constant 448 : index
    %c0_58 = arith.constant 0 : index
    %57 = vector.load %arg5[%c448_57, %c0_58] : memref<576x128xbf16, #tpu.memory_space<vmem>>, vector<64x128xbf16>
    %cst_59 = arith.constant dense<0.000000e+00> : vector<55x128xf32>
    %58 = tpu.matmul %31, %57, %cst_59 {dimension_numbers = #tpu.dot_dimension_numbers<[1], [0], [0], [1], [0, 0, 1, 1], [], []>} : vector<55x64xbf16>, vector<64x128xbf16>, vector<55x128xf32> -> vector<55x128xf32>
    %59 = arith.addf %56, %58 : vector<55x128xf32>
    %c9_60 = arith.constant 9 : index
    %c0_61 = arith.constant 0 : index
    %60 = vector.load %arg2[%c9_60, %c0_61] : memref<64x64xbf16, #tpu.memory_space<vmem>>, vector<55x64xbf16>
    %c512_62 = arith.constant 512 : index
    %c0_63 = arith.constant 0 : index
    %61 = vector.load %arg5[%c512_62, %c0_63] : memref<576x128xbf16, #tpu.memory_space<vmem>>, vector<64x128xbf16>
    %cst_64 = arith.constant dense<0.000000e+00> : vector<55x128xf32>
    %62 = tpu.matmul %60, %61, %cst_64 {dimension_numbers = #tpu.dot_dimension_numbers<[1], [0], [0], [1], [0, 0, 1, 1], [], []>} : vector<55x64xbf16>, vector<64x128xbf16>, vector<55x128xf32> -> vector<55x128xf32>
    %63 = arith.addf %59, %62 : vector<55x128xf32>
    %64 = arith.maximumf %34, %63 : vector<55x128xf32>
    %c0_65 = arith.constant 0 : index
    %c0_66 = arith.constant 0 : index
    %65 = vector.load %arg5[%c0_65, %c0_66] : memref<576x128xbf16, #tpu.memory_space<vmem>>, vector<64x128xbf16>
    %cst_67 = arith.constant dense<0.000000e+00> : vector<55x128xf32>
    %66 = tpu.matmul %11, %65, %cst_67 {dimension_numbers = #tpu.dot_dimension_numbers<[1], [0], [0], [1], [0, 0, 1, 1], [], []>} : vector<55x64xbf16>, vector<64x128xbf16>, vector<55x128xf32> -> vector<55x128xf32>
    %c64_68 = arith.constant 64 : index
    %c0_69 = arith.constant 0 : index
    %67 = vector.load %arg5[%c64_68, %c0_69] : memref<576x128xbf16, #tpu.memory_space<vmem>>, vector<64x128xbf16>
    %cst_70 = arith.constant dense<0.000000e+00> : vector<55x128xf32>
    %68 = tpu.matmul %15, %67, %cst_70 {dimension_numbers = #tpu.dot_dimension_numbers<[1], [0], [0], [1], [0, 0, 1, 1], [], []>} : vector<55x64xbf16>, vector<64x128xbf16>, vector<55x128xf32> -> vector<55x128xf32>
    %69 = arith.addf %66, %68 : vector<55x128xf32>
    %c128_71 = arith.constant 128 : index
    %c0_72 = arith.constant 0 : index
    %70 = vector.load %arg5[%c128_71, %c0_72] : memref<576x128xbf16, #tpu.memory_space<vmem>>, vector<64x128xbf16>
    %cst_73 = arith.constant dense<0.000000e+00> : vector<55x128xf32>
    %71 = tpu.matmul %19, %70, %cst_73 {dimension_numbers = #tpu.dot_dimension_numbers<[1], [0], [0], [1], [0, 0, 1, 1], [], []>} : vector<55x64xbf16>, vector<64x128xbf16>, vector<55x128xf32> -> vector<55x128xf32>
    %72 = arith.addf %69, %71 : vector<55x128xf32>
    %c192_74 = arith.constant 192 : index
    %c0_75 = arith.constant 0 : index
    %73 = vector.load %arg5[%c192_74, %c0_75] : memref<576x128xbf16, #tpu.memory_space<vmem>>, vector<64x128xbf16>
    %cst_76 = arith.constant dense<0.000000e+00> : vector<55x128xf32>
    %74 = tpu.matmul %23, %73, %cst_76 {dimension_numbers = #tpu.dot_dimension_numbers<[1], [0], [0], [1], [0, 0, 1, 1], [], []>} : vector<55x64xbf16>, vector<64x128xbf16>, vector<55x128xf32> -> vector<55x128xf32>
    %75 = arith.addf %72, %74 : vector<55x128xf32>
    %c256_77 = arith.constant 256 : index
    %c0_78 = arith.constant 0 : index
    %76 = vector.load %arg5[%c256_77, %c0_78] : memref<576x128xbf16, #tpu.memory_space<vmem>>, vector<64x128xbf16>
    %cst_79 = arith.constant dense<0.000000e+00> : vector<55x128xf32>
    %77 = tpu.matmul %27, %76, %cst_79 {dimension_numbers = #tpu.dot_dimension_numbers<[1], [0], [0], [1], [0, 0, 1, 1], [], []>} : vector<55x64xbf16>, vector<64x128xbf16>, vector<55x128xf32> -> vector<55x128xf32>
    %78 = arith.addf %75, %77 : vector<55x128xf32>
    %c320_80 = arith.constant 320 : index
    %c0_81 = arith.constant 0 : index
    %79 = vector.load %arg5[%c320_80, %c0_81] : memref<576x128xbf16, #tpu.memory_space<vmem>>, vector<64x128xbf16>
    %cst_82 = arith.constant dense<0.000000e+00> : vector<55x128xf32>
    %80 = tpu.matmul %31, %79, %cst_82 {dimension_numbers = #tpu.dot_dimension_numbers<[1], [0], [0], [1], [0, 0, 1, 1], [], []>} : vector<55x64xbf16>, vector<64x128xbf16>, vector<55x128xf32> -> vector<55x128xf32>
    %81 = arith.addf %78, %80 : vector<55x128xf32>
    %c8_83 = arith.constant 8 : index
    %c0_84 = arith.constant 0 : index
    %82 = vector.load %arg3[%c8_83, %c0_84] : memref<64x64xbf16, #tpu.memory_space<vmem>>, vector<55x64xbf16>
    %c384_85 = arith.constant 384 : index
    %c0_86 = arith.constant 0 : index
    %83 = vector.load %arg5[%c384_85, %c0_86] : memref<576x128xbf16, #tpu.memory_space<vmem>>, vector<64x128xbf16>
    %cst_87 = arith.constant dense<0.000000e+00> : vector<55x128xf32>
    %84 = tpu.matmul %82, %83, %cst_87 {dimension_numbers = #tpu.dot_dimension_numbers<[1], [0], [0], [1], [0, 0, 1, 1], [], []>} : vector<55x64xbf16>, vector<64x128xbf16>, vector<55x128xf32> -> vector<55x128xf32>
    %85 = arith.addf %81, %84 : vector<55x128xf32>
    %c8_88 = arith.constant 8 : index
    %c0_89 = arith.constant 0 : index
    %86 = vector.load %arg4[%c8_88, %c0_89] : memref<64x64xbf16, #tpu.memory_space<vmem>>, vector<55x64xbf16>
    %c448_90 = arith.constant 448 : index
    %c0_91 = arith.constant 0 : index
    %87 = vector.load %arg5[%c448_90, %c0_91] : memref<576x128xbf16, #tpu.memory_space<vmem>>, vector<64x128xbf16>
    %cst_92 = arith.constant dense<0.000000e+00> : vector<55x128xf32>
    %88 = tpu.matmul %86, %87, %cst_92 {dimension_numbers = #tpu.dot_dimension_numbers<[1], [0], [0], [1], [0, 0, 1, 1], [], []>} : vector<55x64xbf16>, vector<64x128xbf16>, vector<55x128xf32> -> vector<55x128xf32>
    %89 = arith.addf %85, %88 : vector<55x128xf32>
    %c9_93 = arith.constant 9 : index
    %c0_94 = arith.constant 0 : index
    %90 = vector.load %arg3[%c9_93, %c0_94] : memref<64x64xbf16, #tpu.memory_space<vmem>>, vector<55x64xbf16>
    %c512_95 = arith.constant 512 : index
    %c0_96 = arith.constant 0 : index
    %91 = vector.load %arg5[%c512_95, %c0_96] : memref<576x128xbf16, #tpu.memory_space<vmem>>, vector<64x128xbf16>
    %cst_97 = arith.constant dense<0.000000e+00> : vector<55x128xf32>
    %92 = tpu.matmul %90, %91, %cst_97 {dimension_numbers = #tpu.dot_dimension_numbers<[1], [0], [0], [1], [0, 0, 1, 1], [], []>} : vector<55x64xbf16>, vector<64x128xbf16>, vector<55x128xf32> -> vector<55x128xf32>
    %93 = arith.addf %89, %92 : vector<55x128xf32>
    %94 = arith.maximumf %64, %93 : vector<55x128xf32>
    %c0_98 = arith.constant 0 : index
    %c0_99 = arith.constant 0 : index
    %95 = vector.load %arg5[%c0_98, %c0_99] : memref<576x128xbf16, #tpu.memory_space<vmem>>, vector<64x128xbf16>
    %cst_100 = arith.constant dense<0.000000e+00> : vector<55x128xf32>
    %96 = tpu.matmul %15, %95, %cst_100 {dimension_numbers = #tpu.dot_dimension_numbers<[1], [0], [0], [1], [0, 0, 1, 1], [], []>} : vector<55x64xbf16>, vector<64x128xbf16>, vector<55x128xf32> -> vector<55x128xf32>
    %c64_101 = arith.constant 64 : index
    %c0_102 = arith.constant 0 : index
    %97 = vector.load %arg5[%c64_101, %c0_102] : memref<576x128xbf16, #tpu.memory_space<vmem>>, vector<64x128xbf16>
    %cst_103 = arith.constant dense<0.000000e+00> : vector<55x128xf32>
    %98 = tpu.matmul %19, %97, %cst_103 {dimension_numbers = #tpu.dot_dimension_numbers<[1], [0], [0], [1], [0, 0, 1, 1], [], []>} : vector<55x64xbf16>, vector<64x128xbf16>, vector<55x128xf32> -> vector<55x128xf32>
    %99 = arith.addf %96, %98 : vector<55x128xf32>
    %c128_104 = arith.constant 128 : index
    %c0_105 = arith.constant 0 : index
    %100 = vector.load %arg5[%c128_104, %c0_105] : memref<576x128xbf16, #tpu.memory_space<vmem>>, vector<64x128xbf16>
    %cst_106 = arith.constant dense<0.000000e+00> : vector<55x128xf32>
    %101 = tpu.matmul %50, %100, %cst_106 {dimension_numbers = #tpu.dot_dimension_numbers<[1], [0], [0], [1], [0, 0, 1, 1], [], []>} : vector<55x64xbf16>, vector<64x128xbf16>, vector<55x128xf32> -> vector<55x128xf32>
    %102 = arith.addf %99, %101 : vector<55x128xf32>
    %c192_107 = arith.constant 192 : index
    %c0_108 = arith.constant 0 : index
    %103 = vector.load %arg5[%c192_107, %c0_108] : memref<576x128xbf16, #tpu.memory_space<vmem>>, vector<64x128xbf16>
    %cst_109 = arith.constant dense<0.000000e+00> : vector<55x128xf32>
    %104 = tpu.matmul %27, %103, %cst_109 {dimension_numbers = #tpu.dot_dimension_numbers<[1], [0], [0], [1], [0, 0, 1, 1], [], []>} : vector<55x64xbf16>, vector<64x128xbf16>, vector<55x128xf32> -> vector<55x128xf32>
    %105 = arith.addf %102, %104 : vector<55x128xf32>
    %c256_110 = arith.constant 256 : index
    %c0_111 = arith.constant 0 : index
    %106 = vector.load %arg5[%c256_110, %c0_111] : memref<576x128xbf16, #tpu.memory_space<vmem>>, vector<64x128xbf16>
    %cst_112 = arith.constant dense<0.000000e+00> : vector<55x128xf32>
    %107 = tpu.matmul %31, %106, %cst_112 {dimension_numbers = #tpu.dot_dimension_numbers<[1], [0], [0], [1], [0, 0, 1, 1], [], []>} : vector<55x64xbf16>, vector<64x128xbf16>, vector<55x128xf32> -> vector<55x128xf32>
    %108 = arith.addf %105, %107 : vector<55x128xf32>
    %c320_113 = arith.constant 320 : index
    %c0_114 = arith.constant 0 : index
    %109 = vector.load %arg5[%c320_113, %c0_114] : memref<576x128xbf16, #tpu.memory_space<vmem>>, vector<64x128xbf16>
    %cst_115 = arith.constant dense<0.000000e+00> : vector<55x128xf32>
    %110 = tpu.matmul %60, %109, %cst_115 {dimension_numbers = #tpu.dot_dimension_numbers<[1], [0], [0], [1], [0, 0, 1, 1], [], []>} : vector<55x64xbf16>, vector<64x128xbf16>, vector<55x128xf32> -> vector<55x128xf32>
    %111 = arith.addf %108, %110 : vector<55x128xf32>
    %c384_116 = arith.constant 384 : index
    %c0_117 = arith.constant 0 : index
    %112 = vector.load %arg5[%c384_116, %c0_117] : memref<576x128xbf16, #tpu.memory_space<vmem>>, vector<64x128xbf16>
    %cst_118 = arith.constant dense<0.000000e+00> : vector<55x128xf32>
    %113 = tpu.matmul %86, %112, %cst_118 {dimension_numbers = #tpu.dot_dimension_numbers<[1], [0], [0], [1], [0, 0, 1, 1], [], []>} : vector<55x64xbf16>, vector<64x128xbf16>, vector<55x128xf32> -> vector<55x128xf32>
    %114 = arith.addf %111, %113 : vector<55x128xf32>
    %c448_119 = arith.constant 448 : index
    %c0_120 = arith.constant 0 : index
    %115 = vector.load %arg5[%c448_119, %c0_120] : memref<576x128xbf16, #tpu.memory_space<vmem>>, vector<64x128xbf16>
    %cst_121 = arith.constant dense<0.000000e+00> : vector<55x128xf32>
    %116 = tpu.matmul %90, %115, %cst_121 {dimension_numbers = #tpu.dot_dimension_numbers<[1], [0], [0], [1], [0, 0, 1, 1], [], []>} : vector<55x64xbf16>, vector<64x128xbf16>, vector<55x128xf32> -> vector<55x128xf32>
    %117 = arith.addf %114, %116 : vector<55x128xf32>
    %c9_122 = arith.constant 9 : index
    %c0_123 = arith.constant 0 : index
    %118 = vector.load %arg4[%c9_122, %c0_123] : memref<64x64xbf16, #tpu.memory_space<vmem>>, vector<55x64xbf16>
    %c512_124 = arith.constant 512 : index
    %c0_125 = arith.constant 0 : index
    %119 = vector.load %arg5[%c512_124, %c0_125] : memref<576x128xbf16, #tpu.memory_space<vmem>>, vector<64x128xbf16>
    %cst_126 = arith.constant dense<0.000000e+00> : vector<55x128xf32>
    %120 = tpu.matmul %118, %119, %cst_126 {dimension_numbers = #tpu.dot_dimension_numbers<[1], [0], [0], [1], [0, 0, 1, 1], [], []>} : vector<55x64xbf16>, vector<64x128xbf16>, vector<55x128xf32> -> vector<55x128xf32>
    %121 = arith.addf %117, %120 : vector<55x128xf32>
    %122 = arith.maximumf %94, %121 : vector<55x128xf32>
    %c0_127 = arith.constant 0 : index
    %c0_128 = arith.constant 0 : index
    %123 = vector.load %arg6[%c0_127, %c0_128] : memref<1x128xf32, #tpu.memory_space<vmem>>, vector<1x128xf32>
    %124 = vector.broadcast %123 : vector<1x128xf32> to vector<55x128xf32>
    %125 = arith.addf %122, %124 : vector<55x128xf32>
    %cst_129 = arith.constant 0.000000e+00 : f32
    %126 = vector.broadcast %cst_129 : f32 to vector<55x128xf32>
    %127 = arith.maximumf %125, %126 : vector<55x128xf32>
    %128 = arith.truncf %127 : vector<55x128xf32> to vector<55x128xbf16>
    %c0_130 = arith.constant 0 : index
    %c0_131 = arith.constant 0 : index
    %129 = vector.load %arg7[%c0_130, %c0_131] : memref<64x128xbf16, #tpu.memory_space<vmem>>, vector<55x128xbf16>
    tpu.vector_store %arg7[%c0_130, %c0_131], %128 {strides = array<i32>} : memref<64x128xbf16, #tpu.memory_space<vmem>>, vector<55x128xbf16>,
    %cst_132 = arith.constant 0.000000e+00 : bf16
    %130 = vector.broadcast %cst_132 : bf16 to vector<9x128xbf16>
    %c55 = arith.constant 55 : index
    %c0_133 = arith.constant 0 : index
    %131 = vector.load %arg7[%c55, %c0_133] : memref<64x128xbf16, #tpu.memory_space<vmem>>, vector<9x128xbf16>
    tpu.vector_store %arg7[%c55, %c0_133], %130 {strides = array<i32>} : memref<64x128xbf16, #tpu.memory_space<vmem>>, vector<9x128xbf16>,
    return
  }
  func.func @transform_0(%arg0: i32) -> (i32, i32) {
    %c0_i32 = arith.constant 0 : i32
    %c0_i32_0 = arith.constant 0 : i32
    return %arg0, %c0_i32 : i32, i32
  }
  func.func @transform_1(%arg0: i32) -> (i32, i32) {
    %c0_i32 = arith.constant 0 : i32
    %c0_i32_0 = arith.constant 0 : i32
    return %arg0, %c0_i32 : i32, i32
  }
  func.func @transform_2(%arg0: i32) -> (i32, i32) {
    %c0_i32 = arith.constant 0 : i32
    %c0_i32_0 = arith.constant 0 : i32
    return %arg0, %c0_i32 : i32, i32
  }
  func.func @transform_3(%arg0: i32) -> (i32, i32) {
    %c0_i32 = arith.constant 0 : i32
    %c0_i32_0 = arith.constant 0 : i32
    return %arg0, %c0_i32 : i32, i32
  }
  func.func @transform_4(%arg0: i32) -> (i32, i32) {
    %c0_i32 = arith.constant 0 : i32
    %c0_i32_0 = arith.constant 0 : i32
    %c0_i32_1 = arith.constant 0 : i32
    return %c0_i32, %c0_i32_0 : i32, i32
  }
  func.func @transform_5(%arg0: i32) -> (i32, i32) {
    %c0_i32 = arith.constant 0 : i32
    %c0_i32_0 = arith.constant 0 : i32
    %c0_i32_1 = arith.constant 0 : i32
    return %c0_i32, %c0_i32_0 : i32, i32
  }
  func.func @transform_6(%arg0: i32) -> (i32, i32) {
    %c0_i32 = arith.constant 0 : i32
    %c0_i32_0 = arith.constant 0 : i32
    return %arg0, %c0_i32 : i32, i32
  }
}

module attributes {stable_mosaic.version = 11 : i64} {
  func.func @_conv_pool_plane_kernel(%arg0: i32, %arg1: memref<16x128xbf16, #tpu.memory_space<vmem>>, %arg2: memref<16x128xbf16, #tpu.memory_space<vmem>>, %arg3: memref<16x128xbf16, #tpu.memory_space<vmem>>, %arg4: memref<16x128xbf16, #tpu.memory_space<vmem>>, %arg5: memref<1152x256xbf16, #tpu.memory_space<vmem>>, %arg6: memref<1x256xf32, #tpu.memory_space<vmem>>, %arg7: memref<16x256xbf16, #tpu.memory_space<vmem>>) attributes {dimension_semantics = [#tpu.dimension_semantics<parallel>], iteration_bounds = array<i64: 2>, scalar_prefetch = 0 : i64, scratch_operands = 0 : i64, tpu.core_type = #tpu.core_type<tc>, window_params = [{transform_indices = @transform_0, window_bounds = array<i64: 16, 128>}, {transform_indices = @transform_1, window_bounds = array<i64: 16, 128>}, {transform_indices = @transform_2, window_bounds = array<i64: 16, 128>}, {transform_indices = @transform_3, window_bounds = array<i64: 16, 128>}, {pipeline_mode = #tpu.pipeline_mode<synchronous>, transform_indices = @transform_4, window_bounds = array<i64: 1152, 256>}, {pipeline_mode = #tpu.pipeline_mode<synchronous>, transform_indices = @transform_5, window_bounds = array<i64: 1, 256>}, {transform_indices = @transform_6, window_bounds = array<i64: 16, 256>}]} {
    %c0 = arith.constant 0 : index
    %c0_0 = arith.constant 0 : index
    %0 = vector.load %arg1[%c0, %c0_0] : memref<16x128xbf16, #tpu.memory_space<vmem>>, vector<11x128xbf16>
    %c0_1 = arith.constant 0 : index
    %c0_2 = arith.constant 0 : index
    %1 = vector.load %arg5[%c0_1, %c0_2] : memref<1152x256xbf16, #tpu.memory_space<vmem>>, vector<128x256xbf16>
    %cst = arith.constant dense<0.000000e+00> : vector<11x256xf32>
    %2 = tpu.matmul %0, %1, %cst {dimension_numbers = #tpu.dot_dimension_numbers<[1], [0], [0], [1], [0, 0, 1, 1], [], []>} : vector<11x128xbf16>, vector<128x256xbf16>, vector<11x256xf32> -> vector<11x256xf32>
    %c0_3 = arith.constant 0 : index
    %c0_4 = arith.constant 0 : index
    %3 = vector.load %arg2[%c0_3, %c0_4] : memref<16x128xbf16, #tpu.memory_space<vmem>>, vector<11x128xbf16>
    %c128 = arith.constant 128 : index
    %c0_5 = arith.constant 0 : index
    %4 = vector.load %arg5[%c128, %c0_5] : memref<1152x256xbf16, #tpu.memory_space<vmem>>, vector<128x256xbf16>
    %cst_6 = arith.constant dense<0.000000e+00> : vector<11x256xf32>
    %5 = tpu.matmul %3, %4, %cst_6 {dimension_numbers = #tpu.dot_dimension_numbers<[1], [0], [0], [1], [0, 0, 1, 1], [], []>} : vector<11x128xbf16>, vector<128x256xbf16>, vector<11x256xf32> -> vector<11x256xf32>
    %6 = arith.addf %2, %5 : vector<11x256xf32>
    %c1 = arith.constant 1 : index
    %c0_7 = arith.constant 0 : index
    %7 = vector.load %arg1[%c1, %c0_7] : memref<16x128xbf16, #tpu.memory_space<vmem>>, vector<11x128xbf16>
    %c256 = arith.constant 256 : index
    %c0_8 = arith.constant 0 : index
    %8 = vector.load %arg5[%c256, %c0_8] : memref<1152x256xbf16, #tpu.memory_space<vmem>>, vector<128x256xbf16>
    %cst_9 = arith.constant dense<0.000000e+00> : vector<11x256xf32>
    %9 = tpu.matmul %7, %8, %cst_9 {dimension_numbers = #tpu.dot_dimension_numbers<[1], [0], [0], [1], [0, 0, 1, 1], [], []>} : vector<11x128xbf16>, vector<128x256xbf16>, vector<11x256xf32> -> vector<11x256xf32>
    %10 = arith.addf %6, %9 : vector<11x256xf32>
    %c0_10 = arith.constant 0 : index
    %c0_11 = arith.constant 0 : index
    %11 = vector.load %arg3[%c0_10, %c0_11] : memref<16x128xbf16, #tpu.memory_space<vmem>>, vector<11x128xbf16>
    %c384 = arith.constant 384 : index
    %c0_12 = arith.constant 0 : index
    %12 = vector.load %arg5[%c384, %c0_12] : memref<1152x256xbf16, #tpu.memory_space<vmem>>, vector<128x256xbf16>
    %cst_13 = arith.constant dense<0.000000e+00> : vector<11x256xf32>
    %13 = tpu.matmul %11, %12, %cst_13 {dimension_numbers = #tpu.dot_dimension_numbers<[1], [0], [0], [1], [0, 0, 1, 1], [], []>} : vector<11x128xbf16>, vector<128x256xbf16>, vector<11x256xf32> -> vector<11x256xf32>
    %14 = arith.addf %10, %13 : vector<11x256xf32>
    %c0_14 = arith.constant 0 : index
    %c0_15 = arith.constant 0 : index
    %15 = vector.load %arg4[%c0_14, %c0_15] : memref<16x128xbf16, #tpu.memory_space<vmem>>, vector<11x128xbf16>
    %c512 = arith.constant 512 : index
    %c0_16 = arith.constant 0 : index
    %16 = vector.load %arg5[%c512, %c0_16] : memref<1152x256xbf16, #tpu.memory_space<vmem>>, vector<128x256xbf16>
    %cst_17 = arith.constant dense<0.000000e+00> : vector<11x256xf32>
    %17 = tpu.matmul %15, %16, %cst_17 {dimension_numbers = #tpu.dot_dimension_numbers<[1], [0], [0], [1], [0, 0, 1, 1], [], []>} : vector<11x128xbf16>, vector<128x256xbf16>, vector<11x256xf32> -> vector<11x256xf32>
    %18 = arith.addf %14, %17 : vector<11x256xf32>
    %c1_18 = arith.constant 1 : index
    %c0_19 = arith.constant 0 : index
    %19 = vector.load %arg3[%c1_18, %c0_19] : memref<16x128xbf16, #tpu.memory_space<vmem>>, vector<11x128xbf16>
    %c640 = arith.constant 640 : index
    %c0_20 = arith.constant 0 : index
    %20 = vector.load %arg5[%c640, %c0_20] : memref<1152x256xbf16, #tpu.memory_space<vmem>>, vector<128x256xbf16>
    %cst_21 = arith.constant dense<0.000000e+00> : vector<11x256xf32>
    %21 = tpu.matmul %19, %20, %cst_21 {dimension_numbers = #tpu.dot_dimension_numbers<[1], [0], [0], [1], [0, 0, 1, 1], [], []>} : vector<11x128xbf16>, vector<128x256xbf16>, vector<11x256xf32> -> vector<11x256xf32>
    %22 = arith.addf %18, %21 : vector<11x256xf32>
    %c4 = arith.constant 4 : index
    %c0_22 = arith.constant 0 : index
    %23 = vector.load %arg1[%c4, %c0_22] : memref<16x128xbf16, #tpu.memory_space<vmem>>, vector<11x128xbf16>
    %c768 = arith.constant 768 : index
    %c0_23 = arith.constant 0 : index
    %24 = vector.load %arg5[%c768, %c0_23] : memref<1152x256xbf16, #tpu.memory_space<vmem>>, vector<128x256xbf16>
    %cst_24 = arith.constant dense<0.000000e+00> : vector<11x256xf32>
    %25 = tpu.matmul %23, %24, %cst_24 {dimension_numbers = #tpu.dot_dimension_numbers<[1], [0], [0], [1], [0, 0, 1, 1], [], []>} : vector<11x128xbf16>, vector<128x256xbf16>, vector<11x256xf32> -> vector<11x256xf32>
    %26 = arith.addf %22, %25 : vector<11x256xf32>
    %c4_25 = arith.constant 4 : index
    %c0_26 = arith.constant 0 : index
    %27 = vector.load %arg2[%c4_25, %c0_26] : memref<16x128xbf16, #tpu.memory_space<vmem>>, vector<11x128xbf16>
    %c896 = arith.constant 896 : index
    %c0_27 = arith.constant 0 : index
    %28 = vector.load %arg5[%c896, %c0_27] : memref<1152x256xbf16, #tpu.memory_space<vmem>>, vector<128x256xbf16>
    %cst_28 = arith.constant dense<0.000000e+00> : vector<11x256xf32>
    %29 = tpu.matmul %27, %28, %cst_28 {dimension_numbers = #tpu.dot_dimension_numbers<[1], [0], [0], [1], [0, 0, 1, 1], [], []>} : vector<11x128xbf16>, vector<128x256xbf16>, vector<11x256xf32> -> vector<11x256xf32>
    %30 = arith.addf %26, %29 : vector<11x256xf32>
    %c5 = arith.constant 5 : index
    %c0_29 = arith.constant 0 : index
    %31 = vector.load %arg1[%c5, %c0_29] : memref<16x128xbf16, #tpu.memory_space<vmem>>, vector<11x128xbf16>
    %c1024 = arith.constant 1024 : index
    %c0_30 = arith.constant 0 : index
    %32 = vector.load %arg5[%c1024, %c0_30] : memref<1152x256xbf16, #tpu.memory_space<vmem>>, vector<128x256xbf16>
    %cst_31 = arith.constant dense<0.000000e+00> : vector<11x256xf32>
    %33 = tpu.matmul %31, %32, %cst_31 {dimension_numbers = #tpu.dot_dimension_numbers<[1], [0], [0], [1], [0, 0, 1, 1], [], []>} : vector<11x128xbf16>, vector<128x256xbf16>, vector<11x256xf32> -> vector<11x256xf32>
    %34 = arith.addf %30, %33 : vector<11x256xf32>
    %c0_32 = arith.constant 0 : index
    %c0_33 = arith.constant 0 : index
    %35 = vector.load %arg5[%c0_32, %c0_33] : memref<1152x256xbf16, #tpu.memory_space<vmem>>, vector<128x256xbf16>
    %cst_34 = arith.constant dense<0.000000e+00> : vector<11x256xf32>
    %36 = tpu.matmul %3, %35, %cst_34 {dimension_numbers = #tpu.dot_dimension_numbers<[1], [0], [0], [1], [0, 0, 1, 1], [], []>} : vector<11x128xbf16>, vector<128x256xbf16>, vector<11x256xf32> -> vector<11x256xf32>
    %c128_35 = arith.constant 128 : index
    %c0_36 = arith.constant 0 : index
    %37 = vector.load %arg5[%c128_35, %c0_36] : memref<1152x256xbf16, #tpu.memory_space<vmem>>, vector<128x256xbf16>
    %cst_37 = arith.constant dense<0.000000e+00> : vector<11x256xf32>
    %38 = tpu.matmul %7, %37, %cst_37 {dimension_numbers = #tpu.dot_dimension_numbers<[1], [0], [0], [1], [0, 0, 1, 1], [], []>} : vector<11x128xbf16>, vector<128x256xbf16>, vector<11x256xf32> -> vector<11x256xf32>
    %39 = arith.addf %36, %38 : vector<11x256xf32>
    %c1_38 = arith.constant 1 : index
    %c0_39 = arith.constant 0 : index
    %40 = vector.load %arg2[%c1_38, %c0_39] : memref<16x128xbf16, #tpu.memory_space<vmem>>, vector<11x128xbf16>
    %c256_40 = arith.constant 256 : index
    %c0_41 = arith.constant 0 : index
    %41 = vector.load %arg5[%c256_40, %c0_41] : memref<1152x256xbf16, #tpu.memory_space<vmem>>, vector<128x256xbf16>
    %cst_42 = arith.constant dense<0.000000e+00> : vector<11x256xf32>
    %42 = tpu.matmul %40, %41, %cst_42 {dimension_numbers = #tpu.dot_dimension_numbers<[1], [0], [0], [1], [0, 0, 1, 1], [], []>} : vector<11x128xbf16>, vector<128x256xbf16>, vector<11x256xf32> -> vector<11x256xf32>
    %43 = arith.addf %39, %42 : vector<11x256xf32>
    %c384_43 = arith.constant 384 : index
    %c0_44 = arith.constant 0 : index
    %44 = vector.load %arg5[%c384_43, %c0_44] : memref<1152x256xbf16, #tpu.memory_space<vmem>>, vector<128x256xbf16>
    %cst_45 = arith.constant dense<0.000000e+00> : vector<11x256xf32>
    %45 = tpu.matmul %15, %44, %cst_45 {dimension_numbers = #tpu.dot_dimension_numbers<[1], [0], [0], [1], [0, 0, 1, 1], [], []>} : vector<11x128xbf16>, vector<128x256xbf16>, vector<11x256xf32> -> vector<11x256xf32>
    %46 = arith.addf %43, %45 : vector<11x256xf32>
    %c512_46 = arith.constant 512 : index
    %c0_47 = arith.constant 0 : index
    %47 = vector.load %arg5[%c512_46, %c0_47] : memref<1152x256xbf16, #tpu.memory_space<vmem>>, vector<128x256xbf16>
    %cst_48 = arith.constant dense<0.000000e+00> : vector<11x256xf32>
    %48 = tpu.matmul %19, %47, %cst_48 {dimension_numbers = #tpu.dot_dimension_numbers<[1], [0], [0], [1], [0, 0, 1, 1], [], []>} : vector<11x128xbf16>, vector<128x256xbf16>, vector<11x256xf32> -> vector<11x256xf32>
    %49 = arith.addf %46, %48 : vector<11x256xf32>
    %c1_49 = arith.constant 1 : index
    %c0_50 = arith.constant 0 : index
    %50 = vector.load %arg4[%c1_49, %c0_50] : memref<16x128xbf16, #tpu.memory_space<vmem>>, vector<11x128xbf16>
    %c640_51 = arith.constant 640 : index
    %c0_52 = arith.constant 0 : index
    %51 = vector.load %arg5[%c640_51, %c0_52] : memref<1152x256xbf16, #tpu.memory_space<vmem>>, vector<128x256xbf16>
    %cst_53 = arith.constant dense<0.000000e+00> : vector<11x256xf32>
    %52 = tpu.matmul %50, %51, %cst_53 {dimension_numbers = #tpu.dot_dimension_numbers<[1], [0], [0], [1], [0, 0, 1, 1], [], []>} : vector<11x128xbf16>, vector<128x256xbf16>, vector<11x256xf32> -> vector<11x256xf32>
    %53 = arith.addf %49, %52 : vector<11x256xf32>
    %c768_54 = arith.constant 768 : index
    %c0_55 = arith.constant 0 : index
    %54 = vector.load %arg5[%c768_54, %c0_55] : memref<1152x256xbf16, #tpu.memory_space<vmem>>, vector<128x256xbf16>
    %cst_56 = arith.constant dense<0.000000e+00> : vector<11x256xf32>
    %55 = tpu.matmul %27, %54, %cst_56 {dimension_numbers = #tpu.dot_dimension_numbers<[1], [0], [0], [1], [0, 0, 1, 1], [], []>} : vector<11x128xbf16>, vector<128x256xbf16>, vector<11x256xf32> -> vector<11x256xf32>
    %56 = arith.addf %53, %55 : vector<11x256xf32>
    %c896_57 = arith.constant 896 : index
    %c0_58 = arith.constant 0 : index
    %57 = vector.load %arg5[%c896_57, %c0_58] : memref<1152x256xbf16, #tpu.memory_space<vmem>>, vector<128x256xbf16>
    %cst_59 = arith.constant dense<0.000000e+00> : vector<11x256xf32>
    %58 = tpu.matmul %31, %57, %cst_59 {dimension_numbers = #tpu.dot_dimension_numbers<[1], [0], [0], [1], [0, 0, 1, 1], [], []>} : vector<11x128xbf16>, vector<128x256xbf16>, vector<11x256xf32> -> vector<11x256xf32>
    %59 = arith.addf %56, %58 : vector<11x256xf32>
    %c5_60 = arith.constant 5 : index
    %c0_61 = arith.constant 0 : index
    %60 = vector.load %arg2[%c5_60, %c0_61] : memref<16x128xbf16, #tpu.memory_space<vmem>>, vector<11x128xbf16>
    %c1024_62 = arith.constant 1024 : index
    %c0_63 = arith.constant 0 : index
    %61 = vector.load %arg5[%c1024_62, %c0_63] : memref<1152x256xbf16, #tpu.memory_space<vmem>>, vector<128x256xbf16>
    %cst_64 = arith.constant dense<0.000000e+00> : vector<11x256xf32>
    %62 = tpu.matmul %60, %61, %cst_64 {dimension_numbers = #tpu.dot_dimension_numbers<[1], [0], [0], [1], [0, 0, 1, 1], [], []>} : vector<11x128xbf16>, vector<128x256xbf16>, vector<11x256xf32> -> vector<11x256xf32>
    %63 = arith.addf %59, %62 : vector<11x256xf32>
    %64 = arith.maximumf %34, %63 : vector<11x256xf32>
    %c0_65 = arith.constant 0 : index
    %c0_66 = arith.constant 0 : index
    %65 = vector.load %arg5[%c0_65, %c0_66] : memref<1152x256xbf16, #tpu.memory_space<vmem>>, vector<128x256xbf16>
    %cst_67 = arith.constant dense<0.000000e+00> : vector<11x256xf32>
    %66 = tpu.matmul %11, %65, %cst_67 {dimension_numbers = #tpu.dot_dimension_numbers<[1], [0], [0], [1], [0, 0, 1, 1], [], []>} : vector<11x128xbf16>, vector<128x256xbf16>, vector<11x256xf32> -> vector<11x256xf32>
    %c128_68 = arith.constant 128 : index
    %c0_69 = arith.constant 0 : index
    %67 = vector.load %arg5[%c128_68, %c0_69] : memref<1152x256xbf16, #tpu.memory_space<vmem>>, vector<128x256xbf16>
    %cst_70 = arith.constant dense<0.000000e+00> : vector<11x256xf32>
    %68 = tpu.matmul %15, %67, %cst_70 {dimension_numbers = #tpu.dot_dimension_numbers<[1], [0], [0], [1], [0, 0, 1, 1], [], []>} : vector<11x128xbf16>, vector<128x256xbf16>, vector<11x256xf32> -> vector<11x256xf32>
    %69 = arith.addf %66, %68 : vector<11x256xf32>
    %c256_71 = arith.constant 256 : index
    %c0_72 = arith.constant 0 : index
    %70 = vector.load %arg5[%c256_71, %c0_72] : memref<1152x256xbf16, #tpu.memory_space<vmem>>, vector<128x256xbf16>
    %cst_73 = arith.constant dense<0.000000e+00> : vector<11x256xf32>
    %71 = tpu.matmul %19, %70, %cst_73 {dimension_numbers = #tpu.dot_dimension_numbers<[1], [0], [0], [1], [0, 0, 1, 1], [], []>} : vector<11x128xbf16>, vector<128x256xbf16>, vector<11x256xf32> -> vector<11x256xf32>
    %72 = arith.addf %69, %71 : vector<11x256xf32>
    %c384_74 = arith.constant 384 : index
    %c0_75 = arith.constant 0 : index
    %73 = vector.load %arg5[%c384_74, %c0_75] : memref<1152x256xbf16, #tpu.memory_space<vmem>>, vector<128x256xbf16>
    %cst_76 = arith.constant dense<0.000000e+00> : vector<11x256xf32>
    %74 = tpu.matmul %23, %73, %cst_76 {dimension_numbers = #tpu.dot_dimension_numbers<[1], [0], [0], [1], [0, 0, 1, 1], [], []>} : vector<11x128xbf16>, vector<128x256xbf16>, vector<11x256xf32> -> vector<11x256xf32>
    %75 = arith.addf %72, %74 : vector<11x256xf32>
    %c512_77 = arith.constant 512 : index
    %c0_78 = arith.constant 0 : index
    %76 = vector.load %arg5[%c512_77, %c0_78] : memref<1152x256xbf16, #tpu.memory_space<vmem>>, vector<128x256xbf16>
    %cst_79 = arith.constant dense<0.000000e+00> : vector<11x256xf32>
    %77 = tpu.matmul %27, %76, %cst_79 {dimension_numbers = #tpu.dot_dimension_numbers<[1], [0], [0], [1], [0, 0, 1, 1], [], []>} : vector<11x128xbf16>, vector<128x256xbf16>, vector<11x256xf32> -> vector<11x256xf32>
    %78 = arith.addf %75, %77 : vector<11x256xf32>
    %c640_80 = arith.constant 640 : index
    %c0_81 = arith.constant 0 : index
    %79 = vector.load %arg5[%c640_80, %c0_81] : memref<1152x256xbf16, #tpu.memory_space<vmem>>, vector<128x256xbf16>
    %cst_82 = arith.constant dense<0.000000e+00> : vector<11x256xf32>
    %80 = tpu.matmul %31, %79, %cst_82 {dimension_numbers = #tpu.dot_dimension_numbers<[1], [0], [0], [1], [0, 0, 1, 1], [], []>} : vector<11x128xbf16>, vector<128x256xbf16>, vector<11x256xf32> -> vector<11x256xf32>
    %81 = arith.addf %78, %80 : vector<11x256xf32>
    %c4_83 = arith.constant 4 : index
    %c0_84 = arith.constant 0 : index
    %82 = vector.load %arg3[%c4_83, %c0_84] : memref<16x128xbf16, #tpu.memory_space<vmem>>, vector<11x128xbf16>
    %c768_85 = arith.constant 768 : index
    %c0_86 = arith.constant 0 : index
    %83 = vector.load %arg5[%c768_85, %c0_86] : memref<1152x256xbf16, #tpu.memory_space<vmem>>, vector<128x256xbf16>
    %cst_87 = arith.constant dense<0.000000e+00> : vector<11x256xf32>
    %84 = tpu.matmul %82, %83, %cst_87 {dimension_numbers = #tpu.dot_dimension_numbers<[1], [0], [0], [1], [0, 0, 1, 1], [], []>} : vector<11x128xbf16>, vector<128x256xbf16>, vector<11x256xf32> -> vector<11x256xf32>
    %85 = arith.addf %81, %84 : vector<11x256xf32>
    %c4_88 = arith.constant 4 : index
    %c0_89 = arith.constant 0 : index
    %86 = vector.load %arg4[%c4_88, %c0_89] : memref<16x128xbf16, #tpu.memory_space<vmem>>, vector<11x128xbf16>
    %c896_90 = arith.constant 896 : index
    %c0_91 = arith.constant 0 : index
    %87 = vector.load %arg5[%c896_90, %c0_91] : memref<1152x256xbf16, #tpu.memory_space<vmem>>, vector<128x256xbf16>
    %cst_92 = arith.constant dense<0.000000e+00> : vector<11x256xf32>
    %88 = tpu.matmul %86, %87, %cst_92 {dimension_numbers = #tpu.dot_dimension_numbers<[1], [0], [0], [1], [0, 0, 1, 1], [], []>} : vector<11x128xbf16>, vector<128x256xbf16>, vector<11x256xf32> -> vector<11x256xf32>
    %89 = arith.addf %85, %88 : vector<11x256xf32>
    %c5_93 = arith.constant 5 : index
    %c0_94 = arith.constant 0 : index
    %90 = vector.load %arg3[%c5_93, %c0_94] : memref<16x128xbf16, #tpu.memory_space<vmem>>, vector<11x128xbf16>
    %c1024_95 = arith.constant 1024 : index
    %c0_96 = arith.constant 0 : index
    %91 = vector.load %arg5[%c1024_95, %c0_96] : memref<1152x256xbf16, #tpu.memory_space<vmem>>, vector<128x256xbf16>
    %cst_97 = arith.constant dense<0.000000e+00> : vector<11x256xf32>
    %92 = tpu.matmul %90, %91, %cst_97 {dimension_numbers = #tpu.dot_dimension_numbers<[1], [0], [0], [1], [0, 0, 1, 1], [], []>} : vector<11x128xbf16>, vector<128x256xbf16>, vector<11x256xf32> -> vector<11x256xf32>
    %93 = arith.addf %89, %92 : vector<11x256xf32>
    %94 = arith.maximumf %64, %93 : vector<11x256xf32>
    %c0_98 = arith.constant 0 : index
    %c0_99 = arith.constant 0 : index
    %95 = vector.load %arg5[%c0_98, %c0_99] : memref<1152x256xbf16, #tpu.memory_space<vmem>>, vector<128x256xbf16>
    %cst_100 = arith.constant dense<0.000000e+00> : vector<11x256xf32>
    %96 = tpu.matmul %15, %95, %cst_100 {dimension_numbers = #tpu.dot_dimension_numbers<[1], [0], [0], [1], [0, 0, 1, 1], [], []>} : vector<11x128xbf16>, vector<128x256xbf16>, vector<11x256xf32> -> vector<11x256xf32>
    %c128_101 = arith.constant 128 : index
    %c0_102 = arith.constant 0 : index
    %97 = vector.load %arg5[%c128_101, %c0_102] : memref<1152x256xbf16, #tpu.memory_space<vmem>>, vector<128x256xbf16>
    %cst_103 = arith.constant dense<0.000000e+00> : vector<11x256xf32>
    %98 = tpu.matmul %19, %97, %cst_103 {dimension_numbers = #tpu.dot_dimension_numbers<[1], [0], [0], [1], [0, 0, 1, 1], [], []>} : vector<11x128xbf16>, vector<128x256xbf16>, vector<11x256xf32> -> vector<11x256xf32>
    %99 = arith.addf %96, %98 : vector<11x256xf32>
    %c256_104 = arith.constant 256 : index
    %c0_105 = arith.constant 0 : index
    %100 = vector.load %arg5[%c256_104, %c0_105] : memref<1152x256xbf16, #tpu.memory_space<vmem>>, vector<128x256xbf16>
    %cst_106 = arith.constant dense<0.000000e+00> : vector<11x256xf32>
    %101 = tpu.matmul %50, %100, %cst_106 {dimension_numbers = #tpu.dot_dimension_numbers<[1], [0], [0], [1], [0, 0, 1, 1], [], []>} : vector<11x128xbf16>, vector<128x256xbf16>, vector<11x256xf32> -> vector<11x256xf32>
    %102 = arith.addf %99, %101 : vector<11x256xf32>
    %c384_107 = arith.constant 384 : index
    %c0_108 = arith.constant 0 : index
    %103 = vector.load %arg5[%c384_107, %c0_108] : memref<1152x256xbf16, #tpu.memory_space<vmem>>, vector<128x256xbf16>
    %cst_109 = arith.constant dense<0.000000e+00> : vector<11x256xf32>
    %104 = tpu.matmul %27, %103, %cst_109 {dimension_numbers = #tpu.dot_dimension_numbers<[1], [0], [0], [1], [0, 0, 1, 1], [], []>} : vector<11x128xbf16>, vector<128x256xbf16>, vector<11x256xf32> -> vector<11x256xf32>
    %105 = arith.addf %102, %104 : vector<11x256xf32>
    %c512_110 = arith.constant 512 : index
    %c0_111 = arith.constant 0 : index
    %106 = vector.load %arg5[%c512_110, %c0_111] : memref<1152x256xbf16, #tpu.memory_space<vmem>>, vector<128x256xbf16>
    %cst_112 = arith.constant dense<0.000000e+00> : vector<11x256xf32>
    %107 = tpu.matmul %31, %106, %cst_112 {dimension_numbers = #tpu.dot_dimension_numbers<[1], [0], [0], [1], [0, 0, 1, 1], [], []>} : vector<11x128xbf16>, vector<128x256xbf16>, vector<11x256xf32> -> vector<11x256xf32>
    %108 = arith.addf %105, %107 : vector<11x256xf32>
    %c640_113 = arith.constant 640 : index
    %c0_114 = arith.constant 0 : index
    %109 = vector.load %arg5[%c640_113, %c0_114] : memref<1152x256xbf16, #tpu.memory_space<vmem>>, vector<128x256xbf16>
    %cst_115 = arith.constant dense<0.000000e+00> : vector<11x256xf32>
    %110 = tpu.matmul %60, %109, %cst_115 {dimension_numbers = #tpu.dot_dimension_numbers<[1], [0], [0], [1], [0, 0, 1, 1], [], []>} : vector<11x128xbf16>, vector<128x256xbf16>, vector<11x256xf32> -> vector<11x256xf32>
    %111 = arith.addf %108, %110 : vector<11x256xf32>
    %c768_116 = arith.constant 768 : index
    %c0_117 = arith.constant 0 : index
    %112 = vector.load %arg5[%c768_116, %c0_117] : memref<1152x256xbf16, #tpu.memory_space<vmem>>, vector<128x256xbf16>
    %cst_118 = arith.constant dense<0.000000e+00> : vector<11x256xf32>
    %113 = tpu.matmul %86, %112, %cst_118 {dimension_numbers = #tpu.dot_dimension_numbers<[1], [0], [0], [1], [0, 0, 1, 1], [], []>} : vector<11x128xbf16>, vector<128x256xbf16>, vector<11x256xf32> -> vector<11x256xf32>
    %114 = arith.addf %111, %113 : vector<11x256xf32>
    %c896_119 = arith.constant 896 : index
    %c0_120 = arith.constant 0 : index
    %115 = vector.load %arg5[%c896_119, %c0_120] : memref<1152x256xbf16, #tpu.memory_space<vmem>>, vector<128x256xbf16>
    %cst_121 = arith.constant dense<0.000000e+00> : vector<11x256xf32>
    %116 = tpu.matmul %90, %115, %cst_121 {dimension_numbers = #tpu.dot_dimension_numbers<[1], [0], [0], [1], [0, 0, 1, 1], [], []>} : vector<11x128xbf16>, vector<128x256xbf16>, vector<11x256xf32> -> vector<11x256xf32>
    %117 = arith.addf %114, %116 : vector<11x256xf32>
    %c5_122 = arith.constant 5 : index
    %c0_123 = arith.constant 0 : index
    %118 = vector.load %arg4[%c5_122, %c0_123] : memref<16x128xbf16, #tpu.memory_space<vmem>>, vector<11x128xbf16>
    %c1024_124 = arith.constant 1024 : index
    %c0_125 = arith.constant 0 : index
    %119 = vector.load %arg5[%c1024_124, %c0_125] : memref<1152x256xbf16, #tpu.memory_space<vmem>>, vector<128x256xbf16>
    %cst_126 = arith.constant dense<0.000000e+00> : vector<11x256xf32>
    %120 = tpu.matmul %118, %119, %cst_126 {dimension_numbers = #tpu.dot_dimension_numbers<[1], [0], [0], [1], [0, 0, 1, 1], [], []>} : vector<11x128xbf16>, vector<128x256xbf16>, vector<11x256xf32> -> vector<11x256xf32>
    %121 = arith.addf %117, %120 : vector<11x256xf32>
    %122 = arith.maximumf %94, %121 : vector<11x256xf32>
    %c0_127 = arith.constant 0 : index
    %c0_128 = arith.constant 0 : index
    %123 = vector.load %arg6[%c0_127, %c0_128] : memref<1x256xf32, #tpu.memory_space<vmem>>, vector<1x256xf32>
    %124 = vector.broadcast %123 : vector<1x256xf32> to vector<11x256xf32>
    %125 = arith.addf %122, %124 : vector<11x256xf32>
    %cst_129 = arith.constant 0.000000e+00 : f32
    %126 = vector.broadcast %cst_129 : f32 to vector<11x256xf32>
    %127 = arith.maximumf %125, %126 : vector<11x256xf32>
    %128 = arith.truncf %127 : vector<11x256xf32> to vector<11x256xbf16>
    %c0_130 = arith.constant 0 : index
    %c0_131 = arith.constant 0 : index
    %129 = vector.load %arg7[%c0_130, %c0_131] : memref<16x256xbf16, #tpu.memory_space<vmem>>, vector<11x256xbf16>
    tpu.vector_store %arg7[%c0_130, %c0_131], %128 {strides = array<i32>} : memref<16x256xbf16, #tpu.memory_space<vmem>>, vector<11x256xbf16>,
    %cst_132 = arith.constant 0.000000e+00 : bf16
    %130 = vector.broadcast %cst_132 : bf16 to vector<5x256xbf16>
    %c11 = arith.constant 11 : index
    %c0_133 = arith.constant 0 : index
    %131 = vector.load %arg7[%c11, %c0_133] : memref<16x256xbf16, #tpu.memory_space<vmem>>, vector<5x256xbf16>
    tpu.vector_store %arg7[%c11, %c0_133], %130 {strides = array<i32>} : memref<16x256xbf16, #tpu.memory_space<vmem>>, vector<5x256xbf16>,
    return
  }
  func.func @transform_0(%arg0: i32) -> (i32, i32) {
    %c0_i32 = arith.constant 0 : i32
    %c0_i32_0 = arith.constant 0 : i32
    return %arg0, %c0_i32 : i32, i32
  }
  func.func @transform_1(%arg0: i32) -> (i32, i32) {
    %c0_i32 = arith.constant 0 : i32
    %c0_i32_0 = arith.constant 0 : i32
    return %arg0, %c0_i32 : i32, i32
  }
  func.func @transform_2(%arg0: i32) -> (i32, i32) {
    %c0_i32 = arith.constant 0 : i32
    %c0_i32_0 = arith.constant 0 : i32
    return %arg0, %c0_i32 : i32, i32
  }
  func.func @transform_3(%arg0: i32) -> (i32, i32) {
    %c0_i32 = arith.constant 0 : i32
    %c0_i32_0 = arith.constant 0 : i32
    return %arg0, %c0_i32 : i32, i32
  }
  func.func @transform_4(%arg0: i32) -> (i32, i32) {
    %c0_i32 = arith.constant 0 : i32
    %c0_i32_0 = arith.constant 0 : i32
    %c0_i32_1 = arith.constant 0 : i32
    return %c0_i32, %c0_i32_0 : i32, i32
  }
  func.func @transform_5(%arg0: i32) -> (i32, i32) {
    %c0_i32 = arith.constant 0 : i32
    %c0_i32_0 = arith.constant 0 : i32
    %c0_i32_1 = arith.constant 0 : i32
    return %c0_i32, %c0_i32_0 : i32, i32
  }
  func.func @transform_6(%arg0: i32) -> (i32, i32) {
    %c0_i32 = arith.constant 0 : i32
    %c0_i32_0 = arith.constant 0 : i32
    return %arg0, %c0_i32 : i32, i32
  }
}

module attributes {stable_mosaic.version = 11 : i64} {
  func.func @_fc_chain_kernel(%arg0: i32, %arg1: memref<8x2304xbf16, #tpu.memory_space<vmem>>, %arg2: memref<2304x256xbf16, #tpu.memory_space<vmem>>, %arg3: memref<1x256xf32, #tpu.memory_space<vmem>>, %arg4: memref<256x128xbf16, #tpu.memory_space<vmem>>, %arg5: memref<1x128xf32, #tpu.memory_space<vmem>>, %arg6: memref<128x64xbf16, #tpu.memory_space<vmem>>, %arg7: memref<1x64xf32, #tpu.memory_space<vmem>>, %arg8: memref<64x128xbf16, #tpu.memory_space<vmem>>, %arg9: memref<1x128xf32, #tpu.memory_space<vmem>>, %arg10: memref<8x128xf32, #tpu.memory_space<vmem>>) attributes {dimension_semantics = [#tpu.dimension_semantics<parallel>], iteration_bounds = array<i64: 2>, scalar_prefetch = 0 : i64, scratch_operands = 0 : i64, tpu.core_type = #tpu.core_type<tc>, window_params = [{transform_indices = @transform_0, window_bounds = array<i64: 8, 2304>}, {pipeline_mode = #tpu.pipeline_mode<synchronous>, transform_indices = @transform_1, window_bounds = array<i64: 2304, 256>}, {pipeline_mode = #tpu.pipeline_mode<synchronous>, transform_indices = @transform_2, window_bounds = array<i64: 1, 256>}, {pipeline_mode = #tpu.pipeline_mode<synchronous>, transform_indices = @transform_3, window_bounds = array<i64: 256, 128>}, {pipeline_mode = #tpu.pipeline_mode<synchronous>, transform_indices = @transform_4, window_bounds = array<i64: 1, 128>}, {pipeline_mode = #tpu.pipeline_mode<synchronous>, transform_indices = @transform_5, window_bounds = array<i64: 128, 64>}, {pipeline_mode = #tpu.pipeline_mode<synchronous>, transform_indices = @transform_6, window_bounds = array<i64: 1, 64>}, {pipeline_mode = #tpu.pipeline_mode<synchronous>, transform_indices = @transform_7, window_bounds = array<i64: 64, 128>}, {pipeline_mode = #tpu.pipeline_mode<synchronous>, transform_indices = @transform_8, window_bounds = array<i64: 1, 128>}, {transform_indices = @transform_9, window_bounds = array<i64: 8, 128>}]} {
    %c0 = arith.constant 0 : index
    %c0_0 = arith.constant 0 : index
    %0 = vector.load %arg1[%c0, %c0_0] : memref<8x2304xbf16, #tpu.memory_space<vmem>>, vector<8x2304xbf16>
    %c0_1 = arith.constant 0 : index
    %c0_2 = arith.constant 0 : index
    %1 = vector.load %arg2[%c0_1, %c0_2] : memref<2304x256xbf16, #tpu.memory_space<vmem>>, vector<2304x256xbf16>
    %cst = arith.constant dense<0.000000e+00> : vector<8x256xf32>
    %2 = tpu.matmul %0, %1, %cst {dimension_numbers = #tpu.dot_dimension_numbers<[1], [0], [0], [1], [0, 0, 1, 1], [], []>} : vector<8x2304xbf16>, vector<2304x256xbf16>, vector<8x256xf32> -> vector<8x256xf32>
    %c0_3 = arith.constant 0 : index
    %c0_4 = arith.constant 0 : index
    %3 = vector.load %arg3[%c0_3, %c0_4] : memref<1x256xf32, #tpu.memory_space<vmem>>, vector<1x256xf32>
    %4 = vector.broadcast %3 : vector<1x256xf32> to vector<8x256xf32>
    %5 = arith.addf %2, %4 : vector<8x256xf32>
    %cst_5 = arith.constant 0.000000e+00 : f32
    %6 = vector.broadcast %cst_5 : f32 to vector<8x256xf32>
    %7 = arith.maximumf %5, %6 : vector<8x256xf32>
    %8 = arith.truncf %7 : vector<8x256xf32> to vector<8x256xbf16>
    %c0_6 = arith.constant 0 : index
    %c0_7 = arith.constant 0 : index
    %9 = vector.load %arg4[%c0_6, %c0_7] : memref<256x128xbf16, #tpu.memory_space<vmem>>, vector<256x128xbf16>
    %cst_8 = arith.constant dense<0.000000e+00> : vector<8x128xf32>
    %10 = tpu.matmul %8, %9, %cst_8 {dimension_numbers = #tpu.dot_dimension_numbers<[1], [0], [0], [1], [0, 0, 1, 1], [], []>} : vector<8x256xbf16>, vector<256x128xbf16>, vector<8x128xf32> -> vector<8x128xf32>
    %c0_9 = arith.constant 0 : index
    %c0_10 = arith.constant 0 : index
    %11 = vector.load %arg5[%c0_9, %c0_10] : memref<1x128xf32, #tpu.memory_space<vmem>>, vector<1x128xf32>
    %12 = vector.broadcast %11 : vector<1x128xf32> to vector<8x128xf32>
    %13 = arith.addf %10, %12 : vector<8x128xf32>
    %cst_11 = arith.constant 0.000000e+00 : f32
    %14 = vector.broadcast %cst_11 : f32 to vector<8x128xf32>
    %15 = arith.maximumf %13, %14 : vector<8x128xf32>
    %16 = arith.truncf %15 : vector<8x128xf32> to vector<8x128xbf16>
    %c0_12 = arith.constant 0 : index
    %c0_13 = arith.constant 0 : index
    %17 = vector.load %arg6[%c0_12, %c0_13] : memref<128x64xbf16, #tpu.memory_space<vmem>>, vector<128x64xbf16>
    %cst_14 = arith.constant dense<0.000000e+00> : vector<8x64xf32>
    %18 = tpu.matmul %16, %17, %cst_14 {dimension_numbers = #tpu.dot_dimension_numbers<[1], [0], [0], [1], [0, 0, 1, 1], [], []>} : vector<8x128xbf16>, vector<128x64xbf16>, vector<8x64xf32> -> vector<8x64xf32>
    %c0_15 = arith.constant 0 : index
    %c0_16 = arith.constant 0 : index
    %19 = vector.load %arg7[%c0_15, %c0_16] : memref<1x64xf32, #tpu.memory_space<vmem>>, vector<1x64xf32>
    %20 = vector.broadcast %19 : vector<1x64xf32> to vector<8x64xf32>
    %21 = arith.addf %18, %20 : vector<8x64xf32>
    %cst_17 = arith.constant 0.000000e+00 : f32
    %22 = vector.broadcast %cst_17 : f32 to vector<8x64xf32>
    %23 = arith.maximumf %21, %22 : vector<8x64xf32>
    %24 = arith.truncf %23 : vector<8x64xf32> to vector<8x64xbf16>
    %c0_18 = arith.constant 0 : index
    %c0_19 = arith.constant 0 : index
    %25 = vector.load %arg8[%c0_18, %c0_19] : memref<64x128xbf16, #tpu.memory_space<vmem>>, vector<64x128xbf16>
    %cst_20 = arith.constant dense<0.000000e+00> : vector<8x128xf32>
    %26 = tpu.matmul %24, %25, %cst_20 {dimension_numbers = #tpu.dot_dimension_numbers<[1], [0], [0], [1], [0, 0, 1, 1], [], []>} : vector<8x64xbf16>, vector<64x128xbf16>, vector<8x128xf32> -> vector<8x128xf32>
    %c0_21 = arith.constant 0 : index
    %c0_22 = arith.constant 0 : index
    %27 = vector.load %arg9[%c0_21, %c0_22] : memref<1x128xf32, #tpu.memory_space<vmem>>, vector<1x128xf32>
    %28 = vector.broadcast %27 : vector<1x128xf32> to vector<8x128xf32>
    %29 = arith.addf %26, %28 : vector<8x128xf32>
    %c0_23 = arith.constant 0 : index
    %c0_24 = arith.constant 0 : index
    %30 = vector.load %arg10[%c0_23, %c0_24] : memref<8x128xf32, #tpu.memory_space<vmem>>, vector<8x128xf32>
    tpu.vector_store %arg10[%c0_23, %c0_24], %29 {strides = array<i32>} : memref<8x128xf32, #tpu.memory_space<vmem>>, vector<8x128xf32>,
    return
  }
  func.func @transform_0(%arg0: i32) -> (i32, i32) {
    %c0_i32 = arith.constant 0 : i32
    %c0_i32_0 = arith.constant 0 : i32
    return %arg0, %c0_i32 : i32, i32
  }
  func.func @transform_1(%arg0: i32) -> (i32, i32) {
    %c0_i32 = arith.constant 0 : i32
    %c0_i32_0 = arith.constant 0 : i32
    %c0_i32_1 = arith.constant 0 : i32
    return %c0_i32, %c0_i32_0 : i32, i32
  }
  func.func @transform_2(%arg0: i32) -> (i32, i32) {
    %c0_i32 = arith.constant 0 : i32
    %c0_i32_0 = arith.constant 0 : i32
    %c0_i32_1 = arith.constant 0 : i32
    return %c0_i32, %c0_i32_0 : i32, i32
  }
  func.func @transform_3(%arg0: i32) -> (i32, i32) {
    %c0_i32 = arith.constant 0 : i32
    %c0_i32_0 = arith.constant 0 : i32
    %c0_i32_1 = arith.constant 0 : i32
    return %c0_i32, %c0_i32_0 : i32, i32
  }
  func.func @transform_4(%arg0: i32) -> (i32, i32) {
    %c0_i32 = arith.constant 0 : i32
    %c0_i32_0 = arith.constant 0 : i32
    %c0_i32_1 = arith.constant 0 : i32
    return %c0_i32, %c0_i32_0 : i32, i32
  }
  func.func @transform_5(%arg0: i32) -> (i32, i32) {
    %c0_i32 = arith.constant 0 : i32
    %c0_i32_0 = arith.constant 0 : i32
    %c0_i32_1 = arith.constant 0 : i32
    return %c0_i32, %c0_i32_0 : i32, i32
  }
  func.func @transform_6(%arg0: i32) -> (i32, i32) {
    %c0_i32 = arith.constant 0 : i32
    %c0_i32_0 = arith.constant 0 : i32
    %c0_i32_1 = arith.constant 0 : i32
    return %c0_i32, %c0_i32_0 : i32, i32
  }
  func.func @transform_7(%arg0: i32) -> (i32, i32) {
    %c0_i32 = arith.constant 0 : i32
    %c0_i32_0 = arith.constant 0 : i32
    %c0_i32_1 = arith.constant 0 : i32
    return %c0_i32, %c0_i32_0 : i32, i32
  }
  func.func @transform_8(%arg0: i32) -> (i32, i32) {
    %c0_i32 = arith.constant 0 : i32
    %c0_i32_0 = arith.constant 0 : i32
    %c0_i32_1 = arith.constant 0 : i32
    return %c0_i32, %c0_i32_0 : i32, i32
  }
  func.func @transform_9(%arg0: i32) -> (i32, i32) {
    %c0_i32 = arith.constant 0 : i32
    %c0_i32_0 = arith.constant 0 : i32
    return %arg0, %c0_i32 : i32, i32
  }
}

</mosaic_0001>

<bundles_post_ra>
// kernel: forward.4
= control target key start
LH: loop header
LB: loop body
LE: loop exit
PB: predicated region body
PF: predicated region fallthrough
CT: control target
= control target key end

     0   :  { %8 = vsyncpa [#allocation3], 0  ;;  %s1069_s0 = inlined_call_operand.vmem [shape: bf16[392,16], index: 0, kind: input, shape index: {}]   ;;  %s1070_s1 = inlined_call_operand.hbm [shape: bf16[64,64], index: 1, kind: input, shape index: {}]   ;;  %s1071_s2 = inlined_call_operand.hbm [shape: f32[1,64], index: 2, kind: input, shape index: {}]   ;;  %s1072_s3 = inlined_call_operand.vmem [shape: bf16[392,64], index: 3, kind: output, shape index: {}]  }
   0x1   :  { %9 = vsyncpa [#allocation5], 0  ;;  %s933_s12 = smov 0  }
   0x2 LB: > { %s686_s13 = sadd.s32 4294967295, %s907_s12   ;;  %p688_p0 = scmp.ge.s32.totalorder %s907_s12, 1  ;;  %s907_s12 = sphi %s933_s12, %s15_s12  }
   0x3   : > { %p114_p1 = scmp.lt.s32.totalorder %s907_s12, 8  ;;  %s909_s14 = smov [#allocation2]  }
   0x4   : > { %s126_s15 = sshll.u32 %s909_s14, 4  ;;  %p947_p3 = scmp.eq.s32.totalorder %s686_s13, 0  ;;  %s127_s15 = int_to_ptr.vmem [resolvable:$true] %s126_s15 }
   0x5   : > { %p941_p2 = pnand %p688_p0, %p114_p1  ;;  %s910_s18 = smov [#allocation4]  }
   0x6   : > { %s1077_s17 = scalar_select %p947_p3, 1, 0 }
   0x7   : > { %s1076_s16 = scalar_select %p941_p2, 1, 0 }
   0x8   : > { %p806_p4 = pneg %p941_p2  ;;  %s140_s19 = sshll.u32 %s910_s18, 4  ;;  %s959_s19 = int_to_ptr.vmem [resolvable:$true] %s140_s19 }
   0x9   : > { %s837_s23 = scalar_lea.hbm %s1070_s1, 512 }
   0xa   : > { %p955_p5 = pnand %p947_p3, %p806_p4  ;;  %p838_p6 = scmp.ne.s32.totalorder %s1070_s1, %s837_s23 }
   0xb   : > { %p844_p10 = scmp.lt.u32.totalorder %s837_s23, %s1070_s1 }
   0xc   : > { %p839_p7 = pneg %p955_p5 }
   0xe   : > { %p840_p8 = pnand %p839_p7, %p838_p6 }
  0x10   : > { %p841_p9 = pneg %p840_p8 }
  0x12   : > { %p846_p11 = pnand %p844_p10, %p841_p9 }
  0x14   : > { %849 = shalt.err (!%p846_p11)
}
  0x15   : > { %s850_s28 = scalar_lea.vmem %s127_s15, 512  ;;  %p858_p1 = scmp.lt.s32.totalorder %s127_s15, %s127_s15 }
  0x16   : > { %p851_p12 = scmp.ne.s32.totalorder %s127_s15, %s850_s28  ;;  %p859_p4 = scmp.lt.s32.totalorder %s850_s28, %s850_s28 }
  0x18   : > { %p853_p13 = pnand %p851_p12, %p839_p7  ;;  %p860_p3 = por %p859_p4, %p858_p1 }
  0x1a   : > { %p854_p0 = pneg %p853_p13 }
  0x1c   : > { %p861_p2 = pnand %p860_p3, %p854_p0 }
  0x1e   : > { %864 = shalt.err (!%p861_p2)
}
  0x1f   : > { %s911_s29 = smov 64   ;;  %s912_s30 = smov 4  }
  0x20   : > { %809 = dma.hbm_to_vmem [thread:$0]  (!%p955_p5), %s1070_s1, 512, %s127_s15, [#allocation3], %s911_s29, %s911_s29, %s912_s30  }
  0x21   : > { %s865_s8 = scalar_lea.hbm %s1071_s2, 16 }
  0x22   : > { %p866_p6 = scmp.ne.s32.totalorder %s1071_s2, %s865_s8  ;;  %p872_p8 = scmp.lt.u32.totalorder %s865_s8, %s1071_s2 }
  0x24   : > { %p868_p2 = pnand %p866_p6, %p839_p7 }
  0x26   : > { %p869_p3 = pneg %p868_p2 }
  0x28   : > { %p874_p9 = pnand %p872_p8, %p869_p3 }
  0x2a   : > { %877 = shalt.err (!%p874_p9)
}
  0x2b   : > { %s878_s15 = scalar_lea.vmem %s959_s19, 16  ;;  %s885_s18 = scalar_lea.vmem %s959_s19, 32 }
  0x2c   : > { %p879_p10 = scmp.ne.s32.totalorder %s959_s19, %s878_s15  ;;  %p886_p13 = scmp.lt.s32.totalorder %s959_s19, %s959_s19 }
  0x2d   : > { %p887_p0 = scmp.lt.s32.totalorder %s885_s18, %s878_s15 }
  0x2e   : > { %p881_p11 = pnand %p879_p10, %p839_p7 }
  0x2f   : > { %p888_p1 = por %p887_p0, %p886_p13 }
  0x30   : > { %p882_p12 = pneg %p881_p11 }
  0x32   : > { %p889_p4 = pnand %p888_p1, %p882_p12 }
  0x34   : > { %892 = shalt.err (!%p889_p4)
}
  0x35   : > { %812 = dma.hbm_to_vmem [thread:$0]  (!%p955_p5), %s1071_s2, 16, %s959_s19, [#allocation5]  }
  0x36   : > { %p1079_p6 = scmp.ne.s32.totalorder %s1076_s16, 0 }
  0x37   : > { %p1080_p7 = scmp.ne.s32.totalorder (!%p1079_p6), %s1077_s17, 0 }
  0x38   : > { %162 = sbr.rel (%p1079_p6) target bundleno = 325 (0x145), region = 32 }
  0x3f   : > { %898 = dma.done.wait (%p1080_p7), [#allocation3], 512  }
  0x40   : > { %900 = vsyncadd (%p1080_p7), [#allocation3], 4294966784 }
  0x41   : > { %902 = dma.done.wait (%p1080_p7), [#allocation5], 16  }
  0x42   : > { %904 = vsyncadd (%p1080_p7), [#allocation5], 4294967280  ;;  %s190_s20 = smul.u32 7, %s686_s13  ;;  %v829_v0 = vld [vmem:[#allocation2] sm:$0xff]   ;;  %v830_v1 = vld [vmem:[#allocation2 + $0x8] sm:$0xff]   ;;  %vm236_vm0 = vcmask 130048  }
  0x43   : > { %758 = vmatprep.subr.bf16.mxu0 %v829_v0  ;;  %768 = vmatprep.subr.bf16.mxu1 %v830_v1  ;;  %v833_v4 = vld [vmem:[#allocation2 + $0x10] sm:$0xff]   ;;  %v834_v5 = vld [vmem:[#allocation2 + $0x18] sm:$0xff]   ;;  %v721_v35 = vld [vmem:[#allocation4] ss:$0 sm:$0xff]  ;;  %vm600_vm1 = vcmask 519168  }
  0x44   : > { %p191_p2 = scmp.lt.s32.totalorder %s190_s20, 48  ;;  %759 = vmatpush3.bf16.msra.mxu0 %v829_v0  ;;  %769 = vmatpush3.bf16.msra.mxu1 %v830_v1 }
  0x45   : > { %778 = vmatprep.subr.bf16.mxu0 %v833_v4  ;;  %788 = vmatprep.subr.bf16.mxu1 %v834_v5 }
  0x46   : > { %s1082_s20 = smov (!%p191_p2, %s190_s20), 48 }
  0x47   : > { %s695_s16 = sshll.u32 %s1082_s20, 2 }
  0x48   : > { %s194_s24 = scalar_lea.vmem %s1069_s0, %s695_s16  ;;  %s1050_s25 = scalar_lea.vmem %s1072_s3, %s695_s16 }
  0x49   : > { %v831_v2 = vld [vmem:[%s194_s24] sm:$0xff]   ;;  %v832_v3 = vld [vmem:[%s194_s24 + $0x8] sm:$0xff]   ;;  %v835_v6 = vld [vmem:[%s194_s24 + $0x10] sm:$0xff]  }
  0x4a   : > { %760 = vmatprep.mubr.msk.bf16.mxu0 %vm236_vm0, %v831_v2  ;;  %770 = vmatprep.mubr.msk.bf16.mxu1 %vm236_vm0, %v831_v2  ;;  %v836_v7 = vld [vmem:[%s194_s24 + $0x18] ss:$0 sps:$4 sm:$0xff]  }
  0x4b   : > { %761 = vmatmul.mubr.msk.bf16.vlgmr.msra.gmra.mrb[0].mxu0 %vm236_vm0, %v832_v3  ;;  %771 = vmatmul.mubr.msk.bf16.vlgmr.msra.gmra.mrb[0].mxu1 %vm236_vm0, %v832_v3 }
  0x4c   : > { %779 = vmatpush3.bf16.msra.mxu0 %v833_v4  ;;  %764 = vmatprep.mubr.msk.bf16.mxu0 %vm236_vm0, %v835_v6 }
  0x4d   : > { %789 = vmatpush3.bf16.msra.mxu1 %v834_v5  ;;  %774 = vmatprep.mubr.msk.bf16.mxu1 %vm236_vm0, %v835_v6 }
  0x53   : > { %765 = vmatmul.mubr.msk.bf16.gmra.mrb[4].mxu0 %vm236_vm0, %v836_v7  ;;  %775 = vmatmul.mubr.msk.bf16.gmra.mrb[4].mxu1 %vm236_vm0, %v836_v7 }
  0x54   : > { %780 = vmatprep.mubr.msk.bf16.mxu0 %vm236_vm0, %v831_v2  ;;  %790 = vmatprep.mubr.msk.bf16.mxu1 %vm236_vm0, %v831_v2 }
  0x5b   : > { %781 = vmatmul.mubr.msk.bf16.vlgmr.msra.gmra.mrb[8].mxu0 %vm236_vm0, %v832_v3  ;;  %791 = vmatmul.mubr.msk.bf16.vlgmr.msra.gmra.mrb[8].mxu1 %vm236_vm0, %v832_v3 }
  0x5c   : > { %784 = vmatprep.mubr.msk.bf16.mxu0 %vm236_vm0, %v835_v6  ;;  %794 = vmatprep.mubr.msk.bf16.mxu1 %vm236_vm0, %v835_v6 }
  0x63   : > { %785 = vmatmul.mubr.msk.bf16.gmra.mrb[12].mxu0 %vm236_vm0, %v836_v7  ;;  %795 = vmatmul.mubr.msk.bf16.gmra.mrb[12].mxu1 %vm236_vm0, %v836_v7 }
 0x11e   : > { %v762_v8 = vpop.f32.mrb[0].mxu0  ;;  %v772_v9 = vpop.f32.mrb[0].mxu1 }
 0x11f   : > { %v283_v10 = vpop.f32.mrb[1].mxu0  ;;  %v387_v11 = vmax.f32 %v762_v8, %v772_v9  ;;  %v355_v12 = vpop.f32.mrb[1].mxu1 }
 0x120   : > { %v763_v13 = vpop.f32.mrb[2].mxu0  ;;  %v385_v14 = vmax.f32 %v283_v10, %v355_v12  ;;  %v773_v15 = vpop.f32.mrb[2].mxu1 }
 0x121   : > { %v286_v16 = vpop.f32.mrb[3].mxu0  ;;  %v388_v17 = vmax.f32 %v763_v13, %v773_v15  ;;  %v358_v18 = vpop.f32.mrb[3].mxu1 }
 0x122   : > { %v386_v19 = vmax.f32 %v286_v16, %v358_v18 }
 0x126   : > { %v766_v20 = vpop.f32.mrb[4].mxu0  ;;  %v776_v21 = vpop.f32.mrb[4].mxu1 }
 0x127   : > { %v299_v22 = vpop.f32.mrb[5].mxu0  ;;  %v391_v23 = vmax.f32 %v766_v20, %v776_v21  ;;  %v371_v24 = vpop.f32.mrb[5].mxu1 }
 0x128   : > { %v767_v25 = vpop.f32.mrb[6].mxu0  ;;  %v389_v26 = vmax.f32 %v299_v22, %v371_v24  ;;  %v777_v27 = vpop.f32.mrb[6].mxu1 }
 0x129   : > { %v302_v28 = vpop.f32.mrb[7].mxu0  ;;  %v374_v29 = vpop.f32.mrb[7].mxu1 }
 0x12a   : > { %v390_v30 = vmax.f32 %v302_v28, %v374_v29 }
 0x12e   : > { %v782_v31 = vpop.f32.mrb[8].mxu0  ;;  %v792_v33 = vpop.f32.mrb[8].mxu1 }
 0x12f   : > { %v466_v32 = vmax.f32 %v387_v11, %v782_v31  ;;  %v434_v34 = vpop.f32.mrb[9].mxu0  ;;  %v513_v37 = vpop.f32.mrb[9].mxu1 }
 0x130   : > { %v464_v36 = vmax.f32 %v385_v14, %v434_v34  ;;  %v783_v38 = vpop.f32.mrb[10].mxu0  ;;  %v793_v41 = vpop.f32.mrb[10].mxu1 }
 0x131   : > { %v545_v39 = vmax.f32 %v466_v32, %v792_v33  ;;  %v467_v40 = vmax.f32 %v388_v17, %v783_v38  ;;  %v437_v42 = vpop.f32.mrb[11].mxu0  ;;  %v516_v45 = vpop.f32.mrb[11].mxu1 }
 0x132   : > { %v543_v43 = vmax.f32 %v464_v36, %v513_v37  ;;  %v465_v44 = vmax.f32 %v386_v19, %v437_v42 }
 0x133   : > { %v559_v46 = vadd.f32 %v721_v35, %v545_v39  ;;  %v546_v47 = vmax.f32 %v467_v40, %v793_v41 }
 0x134   : > { %v557_v48 = vadd.f32 %v721_v35, %v543_v43  ;;  %v544_v49 = vmax.f32 %v465_v44, %v516_v45 }
 0x135   : > { %v566_v50 = vmax.f32 %v559_v46, 0.0  ;;  %v560_v51 = vadd.f32 %v721_v35, %v546_v47 }
 0x136   : > { %v564_v52 = vmax.f32 %v557_v48, 0.0  ;;  %v558_v53 = vadd.f32 %v721_v35, %v544_v49  ;;  %v786_v54 = vpop.f32.mrb[12].mxu0  ;;  %v796_v58 = vpop.f32.mrb[12].mxu1 }
 0x137   : > { %v733_v55 = vpack.c.bf16 %v566_v50, %v566_v50  ;;  %v567_v56 = vmax.f32 %v560_v51, 0.0  ;;  %v470_v57 = vmax.f32 %v391_v23, %v786_v54  ;;  %v450_v59 = vpop.f32.mrb[13].mxu0  ;;  %v529_v63 = vpop.f32.mrb[13].mxu1 }
 0x138   : > { %v731_v60 = vpack.c.bf16 %v564_v52, %v564_v52  ;;  %v565_v61 = vmax.f32 %v558_v53, 0.0  ;;  %v468_v62 = vmax.f32 %v389_v26, %v450_v59  ;;  %v787_v0 = vpop.f32.mrb[14].mxu0  ;;  %v797_v3 = vpop.f32.mrb[14].mxu1 }
 0x139   : > { %603 = vst.msk [vmem:[%s1050_s25 + $0x8] sm:$0xf] %vm600_vm1, %v733_v55  ;;  %v734_v1 = vpack.c.bf16 %v567_v56, %v567_v56  ;;  %v549_v2 = vmax.f32 %v470_v57, %v796_v58  ;;  %v453_v4 = vpop.f32.mrb[15].mxu0  ;;  %v532_v8 = vpop.f32.mrb[15].mxu1 }
 0x13a   : > { %601 = vst.msk [vmem:[%s1050_s25] sm:$0xf] %vm600_vm1, %v731_v60  ;;  %v732_v5 = vpack.c.bf16 %v565_v61, %v565_v61  ;;  %v547_v6 = vmax.f32 %v468_v62, %v529_v63  ;;  %v469_v7 = vmax.f32 %v390_v30, %v453_v4 }
 0x13b   : > { %604 = vst.msk [vmem:[%s1050_s25 + $0xc] sm:$0xf] %vm600_vm1, %v734_v1  ;;  %v563_v9 = vadd.f32 %v721_v35, %v549_v2 }
 0x13c   : > { %602 = vst.msk [vmem:[%s1050_s25 + $0x4] sm:$0xf] %vm600_vm1, %v732_v5  ;;  %v561_v10 = vadd.f32 %v721_v35, %v547_v6  ;;  %v548_v11 = vmax.f32 %v469_v7, %v532_v8 }
 0x13d   : > { %v570_v12 = vmax.f32 %v563_v9, 0.0 }
 0x13e   : > { %v568_v13 = vmax.f32 %v561_v10, 0.0  ;;  %v562_v14 = vadd.f32 %v721_v35, %v548_v11 }
 0x13f   : > { %v737_v15 = vpack.c.bf16 %v570_v12, %v570_v12 }
 0x140   : > { %v735_v16 = vpack.c.bf16 %v568_v13, %v568_v13  ;;  %v569_v17 = vmax.f32 %v562_v14, 0.0 }
 0x141   : > { %607 = vst.msk [vmem:[%s1050_s25 + $0x18] sm:$0xf] %vm600_vm1, %v737_v15 }
 0x142   : > { %605 = vst.msk [vmem:[%s1050_s25 + $0x10] sm:$0xf] %vm600_vm1, %v735_v16  ;;  %v736_v18 = vpack.c.bf16 %v569_v17, %v569_v17 }
 0x144   : > { %606 = vst.msk [vmem:[%s1050_s25 + $0x14] sm:$0xf] %vm600_vm1, %v736_v18 }
 0x145 PF: > { %s15_s12 = sadd.s32 1, %s907_s12  }
 0x146   : > { %p12_p5 = scmp.ge.s32.totalorder %s15_s12, 9  }
 0x148   :  { %14 = sbr.rel (!%p12_p5) target bundleno = 2 (0x2), region = 71 }
 0x14f   :  { %630 = vsyncpa [#allocation3], 1 }
 0x150   :  { %632 = vsyncpa [#allocation3 + $0x1], 1 }
 0x151   :  { %633 = vsyncpa [#allocation5], 1 }

// kernel: forward.5
= control target key start
LH: loop header
LB: loop body
LE: loop exit
PB: predicated region body
PF: predicated region fallthrough
CT: control target
= control target key end

     0   :  { %s5408_s21 = smov 0   ;;  %s6373_s0 = inlined_call_operand.vmem [shape: bf16[128,64], index: 0, kind: input, shape index: {}]   ;;  %s6374_s1 = inlined_call_operand.vmem [shape: bf16[128,64], index: 1, kind: input, shape index: {}]   ;;  %s6375_s2 = inlined_call_operand.vmem [shape: bf16[128,64], index: 2, kind: input, shape index: {}]   ;;  %s6376_s3 = inlined_call_operand.vmem [shape: bf16[128,64], index: 3, kind: input, shape index: {}]   ;;  %s6377_s4 = inlined_call_operand.vmem [shape: bf16[576,128], index: 4, kind: input, shape index: {}]   ;;  %s6378_s5 = inlined_call_operand.vmem [shape: f32[1,128], index: 5, kind: input, shape index: {}]   ;;  %s6379_s6 = inlined_call_operand.vmem [shape: bf16[128,128], index: 6, kind: output, shape index: {}]  }
   0x1 LB: > { %s3902_s22 = sadd.s32 4294967295, %s5370_s21   ;;  %p3906_p0 = scmp.ge.s32.totalorder %s5370_s21, 1  ;;  %s5370_s21 = sphi %s5408_s21, %s16_s21  }
   0x2   : > { %p246_p1 = scmp.lt.s32.totalorder %s5370_s21, 3 }
   0x4   : > { %p247_p2 = pnand %p3906_p0, %p246_p1 }
   0x6   : > { %250 = sbr.rel (%p247_p2) target bundleno = 543 (0x21f), region = 44 }
   0xd   : > { %v5292_v0 = vld [vmem:[%s6377_s4 + $0x20] sm:$0xff]   ;;  %s3907_s25 = sshll.u32 %s3902_s22, 3  ;;  %v5293_v1 = vld [vmem:[%s6377_s4 + $0x28] sm:$0xff]   ;;  %v5294_v2 = vld [vmem:[%s6377_s4 + $0x30] sm:$0xff]   ;;  %vm394_vm0 = vcmask 523264   ;;  %vm3797_vm2 = vcmask 1043456  }
   0xe   : > { %p292_p3 = scmp.lt.s32.totalorder %s3907_s25, 15  ;;  %4451 = vmatprep.subr.bf16.mxu0 %v5292_v0  ;;  %4595 = vmatprep.subr.bf16.mxu1 %v5292_v0  ;;  %v5295_v3 = vld [vmem:[%s6377_s4 + $0x38] sm:$0xff]   ;;  %vm597_vm1 = vsmask.f32 7424  ;;  %v5454_v7 = vld [vmem:[%s6377_s4] sm:$0xff]   ;;  %v5474_v22 = vld [vmem:[%s6377_s4 + $0x8] sm:$0xff]  }
   0xf   : > { %4452 = vmatpush3.bf16.msra.mxu0 %v5292_v0  ;;  %4596 = vmatpush3.bf16.msra.mxu1 %v5292_v0  ;;  %v5502_v31 = vld [vmem:[%s6377_s4 + $0x10] sm:$0xff]   ;;  %v5520_v34 = vld [vmem:[%s6377_s4 + $0x18] sm:$0xff]   ;;  %v5545_v35 = vld [vmem:[%s6377_s4 + $0x40] sm:$0xff]   ;;  %vm3798_vm3 = vsmask.f32 3328  ;;  %vm3803_vm5 = vcmask 1043459  }
  0x10   : > { %s6409_s25 = smov (!%p292_p3, %s3907_s25), 15  ;;  %4453 = vmatprep.subr.bf16.mxu0 %v5293_v1  ;;  %4597 = vmatprep.subr.bf16.mxu1 %v5293_v1  ;;  %v5558_v37 = vld [vmem:[%s6377_s4 + $0x48] sm:$0xff]   ;;  %v5573_v41 = vld [vmem:[%s6377_s4 + $0x50] sm:$0xff]   ;;  %v5586_v44 = vld [vmem:[%s6377_s4 + $0x58] sm:$0xff]   ;;  %vm3804_vm6 = vsmask.f32 7950 }
  0x11   : > { %s5425_s30 = sshll.u32 %s6409_s25, 2  ;;  %v5604_v51 = vld [vmem:[%s6377_s4 + $0x60] sm:$0xff]   ;;  %v5617_v56 = vld [vmem:[%s6377_s4 + $0x68] sm:$0xff]   ;;  %v5631_v59 = vld [vmem:[%s6377_s4 + $0x70] sm:$0xff]  }
  0x12   : > { %s5434_s11 = scalar_lea.vmem %s6374_s1, %s5425_s30  ;;  %s5440_s14 = scalar_lea.vmem %s6373_s0, %s5425_s30  ;;  %v5643_v61 = vld [vmem:[%s6377_s4 + $0x78] sm:$0xff]   ;;  %v5661_v0 = vld [vmem:[%s6377_s4 + $0x80] sm:$0xff]   ;;  %vm3799_vm4 = vmand %vm3797_vm2, %vm3798_vm3 }
  0x13   : > { %4454 = vmatpush3.bf16.msra.mxu0 %v5293_v1  ;;  %4598 = vmatpush3.bf16.msra.mxu1 %v5293_v1  ;;  %v5443_v4 = vld [vmem:[%s5434_s11] sm:$0xff]   ;;  %v5449_v6 = vld [vmem:[%s5440_s14 + $0x8] sm:$0xff]   ;;  %v5459_v12 = vld [vmem:[%s5440_s14 + $0x10] sm:$0xff]   ;;  %s5526_s26 = scalar_lea.vmem %s6375_s2, %s5425_s30  ;;  %s5533_s29 = scalar_lea.vmem %s6376_s3, %s5425_s30 }
  0x14   : > { %4455 = vmatprep.subr.bf16.mxu0 %v5294_v2  ;;  %4599 = vmatprep.subr.bf16.mxu1 %v5294_v2  ;;  %v5297_v5 = vld [vmem:[%s5440_s14] sm:$0xff]   ;;  %v604_v10 = vshll.u32 %v5449_v6, 16  ;;  %v608_v11 = vshrl.u32 %v5449_v6, 16  ;;  %v5462_v15 = vld [vmem:[%s5434_s11 + $0x8] sm:$0xff]   ;;  %v611_v16 = vshll.u32 %v5459_v12, 16  ;;  %v615_v18 = vshrl.u32 %v5459_v12, 16  ;;  %s6357_s17 = scalar_lea.vmem %s6379_s6, %s5425_s30  ;;  %vm3805_vm7 = vmand %vm3803_vm5, %vm3804_vm6 }
  0x15   : > { %4459 = vmatprep.mubr.msk.bf16.mxu0 %vm394_vm0, %v5443_v4  ;;  %v598_v8 = vshrl.u32 %v5297_v5, 16  ;;  %v600_v9 = vshll.u32 %v5297_v5, 16  ;;  %v5466_v17 = vld [vmem:[%s5440_s14 + $0x18] ss:$0 sps:$4 sm:$0xff]   ;;  %v5481_v25 = vld [vmem:[%s5434_s11 + $0x10] sm:$0xff]   ;;  %v1706_v36 = vshll.u32 %v5443_v4, 16 }
  0x16   : > { %v606_v14 = vrot.slane %v604_v10, 1  ;;  %v613_v21 = vrot.slane %v611_v16, 1  ;;  %v618_v23 = vshll.u32 %v5466_v17, 16  ;;  %v622_v29 = vshrl.u32 %v5466_v17, 16  ;;  %v5510_v32 = vld [vmem:[%s5434_s11 + $0x18] ss:$0 sps:$4 sm:$0xff]  }
  0x17   : > { %4456 = vmatpush3.bf16.msra.mxu0 %v5294_v2  ;;  %4600 = vmatpush3.bf16.msra.mxu1 %v5294_v2  ;;  %v602_v13 = vrot.slane %v600_v9, 1  ;;  %v1704_v38 = vshrl.u32 %v5443_v4, 16  ;;  %v1708_v39 = vrot.slane %v1706_v36, 1  ;;  %v1710_v40 = vshll.u32 %v5462_v15, 16  ;;  %v5647_v62 = vld [vmem:[%s5526_s26] sm:$0xff]   ;;  %v5670_v2 = vld [vmem:[%s5526_s26 + $0x8] sm:$0xff]  }
  0x18   : > { %4457 = vmatprep.subr.bf16.mxu0 %v5295_v3  ;;  %4601 = vmatprep.subr.bf16.mxu1 %v5295_v3  ;;  %v610_v20 = vor.u32 %v608_v11, %v606_v14  ;;  %v617_v27 = vor.u32 %v615_v18, %v613_v21  ;;  %v620_v28 = vrot.slane %v618_v23, 1  ;;  %v1714_v45 = vshrl.u32 %v5462_v15, 16  ;;  %v5652_v63 = vld [vmem:[%s5533_s29] sm:$0xff]   ;;  %v5702_v11 = vld [vmem:[%s6377_s4 + $0x90] sm:$0xff]   ;;  %v5721_v16 = vld [vmem:[%s6377_s4 + $0x98] sm:$0xff]  }
  0x19   : > { %v603_v19 = vor.u32 %v602_v13, %v598_v8  ;;  %v1709_v42 = vor.u32 %v1708_v39, %v1704_v38  ;;  %v1712_v43 = vrot.slane %v1710_v40, 1  ;;  %v1717_v46 = vshll.u32 %v5481_v25, 16  ;;  %v5688_v8 = vld [vmem:[%s5533_s29 + $0x10] sm:$0xff]   ;;  %v5714_v13 = vld [vmem:[%s5533_s29 + $0x18] ss:$0 sps:$4 sm:$0xff]  }
  0x1a   : > { %v5488_v26 = vsel %vm597_vm1, %v610_v20, %v613_v21  ;;  %v5497_v30 = vsel %vm597_vm1, %v617_v27, %v620_v28  ;;  %v5513_v33 = vor.u32 %v622_v29, %v620_v28  ;;  %v1721_v48 = vshrl.u32 %v5481_v25, 16  ;;  %v5777_v40 = vld [vmem:[%s6377_s4 + $0xb0] sm:$0xff]  }
  0x1b   : > { %4458 = vmatpush3.bf16.msra.mxu0 %v5295_v3  ;;  %4602 = vmatpush3.bf16.msra.mxu1 %v5295_v3  ;;  %v5478_v24 = vsel %vm597_vm1, %v603_v19, %v606_v14  ;;  %v1713_v47 = vsel %vm597_vm1, %v1709_v42, %v1712_v43  ;;  %v1724_v49 = vshll.u32 %v5510_v32, 16  ;;  %v1716_v50 = vor.u32 %v1714_v45, %v1712_v43  ;;  %v5673_v3 = vld [vmem:[%s5533_s29 + $0x8] sm:$0xff]  }
  0x1c   : > { %4467 = vmatprep.subr.bf16.mxu0 %v5454_v7  ;;  %4611 = vmatprep.subr.bf16.mxu1 %v5454_v7  ;;  %v1719_v52 = vrot.slane %v1717_v46, 1  ;;  %v1728_v58 = vshrl.u32 %v5510_v32, 16  ;;  %v1022_v1 = vshll.u32 %v5647_v62, 16  ;;  %v1026_v10 = vshll.u32 %v5670_v2, 16  ;;  %v5792_v46 = vld [vmem:[%s6377_s4 + $0xb8] sm:$0xff]  }
  0x1d   : > { %4603 = vmatprep.mubr.msk.bf16.mxu1 %vm394_vm0, %v5478_v24  ;;  %v1726_v54 = vrot.slane %v1724_v49, 1  ;;  %v1958_v28 = vshll.u32 %v5652_v63, 16  ;;  %v1956_v36 = vshrl.u32 %v5652_v63, 16  ;;  %v1962_v39 = vshll.u32 %v5673_v3, 16 }
  0x1e   : > { %4460 = vmatmul.mubr.msk.bf16.vlgmr.msra.gmra.mrb[0].mxu0 %vm394_vm0, %v5462_v15  ;;  %4604 = vmatmul.mubr.msk.bf16.vlgmr.msra.gmra.mrb[0].mxu1 %vm394_vm0, %v5488_v26  ;;  %v1723_v53 = vor.u32 %v1721_v48, %v1719_v52  ;;  %v1720_v55 = vsel %vm597_vm1, %v1716_v50, %v1719_v52  ;;  %v1024_v9 = vrot.slane %v1022_v1, 1  ;;  %v1969_v48 = vshll.u32 %v5688_v8, 16  ;;  %v5828_v1 = vld [vmem:[%s6377_s4 + $0xc8] sm:$0xff]  }
  0x1f   : > { %4468 = vmatpush3.bf16.msra.mxu0 %v5454_v7  ;;  %4612 = vmatpush3.bf16.msra.mxu1 %v5454_v7  ;;  %v1730_v60 = vor.u32 %v1728_v58, %v1726_v54  ;;  %v1960_v38 = vrot.slane %v1958_v28, 1  ;;  %v1964_v45 = vrot.slane %v1962_v39, 1  ;;  %v1973_v50 = vshrl.u32 %v5688_v8, 16  ;;  %v5908_v28 = vld [vmem:[%s5434_s11 + $0x14] sm:$0xff]  }
  0x20   : > { %4469 = vmatprep.subr.bf16.mxu0 %v5474_v22  ;;  %4613 = vmatprep.subr.bf16.mxu1 %v5474_v22  ;;  %v1727_v57 = vsel %vm597_vm1, %v1723_v53, %v1726_v54  ;;  %v1976_v52 = vshll.u32 %v5714_v13, 16  ;;  %v5812_v54 = vld [vmem:[%s6377_s4 + $0xc0] sm:$0xff]   ;;  %v5920_v39 = vld [vmem:[%s6377_s4 + $0xf0] sm:$0xff]  }
  0x21   : > { %4463 = vmatprep.mubr.msk.bf16.mxu0 %vm394_vm0, %v5481_v25  ;;  %4607 = vmatprep.mubr.msk.bf16.mxu1 %vm394_vm0, %v5497_v30  ;;  %v1961_v43 = vor.u32 %v1960_v38, %v1956_v36  ;;  %6396 = vst [vmem:[#allocation4_spill] sm:$0xff] %v5920_v39 }
  0x22   : > { %v1978_v58 = vrot.slane %v1976_v52, 1 }
  0x23   : > { %4470 = vmatpush3.bf16.msra.mxu0 %v5474_v22  ;;  %4614 = vmatpush3.bf16.msra.mxu1 %v5474_v22  ;;  %v5803_v49 = vsel %vm597_vm1, %v1961_v43, %v1964_v45  ;;  %v5928_v43 = vld [vmem:[%s5440_s14 + $0x1c] ss:$0 sps:$4 sm:$0xff]  }
  0x24   : > { %4471 = vmatprep.subr.bf16.mxu0 %v5502_v31  ;;  %4615 = vmatprep.subr.bf16.mxu1 %v5502_v31 }
  0x26   : > { %4464 = vmatmul.mubr.msk.bf16.gmra.mrb[4].mxu0 %vm394_vm0, %v5510_v32  ;;  %4608 = vmatmul.mubr.msk.bf16.gmra.mrb[4].mxu1 %vm394_vm0, %v5513_v33 }
  0x27   : > { %4472 = vmatpush3.bf16.msra.mxu0 %v5502_v31  ;;  %4616 = vmatpush3.bf16.msra.mxu1 %v5502_v31 }
  0x28   : > { %4473 = vmatprep.subr.bf16.mxu0 %v5520_v34  ;;  %4617 = vmatprep.subr.bf16.mxu1 %v5520_v34 }
  0x29   : > { %4475 = vmatprep.mubr.msk.bf16.mxu0 %vm394_vm0, %v5297_v5  ;;  %4619 = vmatprep.mubr.msk.bf16.mxu1 %vm394_vm0, %v5443_v4  ;;  %v5679_v4 = vld [vmem:[%s6377_s4 + $0x88] sm:$0xff]   ;;  %v1020_v5 = vshrl.u32 %v5647_v62, 16 }
  0x2b   : > { %4474 = vmatpush3.bf16.msra.mxu0 %v5520_v34  ;;  %4618 = vmatpush3.bf16.msra.mxu1 %v5520_v34  ;;  %v1025_v14 = vor.u32 %v1024_v9, %v1020_v5  ;;  %v1980_v9 = vshrl.u32 %v5714_v13, 16 }
  0x2c   : > { %4483 = vmatprep.subr.bf16.mxu0 %v5545_v35  ;;  %4627 = vmatprep.subr.bf16.mxu1 %v5545_v35 }
  0x2e   : > { %4476 = vmatmul.mubr.msk.bf16.vlgmr.msra.gmra.mrb[0].mxu0 %vm394_vm0, %v5449_v6  ;;  %4620 = vmatmul.mubr.msk.bf16.vlgmr.msra.gmra.mrb[0].mxu1 %vm394_vm0, %v5462_v15  ;;  %v5685_v6 = vld [vmem:[%s5526_s26 + $0x10] sm:$0xff]   ;;  %v1028_v15 = vrot.slane %v1026_v10, 1 }
  0x2f   : > { %4484 = vmatpush3.bf16.msra.mxu0 %v5545_v35  ;;  %4628 = vmatpush3.bf16.msra.mxu1 %v5545_v35  ;;  %v1033_v18 = vshll.u32 %v5685_v6, 16  ;;  %v1037_v20 = vshrl.u32 %v5685_v6, 16  ;;  %v5845_v10 = vld [vmem:[%s6377_s4 + $0xd0] sm:$0xff]  }
  0x30   : > { %4485 = vmatprep.subr.bf16.mxu0 %v5558_v37  ;;  %4629 = vmatprep.subr.bf16.mxu1 %v5558_v37  ;;  %v5732_v19 = vsel %vm597_vm1, %v1025_v14, %v1028_v15  ;;  %v5853_v14 = vor.u32 %v1980_v9, %v1978_v58 }
  0x31   : > { %4479 = vmatprep.mubr.msk.bf16.mxu0 %vm394_vm0, %v5459_v12  ;;  %4623 = vmatprep.mubr.msk.bf16.mxu1 %vm394_vm0, %v5481_v25  ;;  %v5710_v12 = vld [vmem:[%s5526_s26 + $0x18] ss:$0 sps:$4 sm:$0xff]   ;;  %v1035_v25 = vrot.slane %v1033_v18, 1  ;;  %v5869_v18 = vld [vmem:[%s5434_s11 + $0x4] sm:$0xff]  }
  0x32   : > { %v1040_v21 = vshll.u32 %v5710_v12, 16 }
  0x33   : > { %4486 = vmatpush3.bf16.msra.mxu0 %v5558_v37  ;;  %4630 = vmatpush3.bf16.msra.mxu1 %v5558_v37 }
  0x34   : > { %4487 = vmatprep.subr.bf16.mxu0 %v5573_v41  ;;  %4631 = vmatprep.subr.bf16.mxu1 %v5573_v41  ;;  %v1042_v27 = vrot.slane %v1040_v21, 1  ;;  %v5887_v21 = vld [vmem:[%s5440_s14 + $0xc] sm:$0xff]  }
  0x35   : > { %v1448_v38 = vshll.u32 %v5887_v21, 16  ;;  %v1452_v52 = vshrl.u32 %v5887_v21, 16 }
  0x36   : > { %4480 = vmatmul.mubr.msk.bf16.gmra.mrb[4].mxu0 %vm394_vm0, %v5466_v17  ;;  %4624 = vmatmul.mubr.msk.bf16.gmra.mrb[4].mxu1 %vm394_vm0, %v5510_v32  ;;  %v1030_v17 = vshrl.u32 %v5670_v2, 16  ;;  %v1044_v32 = vshrl.u32 %v5710_v12, 16 }
  0x37   : > { %4488 = vmatpush3.bf16.msra.mxu0 %v5573_v41  ;;  %4632 = vmatpush3.bf16.msra.mxu1 %v5573_v41 }
  0x38   : > { %4489 = vmatprep.subr.bf16.mxu0 %v5586_v44  ;;  %4633 = vmatprep.subr.bf16.mxu1 %v5586_v44  ;;  %v1032_v23 = vor.u32 %v1030_v17, %v1028_v15  ;;  %v5785_v42 = vor.u32 %v1044_v32, %v1042_v27  ;;  %v5860_v15 = vld [vmem:[%s6377_s4 + $0xd8] sm:$0xff]   ;;  %v5864_v17 = vld [vmem:[%s5440_s14 + $0x4] sm:$0xff]  }
  0x39   : > { %4491 = vmatprep.mubr.msk.bf16.mxu0 %vm394_vm0, %v5478_v24  ;;  %4635 = vmatprep.mubr.msk.bf16.mxu1 %vm394_vm0, %v1713_v47  ;;  %v5741_v24 = vld [vmem:[%s6377_s4 + $0xa0] sm:$0xff]   ;;  %v1966_v47 = vshrl.u32 %v5673_v3, 16  ;;  %v1442_v32 = vshrl.u32 %v5864_v17, 16 }
  0x3a   : > { %v5753_v29 = vsel %vm597_vm1, %v1032_v23, %v1035_v25  ;;  %v5891_v23 = vld [vmem:[%s5434_s11 + $0xc] sm:$0xff]  }
  0x3b   : > { %4490 = vmatpush3.bf16.msra.mxu0 %v5586_v44  ;;  %4634 = vmatpush3.bf16.msra.mxu1 %v5586_v44  ;;  %v1968_v53 = vor.u32 %v1966_v47, %v1964_v45  ;;  %v5932_v45 = vld [vmem:[%s5434_s11 + $0x1c] ss:$0 sps:$4 sm:$0xff]  }
  0x3c   : > { %4499 = vmatprep.subr.bf16.mxu0 %v5604_v51  ;;  %4643 = vmatprep.subr.bf16.mxu1 %v5604_v51 }
  0x3e   : > { %4492 = vmatmul.mubr.msk.bf16.vlgmr.msra.gmra.mrb[0].mxu0 %vm394_vm0, %v5488_v26  ;;  %4636 = vmatmul.mubr.msk.bf16.vlgmr.msra.gmra.mrb[0].mxu1 %vm394_vm0, %v1720_v55  ;;  %v1039_v26 = vor.u32 %v1037_v20, %v1035_v25  ;;  %v1971_v55 = vrot.slane %v1969_v48, 1  ;;  %v5879_v20 = vld [vmem:[%s6377_s4 + $0xe0] sm:$0xff]   ;;  %v1444_v25 = vshll.u32 %v5864_v17, 16  ;;  %v1450_v48 = vrot.slane %v1448_v38, 1 }
  0x3f   : > { %4500 = vmatpush3.bf16.msra.mxu0 %v5604_v51  ;;  %4644 = vmatpush3.bf16.msra.mxu1 %v5604_v51  ;;  %6394 = vst [vmem:[#allocation2_spill] sm:$0xff] %v5879_v20 }
  0x40   : > { %4501 = vmatprep.subr.bf16.mxu0 %v5617_v56  ;;  %4645 = vmatprep.subr.bf16.mxu1 %v5617_v56  ;;  %v1446_v36 = vrot.slane %v1444_v25, 1  ;;  %v1454_v9 = vor.u32 %v1452_v52, %v1450_v48  ;;  %v5959_v25 = vld [vmem:[%s6377_s4 + $0x100] sm:$0xff]   ;;  %v5976_v52 = vld [vmem:[%s6377_s4 + $0x108] sm:$0xff]  }
  0x41   : > { %4495 = vmatprep.mubr.msk.bf16.mxu0 %vm394_vm0, %v5497_v30  ;;  %4639 = vmatprep.mubr.msk.bf16.mxu1 %vm394_vm0, %v1727_v57  ;;  %v5758_v30 = vld [vmem:[%s6377_s4 + $0xa8] sm:$0xff]   ;;  %v1975_v57 = vor.u32 %v1973_v50, %v1971_v55  ;;  %v5939_v50 = vld [vmem:[%s6377_s4 + $0xf8] sm:$0xff]   ;;  %6398 = vst [vmem:[#allocation6_spill] sm:$0xff] %v5959_v25  ;;  %6399 = vst [vmem:[#allocation7_spill] sm:$0xff] %v5976_v52 }
  0x42   : > { %v1447_v47 = vor.u32 %v1446_v36, %v1442_v32  ;;  %6397 = vst [vmem:[#allocation5_spill] sm:$0xff] %v5939_v50 }
  0x43   : > { %4502 = vmatpush3.bf16.msra.mxu0 %v5617_v56  ;;  %4646 = vmatpush3.bf16.msra.mxu1 %v5617_v56  ;;  %v5837_v5 = vsel %vm597_vm1, %v1975_v57, %v1978_v58  ;;  %v1462_v58 = vshll.u32 %v5928_v43, 16 }
  0x44   : > { %4503 = vmatprep.subr.bf16.mxu0 %v5631_v59  ;;  %4647 = vmatprep.subr.bf16.mxu1 %v5631_v59 }
  0x45   : > { %v1464_v38 = vrot.slane %v1462_v58, 1  ;;  %v2208_v58 = vshrl.u32 %v5869_v18, 16 }
  0x46   : > { %4496 = vmatmul.mubr.msk.bf16.gmra.mrb[4].mxu0 %vm394_vm0, %v5513_v33  ;;  %4640 = vmatmul.mubr.msk.bf16.gmra.mrb[4].mxu1 %vm394_vm0, %v1730_v60  ;;  %v5768_v33 = vsel %vm597_vm1, %v1039_v26, %v1042_v27  ;;  %v5823_v60 = vsel %vm597_vm1, %v1968_v53, %v1971_v55  ;;  %v5899_v26 = vld [vmem:[%s6377_s4 + $0xe8] sm:$0xff]   ;;  %v5903_v27 = vld [vmem:[%s5440_s14 + $0x14] sm:$0xff]   ;;  %v5950_v55 = vsel %vm597_vm1, %v1447_v47, %v1450_v48  ;;  %v2210_v47 = vshll.u32 %v5869_v18, 16 }
  0x47   : > { %4504 = vmatpush3.bf16.msra.mxu0 %v5631_v59  ;;  %4648 = vmatpush3.bf16.msra.mxu1 %v5631_v59  ;;  %6395 = vst [vmem:[#allocation3_spill] sm:$0xff] %v5899_v26  ;;  %v1455_v53 = vshll.u32 %v5903_v27, 16  ;;  %v1459_v57 = vshrl.u32 %v5903_v27, 16 }
  0x48   : > { %4505 = vmatprep.subr.bf16.mxu0 %v5643_v61  ;;  %4649 = vmatprep.subr.bf16.mxu1 %v5643_v61 }
  0x49   : > { %4507 = vmatprep.mubr.msk.bf16.mxu0 %vm394_vm0, %v5647_v62  ;;  %4651 = vmatprep.mubr.msk.bf16.mxu1 %vm394_vm0, %v5652_v63  ;;  %v1457_v32 = vrot.slane %v1455_v53, 1  ;;  %v1466_v53 = vshrl.u32 %v5928_v43, 16 }
  0x4b   : > { %4506 = vmatpush3.bf16.msra.mxu0 %v5643_v61  ;;  %4650 = vmatpush3.bf16.msra.mxu1 %v5643_v61  ;;  %v1461_v36 = vor.u32 %v1459_v57, %v1457_v32  ;;  %v5971_v48 = vsel %vm597_vm1, %v1454_v9, %v1457_v32  ;;  %v2212_v9 = vrot.slane %v2210_v47, 1  ;;  %v2214_v32 = vshll.u32 %v5891_v23, 16 }
  0x4c   : > { %4515 = vmatprep.subr.bf16.mxu0 %v5661_v0  ;;  %4659 = vmatprep.subr.bf16.mxu1 %v5661_v0 }
  0x4d   : > { %v5986_v57 = vsel %vm597_vm1, %v1461_v36, %v1464_v38  ;;  %v6003_v36 = vor.u32 %v1466_v53, %v1464_v38  ;;  %v2213_v47 = vor.u32 %v2212_v9, %v2208_v58  ;;  %v2225_v53 = vshrl.u32 %v5908_v28, 16 }
  0x4e   : > { %4508 = vmatmul.mubr.msk.bf16.vlgmr.msra.gmra.mrb[0].mxu0 %vm394_vm0, %v5670_v2  ;;  %4652 = vmatmul.mubr.msk.bf16.vlgmr.msra.gmra.mrb[0].mxu1 %vm394_vm0, %v5673_v3  ;;  %v2228_v58 = vshll.u32 %v5932_v45, 16 }
  0x4f   : > { %4516 = vmatpush3.bf16.msra.mxu0 %v5661_v0  ;;  %4660 = vmatpush3.bf16.msra.mxu1 %v5661_v0 }
  0x50   : > { %4517 = vmatprep.subr.bf16.mxu0 %v5679_v4  ;;  %4661 = vmatprep.subr.bf16.mxu1 %v5679_v4 }
  0x51   : > { %4511 = vmatprep.mubr.msk.bf16.mxu0 %vm394_vm0, %v5685_v6  ;;  %4655 = vmatprep.mubr.msk.bf16.mxu1 %vm394_vm0, %v5688_v8 }
  0x53   : > { %4518 = vmatpush3.bf16.msra.mxu0 %v5679_v4  ;;  %4662 = vmatpush3.bf16.msra.mxu1 %v5679_v4 }
  0x54   : > { %4519 = vmatprep.subr.bf16.mxu0 %v5702_v11  ;;  %4663 = vmatprep.subr.bf16.mxu1 %v5702_v11 }
  0x56   : > { %4512 = vmatmul.mubr.msk.bf16.gmra.mrb[4].mxu0 %vm394_vm0, %v5710_v12  ;;  %4656 = vmatmul.mubr.msk.bf16.gmra.mrb[4].mxu1 %vm394_vm0, %v5714_v13 }
  0x57   : > { %4520 = vmatpush3.bf16.msra.mxu0 %v5702_v11  ;;  %4664 = vmatpush3.bf16.msra.mxu1 %v5702_v11 }
  0x58   : > { %4521 = vmatprep.subr.bf16.mxu0 %v5721_v16  ;;  %4665 = vmatprep.subr.bf16.mxu1 %v5721_v16 }
  0x59   : > { %4523 = vmatprep.mubr.msk.bf16.mxu0 %vm394_vm0, %v5652_v63  ;;  %4667 = vmatprep.mubr.msk.bf16.mxu1 %vm394_vm0, %v5732_v19 }
  0x5b   : > { %4522 = vmatpush3.bf16.msra.mxu0 %v5721_v16  ;;  %4666 = vmatpush3.bf16.msra.mxu1 %v5721_v16 }
  0x5c   : > { %4531 = vmatprep.subr.bf16.mxu0 %v5741_v24  ;;  %4675 = vmatprep.subr.bf16.mxu1 %v5741_v24 }
  0x5e   : > { %4524 = vmatmul.mubr.msk.bf16.vlgmr.msra.gmra.mrb[0].mxu0 %vm394_vm0, %v5673_v3  ;;  %4668 = vmatmul.mubr.msk.bf16.vlgmr.msra.gmra.mrb[0].mxu1 %vm394_vm0, %v5753_v29 }
  0x5f   : > { %4532 = vmatpush3.bf16.msra.mxu0 %v5741_v24  ;;  %4676 = vmatpush3.bf16.msra.mxu1 %v5741_v24 }
  0x60   : > { %4533 = vmatprep.subr.bf16.mxu0 %v5758_v30  ;;  %4677 = vmatprep.subr.bf16.mxu1 %v5758_v30 }
  0x61   : > { %4527 = vmatprep.mubr.msk.bf16.mxu0 %vm394_vm0, %v5688_v8  ;;  %4671 = vmatprep.mubr.msk.bf16.mxu1 %vm394_vm0, %v5768_v33 }
  0x63   : > { %4534 = vmatpush3.bf16.msra.mxu0 %v5758_v30  ;;  %4678 = vmatpush3.bf16.msra.mxu1 %v5758_v30 }
  0x64   : > { %4535 = vmatprep.subr.bf16.mxu0 %v5777_v40  ;;  %4679 = vmatprep.subr.bf16.mxu1 %v5777_v40 }
  0x66   : > { %4528 = vmatmul.mubr.msk.bf16.gmra.mrb[4].mxu0 %vm394_vm0, %v5714_v13  ;;  %4672 = vmatmul.mubr.msk.bf16.gmra.mrb[4].mxu1 %vm394_vm0, %v5785_v42 }
  0x67   : > { %4536 = vmatpush3.bf16.msra.mxu0 %v5777_v40  ;;  %4680 = vmatpush3.bf16.msra.mxu1 %v5777_v40 }
  0x68   : > { %4537 = vmatprep.subr.bf16.mxu0 %v5792_v46  ;;  %4681 = vmatprep.subr.bf16.mxu1 %v5792_v46 }
  0x69   : > { %4539 = vmatprep.mubr.msk.bf16.mxu0 %vm394_vm0, %v5732_v19  ;;  %4683 = vmatprep.mubr.msk.bf16.mxu1 %vm394_vm0, %v5803_v49 }
  0x6b   : > { %4538 = vmatpush3.bf16.msra.mxu0 %v5792_v46  ;;  %4682 = vmatpush3.bf16.msra.mxu1 %v5792_v46 }
  0x6c   : > { %4547 = vmatprep.subr.bf16.mxu0 %v5812_v54  ;;  %4691 = vmatprep.subr.bf16.mxu1 %v5812_v54 }
  0x6e   : > { %4540 = vmatmul.mubr.msk.bf16.vlgmr.msra.gmra.mrb[0].mxu0 %vm394_vm0, %v5753_v29  ;;  %4684 = vmatmul.mubr.msk.bf16.vlgmr.msra.gmra.mrb[0].mxu1 %vm394_vm0, %v5823_v60 }
  0x6f   : > { %4548 = vmatpush3.bf16.msra.mxu0 %v5812_v54  ;;  %4692 = vmatpush3.bf16.msra.mxu1 %v5812_v54 }
  0x70   : > { %4549 = vmatprep.subr.bf16.mxu0 %v5828_v1  ;;  %4693 = vmatprep.subr.bf16.mxu1 %v5828_v1 }
  0x71   : > { %4543 = vmatprep.mubr.msk.bf16.mxu0 %vm394_vm0, %v5768_v33  ;;  %4687 = vmatprep.mubr.msk.bf16.mxu1 %vm394_vm0, %v5837_v5 }
  0x73   : > { %4550 = vmatpush3.bf16.msra.mxu0 %v5828_v1  ;;  %4694 = vmatpush3.bf16.msra.mxu1 %v5828_v1 }
  0x74   : > { %4551 = vmatprep.subr.bf16.mxu0 %v5845_v10  ;;  %4695 = vmatprep.subr.bf16.mxu1 %v5845_v10 }
  0x76   : > { %4544 = vmatmul.mubr.msk.bf16.gmra.mrb[4].mxu0 %vm394_vm0, %v5785_v42  ;;  %4688 = vmatmul.mubr.msk.bf16.gmra.mrb[4].mxu1 %vm394_vm0, %v5853_v14 }
  0x77   : > { %4552 = vmatpush3.bf16.msra.mxu0 %v5845_v10  ;;  %4696 = vmatpush3.bf16.msra.mxu1 %v5845_v10 }
  0x78   : > { %4553 = vmatprep.subr.bf16.mxu0 %v5860_v15  ;;  %4697 = vmatprep.subr.bf16.mxu1 %v5860_v15 }
  0x79   : > { %4555 = vmatprep.mubr.msk.bf16.mxu0 %vm394_vm0, %v5864_v17  ;;  %4699 = vmatprep.mubr.msk.bf16.mxu1 %vm394_vm0, %v5869_v18 }
  0x7b   : > { %4554 = vmatpush3.bf16.msra.mxu0 %v5860_v15  ;;  %4698 = vmatpush3.bf16.msra.mxu1 %v5860_v15 }
  0x7c   : > { %4563 = vmatprep.subr.bf16.mxu0 %v5879_v20  ;;  %4707 = vmatprep.subr.bf16.mxu1 %v5879_v20 }
  0x7e   : > { %4556 = vmatmul.mubr.msk.bf16.vlgmr.msra.gmra.mrb[0].mxu0 %vm394_vm0, %v5887_v21  ;;  %4700 = vmatmul.mubr.msk.bf16.vlgmr.msra.gmra.mrb[0].mxu1 %vm394_vm0, %v5891_v23 }
  0x7f   : > { %4564 = vmatpush3.bf16.msra.mxu0 %v5879_v20  ;;  %4708 = vmatpush3.bf16.msra.mxu1 %v5879_v20  ;;  %v2221_v20 = vshll.u32 %v5908_v28, 16 }
  0x80   : > { %4565 = vmatprep.subr.bf16.mxu0 %v5899_v26  ;;  %4709 = vmatprep.subr.bf16.mxu1 %v5899_v26 }
  0x81   : > { %4559 = vmatprep.mubr.msk.bf16.mxu0 %vm394_vm0, %v5903_v27  ;;  %4703 = vmatprep.mubr.msk.bf16.mxu1 %vm394_vm0, %v5908_v28 }
  0x83   : > { %4566 = vmatpush3.bf16.msra.mxu0 %v5899_v26  ;;  %4710 = vmatpush3.bf16.msra.mxu1 %v5899_v26  ;;  %v2218_v26 = vshrl.u32 %v5891_v23, 16 }
  0x84   : > { %4567 = vmatprep.subr.bf16.mxu0 %v5920_v39  ;;  %4711 = vmatprep.subr.bf16.mxu1 %v5920_v39 }
  0x86   : > { %4560 = vmatmul.mubr.msk.bf16.gmra.mrb[4].mxu0 %vm394_vm0, %v5928_v43  ;;  %4704 = vmatmul.mubr.msk.bf16.gmra.mrb[4].mxu1 %vm394_vm0, %v5932_v45 }
  0x87   : > { %4568 = vmatpush3.bf16.msra.mxu0 %v5920_v39  ;;  %4712 = vmatpush3.bf16.msra.mxu1 %v5920_v39  ;;  %v6010_v39 = vld [vmem:[%s6377_s4 + $0x118] sm:$0xff]  }
  0x88   : > { %4569 = vmatprep.subr.bf16.mxu0 %v5939_v50  ;;  %4713 = vmatprep.subr.bf16.mxu1 %v5939_v50 }
  0x89   : > { %4571 = vmatprep.mubr.msk.bf16.mxu0 %vm394_vm0, %v5869_v18  ;;  %4715 = vmatprep.mubr.msk.bf16.mxu1 %vm394_vm0, %v5950_v55 }
  0x8b   : > { %4570 = vmatpush3.bf16.msra.mxu0 %v5939_v50  ;;  %4714 = vmatpush3.bf16.msra.mxu1 %v5939_v50  ;;  %v5995_v50 = vld [vmem:[%s6377_s4 + $0x110] sm:$0xff]  }
  0x8c   : > { %4579 = vmatprep.subr.bf16.mxu0 %v5959_v25  ;;  %4723 = vmatprep.subr.bf16.mxu1 %v5959_v25  ;;  %6400 = vst [vmem:[#allocation8_spill] sm:$0xff] %v5995_v50 }
  0x8e   : > { %4572 = vmatmul.mubr.msk.bf16.vlgmr.msra.gmra.mrb[0].mxu0 %vm394_vm0, %v5891_v23  ;;  %4716 = vmatmul.mubr.msk.bf16.vlgmr.msra.gmra.mrb[0].mxu1 %vm394_vm0, %v5971_v48 }
  0x8f   : > { %4580 = vmatpush3.bf16.msra.mxu0 %v5959_v25  ;;  %4724 = vmatpush3.bf16.msra.mxu1 %v5959_v25  ;;  %v2216_v25 = vrot.slane %v2214_v32, 1  ;;  %v2223_v32 = vrot.slane %v2221_v20, 1  ;;  %v5360_v20 = vld [vmem:[%s6377_s4 + $0x20] sm:$0xff]  }
  0x90   : > { %4581 = vmatprep.subr.bf16.mxu0 %v5976_v52  ;;  %4725 = vmatprep.subr.bf16.mxu1 %v5976_v52 }
  0x91   : > { %4575 = vmatprep.mubr.msk.bf16.mxu0 %vm394_vm0, %v5908_v28  ;;  %4719 = vmatprep.mubr.msk.bf16.mxu1 %vm394_vm0, %v5986_v57  ;;  %v6021_v38 = vsel %vm597_vm1, %v2213_v47, %v2216_v25  ;;  %v2220_v9 = vor.u32 %v2218_v26, %v2216_v25  ;;  %v2227_v47 = vor.u32 %v2225_v53, %v2223_v32  ;;  %v2232_v25 = vshrl.u32 %v5932_v45, 16  ;;  %v5361_v53 = vld [vmem:[%s6377_s4 + $0x28] sm:$0xff]  }
  0x93   : > { %4582 = vmatpush3.bf16.msra.mxu0 %v5976_v52  ;;  %4726 = vmatpush3.bf16.msra.mxu1 %v5976_v52  ;;  %v2230_v52 = vrot.slane %v2228_v58, 1 }
  0x94   : > { %4583 = vmatprep.subr.bf16.mxu0 %v5995_v50  ;;  %4727 = vmatprep.subr.bf16.mxu1 %v5995_v50 }
  0x95   : > { %v6045_v26 = vsel %vm597_vm1, %v2227_v47, %v2230_v52  ;;  %v6055_v58 = vor.u32 %v2232_v25, %v2230_v52  ;;  %v5363_v52 = vld [vmem:[%s6377_s4 + $0x38] sm:$0xff]  }
  0x96   : > { %4576 = vmatmul.mubr.msk.bf16.gmra.mrb[4].mxu0 %vm394_vm0, %v5932_v45  ;;  %4720 = vmatmul.mubr.msk.bf16.gmra.mrb[4].mxu1 %vm394_vm0, %v6003_v36 }
  0x97   : > { %4584 = vmatpush3.bf16.msra.mxu0 %v5995_v50  ;;  %4728 = vmatpush3.bf16.msra.mxu1 %v5995_v50  ;;  %v6035_v50 = vsel %vm597_vm1, %v2220_v9, %v2223_v32  ;;  %v5362_v9 = vld [vmem:[%s6377_s4 + $0x30] sm:$0xff]  }
  0x98   : > { %4585 = vmatprep.subr.bf16.mxu0 %v6010_v39  ;;  %4729 = vmatprep.subr.bf16.mxu1 %v6010_v39 }
  0x99   : > { %4587 = vmatprep.mubr.msk.bf16.mxu0 %vm394_vm0, %v5950_v55  ;;  %4731 = vmatprep.mubr.msk.bf16.mxu1 %vm394_vm0, %v6021_v38 }
  0x9b   : > { %4586 = vmatpush3.bf16.msra.mxu0 %v6010_v39  ;;  %4730 = vmatpush3.bf16.msra.mxu1 %v6010_v39 }
  0x9c   : > { %4739 = vmatprep.subr.bf16.mxu0 %v5360_v20  ;;  %4883 = vmatprep.subr.bf16.mxu1 %v5360_v20 }
  0x9e   : > { %4588 = vmatmul.mubr.msk.bf16.vlgmr.msra.gmra.mrb[0].mxu0 %vm394_vm0, %v5971_v48  ;;  %4732 = vmatmul.mubr.msk.bf16.vlgmr.msra.gmra.mrb[0].mxu1 %vm394_vm0, %v6035_v50 }
  0x9f   : > { %4740 = vmatpush3.bf16.msra.mxu0 %v5360_v20  ;;  %4884 = vmatpush3.bf16.msra.mxu1 %v5360_v20 }
  0xa0   : > { %4741 = vmatprep.subr.bf16.mxu0 %v5361_v53  ;;  %4885 = vmatprep.subr.bf16.mxu1 %v5361_v53 }
  0xa1   : > { %4591 = vmatprep.mubr.msk.bf16.mxu0 %vm394_vm0, %v5986_v57  ;;  %4735 = vmatprep.mubr.msk.bf16.mxu1 %vm394_vm0, %v6045_v26 }
  0xa3   : > { %4742 = vmatpush3.bf16.msra.mxu0 %v5361_v53  ;;  %4886 = vmatpush3.bf16.msra.mxu1 %v5361_v53 }
  0xa4   : > { %4743 = vmatprep.subr.bf16.mxu0 %v5362_v9  ;;  %4887 = vmatprep.subr.bf16.mxu1 %v5362_v9 }
  0xa6   : > { %4592 = vmatmul.mubr.msk.bf16.gmra.mrb[4].mxu0 %vm394_vm0, %v6003_v36  ;;  %4736 = vmatmul.mubr.msk.bf16.gmra.mrb[4].mxu1 %vm394_vm0, %v6055_v58 }
  0xa7   : > { %4744 = vmatpush3.bf16.msra.mxu0 %v5362_v9  ;;  %4888 = vmatpush3.bf16.msra.mxu1 %v5362_v9 }
  0xa8   : > { %4745 = vmatprep.subr.bf16.mxu0 %v5363_v52  ;;  %4889 = vmatprep.subr.bf16.mxu1 %v5363_v52 }
  0xa9   : > { %4747 = vmatprep.mubr.msk.bf16.mxu0 %vm394_vm0, %v5652_v63  ;;  %4891 = vmatprep.mubr.msk.bf16.mxu1 %vm394_vm0, %v5732_v19 }
  0xab   : > { %4746 = vmatpush3.bf16.msra.mxu0 %v5363_v52  ;;  %4890 = vmatpush3.bf16.msra.mxu1 %v5363_v52 }
  0xac   : > { %4755 = vmatprep.subr.bf16.mxu0 %v5454_v7  ;;  %4899 = vmatprep.subr.bf16.mxu1 %v5454_v7 }
  0xae   : > { %4748 = vmatmul.mubr.msk.bf16.vlgmr.msra.gmra.mrb[8].mxu0 %vm394_vm0, %v5673_v3  ;;  %4892 = vmatmul.mubr.msk.bf16.vlgmr.msra.gmra.mrb[8].mxu1 %vm394_vm0, %v5753_v29 }
  0xaf   : > { %4756 = vmatpush3.bf16.msra.mxu0 %v5454_v7  ;;  %4900 = vmatpush3.bf16.msra.mxu1 %v5454_v7  ;;  %v5352_v7 = vld [vmem:[%s5526_s26 + $0x4] sm:$0xff]  }
  0xb0   : > { %4757 = vmatprep.subr.bf16.mxu0 %v5474_v22  ;;  %4901 = vmatprep.subr.bf16.mxu1 %v5474_v22 }
  0xb1   : > { %4751 = vmatprep.mubr.msk.bf16.mxu0 %vm394_vm0, %v5688_v8  ;;  %4895 = vmatprep.mubr.msk.bf16.mxu1 %vm394_vm0, %v5768_v33 }
  0xb3   : > { %4758 = vmatpush3.bf16.msra.mxu0 %v5474_v22  ;;  %4902 = vmatpush3.bf16.msra.mxu1 %v5474_v22  ;;  %v6253_v22 = vld [vmem:[%s5533_s29 + $0x4] sm:$0xff]  }
  0xb4   : > { %4759 = vmatprep.subr.bf16.mxu0 %v5502_v31  ;;  %4903 = vmatprep.subr.bf16.mxu1 %v5502_v31 }
  0xb6   : > { %4752 = vmatmul.mubr.msk.bf16.gmra.mrb[12].mxu0 %vm394_vm0, %v5714_v13  ;;  %4896 = vmatmul.mubr.msk.bf16.gmra.mrb[12].mxu1 %vm394_vm0, %v5785_v42 }
  0xb7   : > { %4760 = vmatpush3.bf16.msra.mxu0 %v5502_v31  ;;  %4904 = vmatpush3.bf16.msra.mxu1 %v5502_v31  ;;  %v5354_v31 = vld [vmem:[%s5526_s26 + $0xc] sm:$0xff]  }
  0xb8   : > { %4761 = vmatprep.subr.bf16.mxu0 %v5520_v34  ;;  %4905 = vmatprep.subr.bf16.mxu1 %v5520_v34 }
  0xb9   : > { %4763 = vmatprep.mubr.msk.bf16.mxu0 %vm394_vm0, %v5647_v62  ;;  %4907 = vmatprep.mubr.msk.bf16.mxu1 %vm394_vm0, %v5652_v63  ;;  %v5358_v62 = vld [vmem:[%s5526_s26 + $0x1c] ss:$0 sps:$4 sm:$0xff]  }
  0xba   : > { %v6289_v63 = vld [vmem:[%s5533_s29 + $0x1c] ss:$0 sps:$4 sm:$0xff]  }
  0xbb   : > { %4762 = vmatpush3.bf16.msra.mxu0 %v5520_v34  ;;  %4906 = vmatpush3.bf16.msra.mxu1 %v5520_v34  ;;  %v6267_v34 = vld [vmem:[%s5533_s29 + $0xc] sm:$0xff]  }
  0xbc   : > { %4771 = vmatprep.subr.bf16.mxu0 %v5545_v35  ;;  %4915 = vmatprep.subr.bf16.mxu1 %v5545_v35 }
  0xbe   : > { %4764 = vmatmul.mubr.msk.bf16.vlgmr.msra.gmra.mrb[8].mxu0 %vm394_vm0, %v5670_v2  ;;  %4908 = vmatmul.mubr.msk.bf16.vlgmr.msra.gmra.mrb[8].mxu1 %vm394_vm0, %v5673_v3 }
  0xbf   : > { %4772 = vmatpush3.bf16.msra.mxu0 %v5545_v35  ;;  %4916 = vmatpush3.bf16.msra.mxu1 %v5545_v35  ;;  %v2955_v35 = vshll.u32 %v5352_v7, 16 }
  0xc0   : > { %4773 = vmatprep.subr.bf16.mxu0 %v5558_v37  ;;  %4917 = vmatprep.subr.bf16.mxu1 %v5558_v37 }
  0xc1   : > { %4767 = vmatprep.mubr.msk.bf16.mxu0 %vm394_vm0, %v5685_v6  ;;  %4911 = vmatprep.mubr.msk.bf16.mxu1 %vm394_vm0, %v5688_v8  ;;  %v2963_v6 = vshrl.u32 %v5354_v31, 16 }
  0xc3   : > { %4774 = vmatpush3.bf16.msra.mxu0 %v5558_v37  ;;  %4918 = vmatpush3.bf16.msra.mxu1 %v5558_v37  ;;  %v6401_v37 = vld [vmem:[#allocation2_spill] sm:$0xff] }
  0xc4   : > { %4775 = vmatprep.subr.bf16.mxu0 %v5573_v41  ;;  %4919 = vmatprep.subr.bf16.mxu1 %v5573_v41 }
  0xc6   : > { %4768 = vmatmul.mubr.msk.bf16.gmra.mrb[12].mxu0 %vm394_vm0, %v5710_v12  ;;  %4912 = vmatmul.mubr.msk.bf16.gmra.mrb[12].mxu1 %vm394_vm0, %v5714_v13  ;;  %v2973_v12 = vshll.u32 %v5358_v62, 16 }
  0xc7   : > { %4776 = vmatpush3.bf16.msra.mxu0 %v5573_v41  ;;  %4920 = vmatpush3.bf16.msra.mxu1 %v5573_v41  ;;  %v5356_v41 = vld [vmem:[%s5526_s26 + $0x14] sm:$0xff]  }
  0xc8   : > { %4777 = vmatprep.subr.bf16.mxu0 %v5586_v44  ;;  %4921 = vmatprep.subr.bf16.mxu1 %v5586_v44  ;;  %v2966_v3 = vshll.u32 %v5356_v41, 16 }
  0xc9   : > { %4779 = vmatprep.mubr.msk.bf16.mxu0 %vm394_vm0, %v5732_v19  ;;  %4923 = vmatprep.mubr.msk.bf16.mxu1 %vm394_vm0, %v5803_v49  ;;  %v3624_v49 = vshrl.u32 %v6253_v22, 16 }
  0xca   : > { %v2968_v13 = vrot.slane %v2966_v3, 1 }
  0xcb   : > { %4778 = vmatpush3.bf16.msra.mxu0 %v5586_v44  ;;  %4922 = vmatpush3.bf16.msra.mxu1 %v5586_v44  ;;  %v6275_v44 = vld [vmem:[%s5533_s29 + $0x14] sm:$0xff]  }
  0xcc   : > { %4787 = vmatprep.subr.bf16.mxu0 %v5604_v51  ;;  %4931 = vmatprep.subr.bf16.mxu1 %v5604_v51 }
  0xce   : > { %4780 = vmatmul.mubr.msk.bf16.vlgmr.msra.gmra.mrb[8].mxu0 %vm394_vm0, %v5753_v29  ;;  %4924 = vmatmul.mubr.msk.bf16.vlgmr.msra.gmra.mrb[8].mxu1 %vm394_vm0, %v5823_v60  ;;  %v2975_v29 = vrot.slane %v2973_v12, 1  ;;  %v3630_v60 = vshll.u32 %v6267_v34, 16 }
  0xcf   : > { %4788 = vmatpush3.bf16.msra.mxu0 %v5604_v51  ;;  %4932 = vmatpush3.bf16.msra.mxu1 %v5604_v51  ;;  %v2953_v51 = vshrl.u32 %v5352_v7, 16 }
  0xd0   : > { %4789 = vmatprep.subr.bf16.mxu0 %v5617_v56  ;;  %4933 = vmatprep.subr.bf16.mxu1 %v5617_v56 }
  0xd1   : > { %4783 = vmatprep.mubr.msk.bf16.mxu0 %vm394_vm0, %v5768_v33  ;;  %4927 = vmatprep.mubr.msk.bf16.mxu1 %vm394_vm0, %v5837_v5  ;;  %v6405_v33 = vld [vmem:[#allocation6_spill] sm:$0xff] }
  0xd3   : > { %4790 = vmatpush3.bf16.msra.mxu0 %v5617_v56  ;;  %4934 = vmatpush3.bf16.msra.mxu1 %v5617_v56  ;;  %v2957_v56 = vrot.slane %v2955_v35, 1 }
  0xd4   : > { %4791 = vmatprep.subr.bf16.mxu0 %v5631_v59  ;;  %4935 = vmatprep.subr.bf16.mxu1 %v5631_v59 }
  0xd6   : > { %4784 = vmatmul.mubr.msk.bf16.gmra.mrb[12].mxu0 %vm394_vm0, %v5785_v42  ;;  %4928 = vmatmul.mubr.msk.bf16.gmra.mrb[12].mxu1 %vm394_vm0, %v5853_v14  ;;  %v2977_v42 = vshrl.u32 %v5358_v62, 16  ;;  %v3632_v14 = vrot.slane %v3630_v60, 1 }
  0xd7   : > { %4792 = vmatpush3.bf16.msra.mxu0 %v5631_v59  ;;  %4936 = vmatpush3.bf16.msra.mxu1 %v5631_v59  ;;  %v2959_v59 = vshll.u32 %v5354_v31, 16 }
  0xd8   : > { %4793 = vmatprep.subr.bf16.mxu0 %v5643_v61  ;;  %4937 = vmatprep.subr.bf16.mxu1 %v5643_v61  ;;  %v2979_v5 = vor.u32 %v2977_v42, %v2975_v29 }
  0xd9   : > { %4795 = vmatprep.mubr.msk.bf16.mxu0 %vm394_vm0, %v5864_v17  ;;  %4939 = vmatprep.mubr.msk.bf16.mxu1 %vm394_vm0, %v5869_v18  ;;  %v2961_v2 = vrot.slane %v2959_v59, 1  ;;  %v6407_v17 = vld [vmem:[#allocation8_spill] sm:$0xff] }
  0xdb   : > { %4794 = vmatpush3.bf16.msra.mxu0 %v5643_v61  ;;  %4938 = vmatpush3.bf16.msra.mxu1 %v5643_v61  ;;  %v6402_v61 = vld [vmem:[#allocation3_spill] sm:$0xff]  ;;  %v2965_v19 = vor.u32 %v2963_v6, %v2961_v2 }
  0xdc   : > { %4803 = vmatprep.subr.bf16.mxu0 %v5661_v0  ;;  %4947 = vmatprep.subr.bf16.mxu1 %v5661_v0 }
  0xde   : > { %4796 = vmatmul.mubr.msk.bf16.vlgmr.msra.gmra.mrb[8].mxu0 %vm394_vm0, %v5887_v21  ;;  %4940 = vmatmul.mubr.msk.bf16.vlgmr.msra.gmra.mrb[8].mxu1 %vm394_vm0, %v5891_v23  ;;  %v3641_v21 = vshrl.u32 %v6275_v44, 16 }
  0xdf   : > { %4804 = vmatpush3.bf16.msra.mxu0 %v5661_v0  ;;  %4948 = vmatpush3.bf16.msra.mxu1 %v5661_v0  ;;  %v2958_v0 = vor.u32 %v2957_v56, %v2953_v51 }
  0xe0   : > { %4805 = vmatprep.subr.bf16.mxu0 %v5679_v4  ;;  %4949 = vmatprep.subr.bf16.mxu1 %v5679_v4 }
  0xe1   : > { %4799 = vmatprep.mubr.msk.bf16.mxu0 %vm394_vm0, %v5903_v27  ;;  %4943 = vmatprep.mubr.msk.bf16.mxu1 %vm394_vm0, %v5908_v28  ;;  %v2962_v8 = vsel %vm597_vm1, %v2958_v0, %v2961_v2 }
  0xe3   : > { %4806 = vmatpush3.bf16.msra.mxu0 %v5679_v4  ;;  %4950 = vmatpush3.bf16.msra.mxu1 %v5679_v4  ;;  %v6403_v4 = vld [vmem:[#allocation4_spill] sm:$0xff] }
  0xe4   : > { %4807 = vmatprep.subr.bf16.mxu0 %v5702_v11  ;;  %4951 = vmatprep.subr.bf16.mxu1 %v5702_v11 }
  0xe6   : > { %4800 = vmatmul.mubr.msk.bf16.gmra.mrb[12].mxu0 %vm394_vm0, %v5928_v43  ;;  %4944 = vmatmul.mubr.msk.bf16.gmra.mrb[12].mxu1 %vm394_vm0, %v5932_v45 }
  0xe7   : > { %4808 = vmatpush3.bf16.msra.mxu0 %v5702_v11  ;;  %4952 = vmatpush3.bf16.msra.mxu1 %v5702_v11  ;;  %v2970_v11 = vshrl.u32 %v5356_v41, 16 }
  0xe8   : > { %4809 = vmatprep.subr.bf16.mxu0 %v5721_v16  ;;  %4953 = vmatprep.subr.bf16.mxu1 %v5721_v16 }
  0xe9   : > { %4811 = vmatprep.mubr.msk.bf16.mxu0 %vm394_vm0, %v5869_v18  ;;  %4955 = vmatprep.mubr.msk.bf16.mxu1 %vm394_vm0, %v5950_v55  ;;  %v3634_v18 = vshrl.u32 %v6267_v34, 16 }
  0xeb   : > { %4810 = vmatpush3.bf16.msra.mxu0 %v5721_v16  ;;  %4954 = vmatpush3.bf16.msra.mxu1 %v5721_v16  ;;  %v6404_v16 = vld [vmem:[#allocation5_spill] sm:$0xff]  ;;  %v3636_v43 = vor.u32 %v3634_v18, %v3632_v14 }
  0xec   : > { %4819 = vmatprep.subr.bf16.mxu0 %v5741_v24  ;;  %4963 = vmatprep.subr.bf16.mxu1 %v5741_v24 }
  0xee   : > { %4812 = vmatmul.mubr.msk.bf16.vlgmr.msra.gmra.mrb[8].mxu0 %vm394_vm0, %v5891_v23  ;;  %4956 = vmatmul.mubr.msk.bf16.vlgmr.msra.gmra.mrb[8].mxu1 %vm394_vm0, %v5971_v48  ;;  %v3644_v23 = vshll.u32 %v6289_v63, 16 }
  0xef   : > { %4820 = vmatpush3.bf16.msra.mxu0 %v5741_v24  ;;  %4964 = vmatpush3.bf16.msra.mxu1 %v5741_v24  ;;  %v2972_v24 = vor.u32 %v2970_v11, %v2968_v13 }
  0xf0   : > { %4821 = vmatprep.subr.bf16.mxu0 %v5758_v30  ;;  %4965 = vmatprep.subr.bf16.mxu1 %v5758_v30 }
  0xf1   : > { %4815 = vmatprep.mubr.msk.bf16.mxu0 %vm394_vm0, %v5908_v28  ;;  %4959 = vmatprep.mubr.msk.bf16.mxu1 %vm394_vm0, %v5986_v57 }
  0xf3   : > { %4822 = vmatpush3.bf16.msra.mxu0 %v5758_v30  ;;  %4966 = vmatpush3.bf16.msra.mxu1 %v5758_v30  ;;  %v3626_v30 = vshll.u32 %v6253_v22, 16 }
  0xf4   : > { %4823 = vmatprep.subr.bf16.mxu0 %v5777_v40  ;;  %4967 = vmatprep.subr.bf16.mxu1 %v5777_v40 }
  0xf6   : > { %4816 = vmatmul.mubr.msk.bf16.gmra.mrb[12].mxu0 %vm394_vm0, %v5932_v45  ;;  %4960 = vmatmul.mubr.msk.bf16.gmra.mrb[12].mxu1 %vm394_vm0, %v6003_v36 }
  0xf7   : > { %4824 = vmatpush3.bf16.msra.mxu0 %v5777_v40  ;;  %4968 = vmatpush3.bf16.msra.mxu1 %v5777_v40  ;;  %v2969_v40 = vsel %vm597_vm1, %v2965_v19, %v2968_v13 }
  0xf8   : > { %4825 = vmatprep.subr.bf16.mxu0 %v5792_v46  ;;  %4969 = vmatprep.subr.bf16.mxu1 %v5792_v46 }
  0xf9   : > { %4827 = vmatprep.mubr.msk.bf16.mxu0 %vm394_vm0, %v5950_v55  ;;  %4971 = vmatprep.mubr.msk.bf16.mxu1 %vm394_vm0, %v6021_v38 }
  0xfb   : > { %4826 = vmatpush3.bf16.msra.mxu0 %v5792_v46  ;;  %4970 = vmatpush3.bf16.msra.mxu1 %v5792_v46  ;;  %v2976_v46 = vsel %vm597_vm1, %v2972_v24, %v2975_v29 }
  0xfc   : > { %4835 = vmatprep.subr.bf16.mxu0 %v5812_v54  ;;  %4979 = vmatprep.subr.bf16.mxu1 %v5812_v54 }
  0xfe   : > { %4828 = vmatmul.mubr.msk.bf16.vlgmr.msra.gmra.mrb[8].mxu0 %vm394_vm0, %v5971_v48  ;;  %4972 = vmatmul.mubr.msk.bf16.vlgmr.msra.gmra.mrb[8].mxu1 %vm394_vm0, %v6035_v50  ;;  %v3646_v50 = vrot.slane %v3644_v23, 1 }
  0xff   : > { %4836 = vmatpush3.bf16.msra.mxu0 %v5812_v54  ;;  %4980 = vmatpush3.bf16.msra.mxu1 %v5812_v54  ;;  %v3628_v54 = vrot.slane %v3626_v30, 1 }
 0x100   : > { %4837 = vmatprep.subr.bf16.mxu0 %v5828_v1  ;;  %4981 = vmatprep.subr.bf16.mxu1 %v5828_v1 }
 0x101   : > { %4831 = vmatprep.mubr.msk.bf16.mxu0 %vm394_vm0, %v5986_v57  ;;  %4975 = vmatprep.mubr.msk.bf16.mxu1 %vm394_vm0, %v6045_v26  ;;  %v3648_v57 = vshrl.u32 %v6289_v63, 16 }
 0x103   : > { %4838 = vmatpush3.bf16.msra.mxu0 %v5828_v1  ;;  %4982 = vmatpush3.bf16.msra.mxu1 %v5828_v1  ;;  %v6406_v1 = vld [vmem:[#allocation7_spill] sm:$0xff] }
 0x104   : > { %4839 = vmatprep.subr.bf16.mxu0 %v5845_v10  ;;  %4983 = vmatprep.subr.bf16.mxu1 %v5845_v10 }
 0x106   : > { %4832 = vmatmul.mubr.msk.bf16.gmra.mrb[12].mxu0 %vm394_vm0, %v6003_v36  ;;  %4976 = vmatmul.mubr.msk.bf16.gmra.mrb[12].mxu1 %vm394_vm0, %v6055_v58  ;;  %v3650_v36 = vor.u32 %v3648_v57, %v3646_v50 }
 0x107   : > { %4840 = vmatpush3.bf16.msra.mxu0 %v5845_v10  ;;  %4984 = vmatpush3.bf16.msra.mxu1 %v5845_v10  ;;  %v3629_v10 = vor.u32 %v3628_v54, %v3624_v49 }
 0x108   : > { %4841 = vmatprep.subr.bf16.mxu0 %v5860_v15  ;;  %4985 = vmatprep.subr.bf16.mxu1 %v5860_v15 }
 0x109   : > { %4843 = vmatprep.mubr.msk.bf16.mxu0 %vm394_vm0, %v5352_v7  ;;  %4987 = vmatprep.mubr.msk.bf16.mxu1 %vm394_vm0, %v6253_v22  ;;  %v3633_v27 = vsel %vm597_vm1, %v3629_v10, %v3632_v14 }
 0x10b   : > { %4842 = vmatpush3.bf16.msra.mxu0 %v5860_v15  ;;  %4986 = vmatpush3.bf16.msra.mxu1 %v5860_v15  ;;  %v3637_v15 = vshll.u32 %v6275_v44, 16 }
 0x10c   : > { %4851 = vmatprep.subr.bf16.mxu0 %v6401_v37  ;;  %4995 = vmatprep.subr.bf16.mxu1 %v6401_v37 }
 0x10d   : > { %v3639_v28 = vrot.slane %v3637_v15, 1 }
 0x10e   : > { %4844 = vmatmul.mubr.msk.bf16.vlgmr.msra.gmra.mrb[8].mxu0 %vm394_vm0, %v5354_v31  ;;  %4988 = vmatmul.mubr.msk.bf16.vlgmr.msra.gmra.mrb[8].mxu1 %vm394_vm0, %v6267_v34 }
 0x10f   : > { %4852 = vmatpush3.bf16.msra.mxu0 %v6401_v37  ;;  %4996 = vmatpush3.bf16.msra.mxu1 %v6401_v37  ;;  %v3643_v45 = vor.u32 %v3641_v21, %v3639_v28  ;;  %v3640_v55 = vsel %vm597_vm1, %v3636_v43, %v3639_v28 }
 0x110   : > { %4853 = vmatprep.subr.bf16.mxu0 %v6402_v61  ;;  %4997 = vmatprep.subr.bf16.mxu1 %v6402_v61 }
 0x111   : > { %4847 = vmatprep.mubr.msk.bf16.mxu0 %vm394_vm0, %v5356_v41  ;;  %4991 = vmatprep.mubr.msk.bf16.mxu1 %vm394_vm0, %v6275_v44  ;;  %v3647_v48 = vsel %vm597_vm1, %v3643_v45, %v3646_v50 }
 0x113   : > { %4854 = vmatpush3.bf16.msra.mxu0 %v6402_v61  ;;  %4998 = vmatpush3.bf16.msra.mxu1 %v6402_v61 }
 0x114   : > { %4855 = vmatprep.subr.bf16.mxu0 %v6403_v4  ;;  %4999 = vmatprep.subr.bf16.mxu1 %v6403_v4 }
 0x116   : > { %4848 = vmatmul.mubr.msk.bf16.gmra.mrb[12].mxu0 %vm394_vm0, %v5358_v62  ;;  %4992 = vmatmul.mubr.msk.bf16.gmra.mrb[12].mxu1 %vm394_vm0, %v6289_v63  ;;  %v5372_v62 = vmov 0  }
 0x117   : > { %4856 = vmatpush3.bf16.msra.mxu0 %v6403_v4  ;;  %5000 = vmatpush3.bf16.msra.mxu1 %v6403_v4  ;;  %3809 = vst [vmem:[%s6357_s17 + $0x1c] sm:$0xf] %v5372_v62  ;;  %v4129_v4 = vld [vmem:[%s6378_s5] ss:$0 sm:$0xff] }
 0x118   : > { %4857 = vmatprep.subr.bf16.mxu0 %v6404_v16  ;;  %5001 = vmatprep.subr.bf16.mxu1 %v6404_v16 }
 0x119   : > { %4859 = vmatprep.mubr.msk.bf16.mxu0 %vm394_vm0, %v6253_v22  ;;  %5003 = vmatprep.mubr.msk.bf16.mxu1 %vm394_vm0, %v2962_v8 }
 0x11b   : > { %4858 = vmatpush3.bf16.msra.mxu0 %v6404_v16  ;;  %5002 = vmatpush3.bf16.msra.mxu1 %v6404_v16 }
 0x11c   : > { %4867 = vmatprep.subr.bf16.mxu0 %v6405_v33  ;;  %5011 = vmatprep.subr.bf16.mxu1 %v6405_v33 }
 0x11e   : > { %4860 = vmatmul.mubr.msk.bf16.vlgmr.msra.gmra.mrb[8].mxu0 %vm394_vm0, %v6267_v34  ;;  %5004 = vmatmul.mubr.msk.bf16.vlgmr.msra.gmra.mrb[8].mxu1 %vm394_vm0, %v2969_v40 }
 0x11f   : > { %4868 = vmatpush3.bf16.msra.mxu0 %v6405_v33  ;;  %5012 = vmatpush3.bf16.msra.mxu1 %v6405_v33 }
 0x120   : > { %4869 = vmatprep.subr.bf16.mxu0 %v6406_v1  ;;  %5013 = vmatprep.subr.bf16.mxu1 %v6406_v1 }
 0x121   : > { %4863 = vmatprep.mubr.msk.bf16.mxu0 %vm394_vm0, %v6275_v44  ;;  %5007 = vmatprep.mubr.msk.bf16.mxu1 %vm394_vm0, %v2976_v46 }
 0x123   : > { %4870 = vmatpush3.bf16.msra.mxu0 %v6406_v1  ;;  %5014 = vmatpush3.bf16.msra.mxu1 %v6406_v1 }
 0x124   : > { %4871 = vmatprep.subr.bf16.mxu0 %v6407_v17  ;;  %5015 = vmatprep.subr.bf16.mxu1 %v6407_v17 }
 0x126   : > { %4864 = vmatmul.mubr.msk.bf16.gmra.mrb[12].mxu0 %vm394_vm0, %v6289_v63  ;;  %5008 = vmatmul.mubr.msk.bf16.gmra.mrb[12].mxu1 %vm394_vm0, %v2979_v5 }
 0x127   : > { %4872 = vmatpush3.bf16.msra.mxu0 %v6407_v17  ;;  %5016 = vmatpush3.bf16.msra.mxu1 %v6407_v17 }
 0x128   : > { %4873 = vmatprep.subr.bf16.mxu0 %v6010_v39  ;;  %5017 = vmatprep.subr.bf16.mxu1 %v6010_v39 }
 0x129   : > { %4875 = vmatprep.mubr.msk.bf16.mxu0 %vm394_vm0, %v2962_v8  ;;  %5019 = vmatprep.mubr.msk.bf16.mxu1 %vm394_vm0, %v3633_v27 }
 0x12b   : > { %4874 = vmatpush3.bf16.msra.mxu0 %v6010_v39  ;;  %5018 = vmatpush3.bf16.msra.mxu1 %v6010_v39 }
 0x12e   : > { %4876 = vmatmul.mubr.msk.bf16.vlgmr.msra.gmra.mrb[8].mxu0 %vm394_vm0, %v2969_v40  ;;  %5020 = vmatmul.mubr.msk.bf16.vlgmr.msra.gmra.mrb[8].mxu1 %vm394_vm0, %v3640_v55 }
 0x12f   : > { %4879 = vmatprep.mubr.msk.bf16.mxu0 %vm394_vm0, %v2976_v46  ;;  %5023 = vmatprep.mubr.msk.bf16.mxu1 %vm394_vm0, %v3647_v48 }
 0x136   : > { %4880 = vmatmul.mubr.msk.bf16.gmra.mrb[12].mxu0 %vm394_vm0, %v2979_v5  ;;  %5024 = vmatmul.mubr.msk.bf16.gmra.mrb[12].mxu1 %vm394_vm0, %v3650_v36 }
 0x171   : > { %v4589_v39 = vpop.f32.mrb[0].mxu0  ;;  %v4733_v38 = vpop.f32.mrb[0].mxu1 }
 0x172   : > { %v1539_v32 = vpop.f32.mrb[1].mxu0  ;;  %v2320_v47 = vmax.f32 %v4589_v39, %v4733_v38  ;;  %v2281_v20 = vpop.f32.mrb[1].mxu1 }
 0x173   : > { %v4590_v26 = vpop.f32.mrb[2].mxu0  ;;  %v2318_v25 = vmax.f32 %v1539_v32, %v2281_v20  ;;  %v4734_v53 = vpop.f32.mrb[2].mxu1  ;;  %v3800_v20 = vld [vmem:[%s6357_s17 + $0x18] sm:$0xf] }
 0x174   : > { %v1542_v58 = vpop.f32.mrb[3].mxu0  ;;  %v2321_v9 = vmax.f32 %v4590_v26, %v4734_v53  ;;  %v2284_v52 = vpop.f32.mrb[3].mxu1 }
 0x175   : > { %v2319_v7 = vmax.f32 %v1542_v58, %v2284_v52 }
 0x179   : > { %v4593_v22 = vpop.f32.mrb[4].mxu0  ;;  %v4737_v31 = vpop.f32.mrb[4].mxu1 }
 0x17a   : > { %v1555_v34 = vpop.f32.mrb[5].mxu0  ;;  %v2324_v35 = vmax.f32 %v4593_v22, %v4737_v31  ;;  %v2297_v37 = vpop.f32.mrb[5].mxu1 }
 0x17b   : > { %v4594_v41 = vpop.f32.mrb[6].mxu0  ;;  %v2322_v44 = vmax.f32 %v1555_v34, %v2297_v37  ;;  %v4738_v51 = vpop.f32.mrb[6].mxu1 }
 0x17c   : > { %v1558_v56 = vpop.f32.mrb[7].mxu0  ;;  %v2300_v59 = vpop.f32.mrb[7].mxu1 }
 0x17d   : > { %v2323_v61 = vmax.f32 %v1558_v56, %v2300_v59 }
 0x201   : > { %v4877_v63 = vpop.f32.mrb[8].mxu0  ;;  %v5021_v2 = vpop.f32.mrb[8].mxu1 }
 0x202   : > { %v3065_v0 = vmax.f32 %v2320_v47, %v4877_v63  ;;  %v3026_v3 = vpop.f32.mrb[9].mxu0  ;;  %v3697_v8 = vpop.f32.mrb[9].mxu1 }
 0x203   : > { %v3063_v6 = vmax.f32 %v2318_v25, %v3026_v3  ;;  %v4878_v11 = vpop.f32.mrb[10].mxu0  ;;  %v5022_v16 = vpop.f32.mrb[10].mxu1 }
 0x204   : > { %v3736_v12 = vmax.f32 %v3065_v0, %v5021_v2  ;;  %v3066_v13 = vmax.f32 %v2321_v9, %v4878_v11  ;;  %v3029_v19 = vpop.f32.mrb[11].mxu0  ;;  %v3700_v30 = vpop.f32.mrb[11].mxu1 }
 0x205   : > { %v3734_v24 = vmax.f32 %v3063_v6, %v3697_v8  ;;  %v3064_v29 = vmax.f32 %v2319_v7, %v3029_v19 }
 0x206   : > { %v3750_v33 = vadd.f32 %v4129_v4, %v3736_v12  ;;  %v3737_v40 = vmax.f32 %v3066_v13, %v5022_v16 }
 0x207   : > { %v3748_v42 = vadd.f32 %v4129_v4, %v3734_v24  ;;  %v3735_v46 = vmax.f32 %v3064_v29, %v3700_v30 }
 0x208   : > { %v3751_v49 = vadd.f32 %v4129_v4, %v3737_v40  ;;  %v3757_v1 = vmax.f32 %v3750_v33, 0.0 }
 0x209   : > { %v3749_v54 = vadd.f32 %v4129_v4, %v3735_v46  ;;  %v4881_v60 = vpop.f32.mrb[12].mxu0  ;;  %v5025_v14 = vpop.f32.mrb[12].mxu1  ;;  %v3755_v17 = vmax.f32 %v3748_v42, 0.0 }
 0x20a   : > { %v3758_v5 = vmax.f32 %v3751_v49, 0.0  ;;  %v3069_v10 = vmax.f32 %v2324_v35, %v4881_v60  ;;  %v3042_v15 = vpop.f32.mrb[13].mxu0  ;;  %v3713_v23 = vpop.f32.mrb[13].mxu1 }
 0x20b   : > { %v3756_v18 = vmax.f32 %v3749_v54, 0.0  ;;  %v3067_v21 = vmax.f32 %v2322_v44, %v3042_v15  ;;  %v4882_v27 = vpop.f32.mrb[14].mxu0  ;;  %v5026_v45 = vpop.f32.mrb[14].mxu1 }
 0x20c   : > { %v4154_v28 = vpack.c.bf16 %v3758_v5, %v3757_v1  ;;  %v3740_v43 = vmax.f32 %v3069_v10, %v5025_v14  ;;  %v3045_v50 = vpop.f32.mrb[15].mxu0  ;;  %v3716_v36 = vpop.f32.mrb[15].mxu1 }
 0x20d   : > { %v4149_v55 = vpack.c.bf16 %v3756_v18, %v3755_v17  ;;  %v3738_v48 = vmax.f32 %v3067_v21, %v3713_v23  ;;  %v3068_v57 = vmax.f32 %v2323_v61, %v3045_v50 }
 0x20e   : > { %4161 = vst [vmem:[%s6357_s17 + $0x8] sm:$0xff] %v4154_v28   ;;  %v3754_v39 = vadd.f32 %v4129_v4, %v3740_v43 }
 0x20f   : > { %4150 = vst [vmem:[%s6357_s17] sm:$0xff] %v4149_v55   ;;  %v3752_v38 = vadd.f32 %v4129_v4, %v3738_v48  ;;  %v3739_v32 = vmax.f32 %v3068_v57, %v3716_v36 }
 0x210   : > { %v3761_v47 = vmax.f32 %v3754_v39, 0.0 }
 0x211   : > { %v3753_v26 = vadd.f32 %v4129_v4, %v3739_v32  ;;  %v3759_v53 = vmax.f32 %v3752_v38, 0.0 }
 0x212   : > { %v4145_v25 = vpack.c.bf16 %v3761_v47, %v3761_v47 }
 0x213   : > { %v3760_v58 = vmax.f32 %v3753_v26, 0.0 }
 0x214   : > { %v3801_v9 = vsel %vm3799_vm4, %v4145_v25, %v3800_v20 }
 0x215   : > { %3802 = vst [vmem:[%s6357_s17 + $0x18] sm:$0xf] %v3801_v9  ;;  %v4159_v52 = vpack.c.bf16 %v3760_v58, %v3759_v53 }
 0x217   : > { %4162 = vst [vmem:[%s6357_s17 + $0x10] sm:$0xff] %v4159_v52  }
 0x21c   : > { %v3806_v7 = vld [vmem:[%s6357_s17 + $0x18] sm:$0x8] }
 0x21d   : > { %v3807_v22 = vsel %vm3805_vm7, 0, %v3806_v7 }
 0x21e   : > { %3808 = vst [vmem:[%s6357_s17 + $0x18] sm:$0x8] %v3807_v22 }
 0x21f PF: > { %s16_s21 = sadd.s32 1, %s5370_s21  }
 0x220   : > { %p13_p4 = scmp.ge.s32.totalorder %s16_s21, 4  }
 0x222   :  { %15 = sbr.rel (!%p13_p4) target bundleno = 1 (0x1), region = 83 }

// kernel: forward.6
= control target key start
LH: loop header
LB: loop body
LE: loop exit
PB: predicated region body
PF: predicated region fallthrough
CT: control target
= control target key end

     0   :  { %s3761_s21 = smov 0   ;;  %s5144_s0 = inlined_call_operand.vmem [shape: bf16[32,128], index: 0, kind: input, shape index: {}]   ;;  %s5145_s1 = inlined_call_operand.vmem [shape: bf16[32,128], index: 1, kind: input, shape index: {}]   ;;  %s5146_s2 = inlined_call_operand.vmem [shape: bf16[32,128], index: 2, kind: input, shape index: {}]   ;;  %s5147_s3 = inlined_call_operand.vmem [shape: bf16[32,128], index: 3, kind: input, shape index: {}]   ;;  %s5148_s4 = inlined_call_operand.vmem [shape: bf16[1152,256], index: 4, kind: input, shape index: {}]   ;;  %s5149_s5 = inlined_call_operand.vmem [shape: f32[1,256], index: 5, kind: input, shape index: {}]   ;;  %s5150_s6 = inlined_call_operand.vmem [shape: bf16[32,256], index: 6, kind: output, shape index: {}]  }
   0x1 LB: > { %s3143_s22 = sadd.s32 4294967295, %s3723_s21   ;;  %p3147_p0 = scmp.ge.s32.totalorder %s3723_s21, 1  ;;  %s3723_s21 = sphi %s3761_s21, %s16_s21  }
   0x2   : > { %p246_p1 = scmp.lt.s32.totalorder %s3723_s21, 3 }
   0x4   : > { %p247_p2 = pnand %p3147_p0, %p246_p1 }
   0x6   : > { %250 = sbr.rel (%p247_p2) target bundleno = 827 (0x33b), region = 44 }
   0xd   : > { %v3455_v0 = vld [vmem:[%s5148_s4 + $0x84] ss:$8 sps:$4 sm:$0xff]   ;;  %s3148_s25 = sshll.u32 %s3143_s22, 1  ;;  %v3457_v1 = vld [vmem:[%s5148_s4 + $0x80] ss:$8 sps:$4 sm:$0xff]   ;;  %v5151_v2 = vmov 0  }
   0xe   : > { %478 = vmatprep.mubr.bf16.mxu0 %v5151_v2  ;;  %1710 = vmatprep.mubr.bf16.mxu1 %v5151_v2  ;;  %p293_p3 = scmp.lt.s32.totalorder %s3148_s25, 3  ;;  %v3458_v3 = vld [vmem:[%s5148_s4 + $0x94] ss:$8 sps:$4 sm:$0xff]   ;;  %v3460_v4 = vld [vmem:[%s5148_s4 + $0x90] ss:$8 sps:$4 sm:$0xff]   ;;  %vm3029_vm0 = vcmask 1041408  }
   0xf   : > { %446 = vmatprep.subr.bf16.mxu0 %v3455_v0  ;;  %1678 = vmatprep.subr.bf16.mxu1 %v3455_v0  ;;  %v3461_v5 = vld [vmem:[%s5148_s4 + $0xa4] ss:$8 sps:$4 sm:$0xff]   ;;  %v3463_v6 = vld [vmem:[%s5148_s4 + $0xa0] ss:$8 sps:$4 sm:$0xff]   ;;  %v3464_v7 = vld [vmem:[%s5148_s4 + $0xb4] ss:$8 sps:$4 sm:$0xff]  }
  0x10   : > { %447 = vmatpush1.bf16.msra.mxu0 %v3457_v1  ;;  %1679 = vmatpush1.bf16.msra.mxu1 %v3457_v1  ;;  %s5377_s25 = smov (!%p293_p3, %s3148_s25), 3  ;;  %v3466_v8 = vld [vmem:[%s5148_s4 + $0xb0] ss:$8 sps:$4 sm:$0xff]   ;;  %v3467_v9 = vld [vmem:[%s5148_s4 + $0xc4] ss:$8 sps:$4 sm:$0xff]   ;;  %vm3032_vm2 = vcmask 1045508  }
  0x11   : > { %448 = vmatprep.subr.bf16.mxu0 %v3458_v3  ;;  %1680 = vmatprep.subr.bf16.mxu1 %v3458_v3  ;;  %s3795_s14 = sshll.u32 %s5377_s25, 2  ;;  %v3469_v10 = vld [vmem:[%s5148_s4 + $0xc0] ss:$8 sps:$4 sm:$0xff]   ;;  %v3470_v11 = vld [vmem:[%s5148_s4 + $0xd4] ss:$8 sps:$4 sm:$0xff]   ;;  %s3315_s15 = sshll.u32 %s5377_s25, 3 }
  0x12   : > { %s3801_s17 = scalar_lea.vmem %s5145_s1, %s3795_s14  ;;  %s3813_s26 = scalar_lea.vmem %s5144_s0, %s3795_s14  ;;  %v3472_v13 = vld [vmem:[%s5148_s4 + $0xd0] ss:$8 sps:$4 sm:$0xff]   ;;  %v3473_v14 = vld [vmem:[%s5148_s4 + $0xe4] ss:$8 sps:$4 sm:$0xff]   ;;  %v3475_v16 = vld [vmem:[%s5148_s4 + $0xe0] ss:$8 sps:$4 sm:$0xff]  }
  0x13   : > { %v3822_v12 = vld [vmem:[%s3813_s26] sm:$0x3f]   ;;  %v3476_v17 = vld [vmem:[%s5148_s4 + $0xf4] ss:$8 sps:$4 sm:$0xff]   ;;  %v3478_v20 = vld [vmem:[%s5148_s4 + $0xf0] ss:$8 sps:$4 sm:$0xff]   ;;  %s3881_s20 = scalar_lea.vmem %s5146_s2, %s3795_s14  ;;  %s3887_s24 = scalar_lea.vmem %s5147_s3, %s3795_s14 }
  0x14   : > { %449 = vmatpush1.bf16.msra.mxu0 %v3460_v4  ;;  %1681 = vmatpush1.bf16.msra.mxu1 %v3460_v4  ;;  %v637_v15 = vshll.u32 %v3822_v12, 16  ;;  %v635_v18 = vshrl.u32 %v3822_v12, 16  ;;  %v3479_v21 = vld [vmem:[%s5148_s4 + $0x4] ss:$8 sps:$4 sm:$0xff]   ;;  %v3482_v24 = vld [vmem:[%s5148_s4] ss:$8 sps:$4 sm:$0xff]  }
  0x15   : > { %450 = vmatprep.subr.bf16.mxu0 %v3461_v5  ;;  %1682 = vmatprep.subr.bf16.mxu1 %v3461_v5  ;;  %v3845_v22 = vld [vmem:[%s3801_s17] sm:$0x3f]   ;;  %v3484_v25 = vld [vmem:[%s5148_s4 + $0x14] ss:$8 sps:$4 sm:$0xff]   ;;  %v3486_v26 = vld [vmem:[%s5148_s4 + $0x10] ss:$8 sps:$4 sm:$0xff]  }
  0x16   : > { %v639_v19 = vrot.slane %v637_v15, 1  ;;  %v3487_v27 = vld [vmem:[%s5148_s4 + $0x24] ss:$8 sps:$4 sm:$0xff]   ;;  %v3489_v28 = vld [vmem:[%s5148_s4 + $0x20] ss:$8 sps:$4 sm:$0xff]   ;;  %v1767_v52 = vshll.u32 %v3845_v22, 16 }
  0x17   : > { %v3490_v29 = vld [vmem:[%s5148_s4 + $0x34] ss:$8 sps:$4 sm:$0xff]   ;;  %v3492_v30 = vld [vmem:[%s5148_s4 + $0x30] ss:$8 sps:$4 sm:$0xff]   ;;  %v3493_v31 = vld [vmem:[%s5148_s4 + $0x44] ss:$8 sps:$4 sm:$0xff]  }
  0x18   : > { %451 = vmatpush1.bf16.msra.mxu0 %v3463_v6  ;;  %1683 = vmatpush1.bf16.msra.mxu1 %v3463_v6  ;;  %v3847_v23 = vor.u32 %v639_v19, %v635_v18  ;;  %v3495_v32 = vld [vmem:[%s5148_s4 + $0x40] ss:$8 sps:$4 sm:$0xff]   ;;  %v3496_v33 = vld [vmem:[%s5148_s4 + $0x54] ss:$8 sps:$4 sm:$0xff]   ;;  %v3498_v34 = vld [vmem:[%s5148_s4 + $0x50] ss:$8 sps:$4 sm:$0xff]  }
  0x19   : > { %452 = vmatprep.subr.bf16.mxu0 %v3464_v7  ;;  %1684 = vmatprep.subr.bf16.mxu1 %v3464_v7  ;;  %v3499_v35 = vld [vmem:[%s5148_s4 + $0x64] ss:$8 sps:$4 sm:$0xff]   ;;  %v3501_v36 = vld [vmem:[%s5148_s4 + $0x60] ss:$8 sps:$4 sm:$0xff]   ;;  %v3502_v37 = vld [vmem:[%s5148_s4 + $0x74] ss:$8 sps:$4 sm:$0xff]  }
  0x1a   : > { %v3504_v38 = vld [vmem:[%s5148_s4 + $0x70] ss:$8 sps:$4 sm:$0xff]   ;;  %v3505_v39 = vld [vmem:[%s5148_s4 + $0x104] ss:$8 sps:$4 sm:$0xff]   ;;  %v3507_v40 = vld [vmem:[%s5148_s4 + $0x100] ss:$8 sps:$4 sm:$0xff]  }
  0x1b   : > { %v3508_v41 = vld [vmem:[%s5148_s4 + $0x114] ss:$8 sps:$4 sm:$0xff]   ;;  %v3510_v42 = vld [vmem:[%s5148_s4 + $0x110] ss:$8 sps:$4 sm:$0xff]   ;;  %v3511_v43 = vld [vmem:[%s5148_s4 + $0x124] ss:$8 sps:$4 sm:$0xff]  }
  0x1c   : > { %453 = vmatpush1.bf16.msra.mxu0 %v3466_v8  ;;  %1685 = vmatpush1.bf16.msra.mxu1 %v3466_v8  ;;  %v3513_v44 = vld [vmem:[%s5148_s4 + $0x120] ss:$8 sps:$4 sm:$0xff]   ;;  %v3935_v45 = vld [vmem:[%s5148_s4 + $0x134] ss:$8 sps:$4 sm:$0xff]   ;;  %v3940_v46 = vld [vmem:[%s5148_s4 + $0x130] ss:$8 sps:$4 sm:$0xff]  }
  0x1d   : > { %454 = vmatprep.subr.bf16.mxu0 %v3467_v9  ;;  %1686 = vmatprep.subr.bf16.mxu1 %v3467_v9  ;;  %v3947_v47 = vld [vmem:[%s5148_s4 + $0x144] ss:$8 sps:$4 sm:$0xff]   ;;  %v3954_v48 = vld [vmem:[%s5148_s4 + $0x140] ss:$8 sps:$4 sm:$0xff]   ;;  %v3961_v49 = vld [vmem:[%s5148_s4 + $0x154] ss:$8 sps:$4 sm:$0xff]  }
  0x1e   : > { %v3968_v50 = vld [vmem:[%s5148_s4 + $0x150] ss:$8 sps:$4 sm:$0xff]   ;;  %v3975_v51 = vld [vmem:[%s5148_s4 + $0x164] ss:$8 sps:$4 sm:$0xff]   ;;  %v3983_v53 = vld [vmem:[%s5148_s4 + $0x160] ss:$8 sps:$4 sm:$0xff]  }
  0x1f   : > { %v3990_v54 = vld [vmem:[%s5148_s4 + $0x174] ss:$8 sps:$4 sm:$0xff]   ;;  %v1765_v55 = vshrl.u32 %v3845_v22, 16  ;;  %v1769_v56 = vrot.slane %v1767_v52, 1  ;;  %v3998_v57 = vld [vmem:[%s5148_s4 + $0x170] ss:$8 sps:$4 sm:$0xff]  }
  0x20   : > { %455 = vmatpush1.bf16.msra.mxu0 %v3469_v10  ;;  %1687 = vmatpush1.bf16.msra.mxu1 %v3469_v10  ;;  %v4005_v58 = vld [vmem:[%s5148_s4 + $0x184] ss:$8 sps:$4 sm:$0xff]   ;;  %v4012_v60 = vld [vmem:[%s5148_s4 + $0x180] ss:$8 sps:$4 sm:$0xff]   ;;  %v4019_v61 = vld [vmem:[%s5148_s4 + $0x194] ss:$8 sps:$4 sm:$0xff]  }
  0x21   : > { %456 = vmatprep.subr.bf16.mxu0 %v3470_v11  ;;  %1688 = vmatprep.subr.bf16.mxu1 %v3470_v11  ;;  %v1770_v59 = vor.u32 %v1769_v56, %v1765_v55  ;;  %v4027_v62 = vld [vmem:[%s5148_s4 + $0x190] ss:$8 sps:$4 sm:$0xff]   ;;  %v4034_v63 = vld [vmem:[%s5148_s4 + $0x1a4] ss:$8 sps:$4 sm:$0xff]   ;;  %v4043_v0 = vld [vmem:[%s5148_s4 + $0x1a0] ss:$8 sps:$4 sm:$0xff]  }
  0x22   : > { %v4050_v1 = vld [vmem:[%s5148_s4 + $0x1b4] ss:$8 sps:$4 sm:$0xff]   ;;  %v4057_v3 = vld [vmem:[%s5148_s4 + $0x1b0] ss:$8 sps:$4 sm:$0xff]   ;;  %v4064_v4 = vld [vmem:[%s5148_s4 + $0x1c4] ss:$8 sps:$4 sm:$0xff]  }
  0x23   : > { %v4071_v5 = vld [vmem:[%s5148_s4 + $0x1c0] ss:$8 sps:$4 sm:$0xff]   ;;  %v4078_v6 = vld [vmem:[%s5148_s4 + $0x1d4] ss:$8 sps:$4 sm:$0xff]   ;;  %v4085_v7 = vld [vmem:[%s5148_s4 + $0x1d0] ss:$8 sps:$4 sm:$0xff]  }
  0x24   : > { %457 = vmatpush1.bf16.msra.mxu0 %v3472_v13  ;;  %1689 = vmatpush1.bf16.msra.mxu1 %v3472_v13  ;;  %v4092_v8 = vld [vmem:[%s5148_s4 + $0x1e4] ss:$8 sps:$4 sm:$0xff]   ;;  %v4099_v9 = vld [vmem:[%s5148_s4 + $0x1e0] ss:$8 sps:$4 sm:$0xff]   ;;  %v4106_v10 = vld [vmem:[%s5148_s4 + $0x1f4] ss:$8 sps:$4 sm:$0xff]  }
  0x25   : > { %458 = vmatprep.subr.bf16.mxu0 %v3473_v14  ;;  %1690 = vmatprep.subr.bf16.mxu1 %v3473_v14  ;;  %v4113_v11 = vld [vmem:[%s5148_s4 + $0x1f0] ss:$8 sps:$4 sm:$0xff]   ;;  %v4123_v13 = vld [vmem:[%s3881_s20] sm:$0x3f]   ;;  %vm3030_vm1 = vsmask.f32 1280 }
  0x26   : > { %v4126_v14 = vld [vmem:[%s3887_s24] sm:$0x3f]   ;;  %v4327_v52 = vld [vmem:[%s5148_s4 + $0x2d0] ss:$8 sps:$4 sm:$0xff]   ;;  %vm3033_vm3 = vsmask.f32 5376  ;;  %vm3031_vm4 = vmand %vm3029_vm0, %vm3030_vm1 }
  0x27   : > { %v4133_v15 = vld [vmem:[%s5148_s4 + $0x200] ss:$8 sps:$4 sm:$0xff]   ;;  %v4156_v18 = vld [vmem:[%s5148_s4 + $0x224] ss:$8 sps:$4 sm:$0xff]   ;;  %5268 = vst [vmem:[#allocation7_spill] sm:$0xff] %v4327_v52  ;;  %v1916_v56 = vshll.u32 %v4126_v14, 16  ;;  %vm3034_vm5 = vmand %vm3032_vm2, %vm3033_vm3 }
  0x28   : > { %459 = vmatpush1.bf16.msra.mxu0 %v3475_v16  ;;  %1691 = vmatpush1.bf16.msra.mxu1 %v3475_v16  ;;  %v4140_v16 = vld [vmem:[%s5148_s4 + $0x214] ss:$8 sps:$4 sm:$0xff]   ;;  %v4165_v19 = vld [vmem:[%s5148_s4 + $0x220] ss:$8 sps:$4 sm:$0xff]   ;;  %v4334_v55 = vld [vmem:[%s5148_s4 + $0x2e4] ss:$8 sps:$4 sm:$0xff]  }
  0x29   : > { %460 = vmatprep.subr.bf16.mxu0 %v3476_v17  ;;  %1692 = vmatprep.subr.bf16.mxu1 %v3476_v17  ;;  %v4149_v17 = vld [vmem:[%s5148_s4 + $0x210] ss:$8 sps:$4 sm:$0xff]   ;;  %5269 = vst [vmem:[#allocation8_spill] sm:$0xff] %v4334_v55  ;;  %vm3035_vm6 = vmor %vm3034_vm5, %vm3031_vm4  ;;  %vm3039_vm7 = vcmask 1043457   ;;  %vm3040_vm8 = vsmask.f32 7942 }
  0x2a   : > { %vm3042_vm9 = vcmask 1047557   ;;  %vm3043_vm10 = vsmask.f32 7958  ;;  %vm3041_vm11 = vmand %vm3039_vm7, %vm3040_vm8 }
  0x2b   : > { %vm3044_vm12 = vmand %vm3042_vm9, %vm3043_vm10 }
  0x2c   : > { %461 = vmatpush1.bf16.msra.mxu0 %v3478_v20  ;;  %1693 = vmatpush1.bf16.msra.mxu1 %v3478_v20  ;;  %v4172_v20 = vld [vmem:[%s5148_s4 + $0x234] ss:$8 sps:$4 sm:$0xff]   ;;  %vm3045_vm13 = vmor %vm3044_vm12, %vm3041_vm11 }
  0x2d   : > { %575 = vmatprep.subr.bf16.mxu0 %v3479_v21  ;;  %1721 = vmatprep.subr.bf16.mxu1 %v3479_v21  ;;  %v4179_v21 = vld [vmem:[%s5148_s4 + $0x230] ss:$8 sps:$4 sm:$0xff]  }
  0x2f   : > { %479 = vmatmul.mubr.bf16.vlgmr.msra.gmra.mrb[0].mxu0 %v3845_v22  ;;  %1711 = vmatmul.mubr.bf16.vlgmr.msra.gmra.mrb[0].mxu1 %v3847_v23 }
  0x30   : > { %576 = vmatpush1.bf16.msra.mxu0 %v3482_v24  ;;  %1722 = vmatpush1.bf16.msra.mxu1 %v3482_v24  ;;  %v4200_v24 = vld [vmem:[%s5148_s4 + $0x254] ss:$8 sps:$4 sm:$0xff]  }
  0x31   : > { %577 = vmatprep.subr.bf16.mxu0 %v3484_v25  ;;  %1723 = vmatprep.subr.bf16.mxu1 %v3484_v25  ;;  %v4207_v25 = vld [vmem:[%s5148_s4 + $0x250] ss:$8 sps:$4 sm:$0xff]  }
  0x32   : > { %607 = vmatprep.mubr.bf16.mxu0 %v5151_v2  ;;  %1753 = vmatprep.mubr.bf16.mxu1 %v5151_v2 }
  0x34   : > { %578 = vmatpush1.bf16.msra.mxu0 %v3486_v26  ;;  %1724 = vmatpush1.bf16.msra.mxu1 %v3486_v26  ;;  %v4214_v26 = vld [vmem:[%s5148_s4 + $0x264] ss:$8 sps:$4 sm:$0xff]  }
  0x35   : > { %579 = vmatprep.subr.bf16.mxu0 %v3487_v27  ;;  %1725 = vmatprep.subr.bf16.mxu1 %v3487_v27  ;;  %v1090_v27 = vshll.u32 %v4123_v13, 16 }
  0x38   : > { %580 = vmatpush1.bf16.msra.mxu0 %v3489_v28  ;;  %1726 = vmatpush1.bf16.msra.mxu1 %v3489_v28  ;;  %v4222_v28 = vld [vmem:[%s5148_s4 + $0x260] ss:$8 sps:$4 sm:$0xff]  }
  0x39   : > { %581 = vmatprep.subr.bf16.mxu0 %v3490_v29  ;;  %1727 = vmatprep.subr.bf16.mxu1 %v3490_v29  ;;  %v4229_v29 = vld [vmem:[%s5148_s4 + $0x274] ss:$8 sps:$4 sm:$0xff]  }
  0x3c   : > { %582 = vmatpush1.bf16.msra.mxu0 %v3492_v30  ;;  %1728 = vmatpush1.bf16.msra.mxu1 %v3492_v30  ;;  %v1088_v30 = vshrl.u32 %v4123_v13, 16 }
  0x3d   : > { %583 = vmatprep.subr.bf16.mxu0 %v3493_v31  ;;  %1729 = vmatprep.subr.bf16.mxu1 %v3493_v31  ;;  %v1092_v31 = vrot.slane %v1090_v27, 1  ;;  %v4349_v27 = vld [vmem:[%s5148_s4 + $0x2f4] ss:$8 sps:$4 sm:$0xff]  }
  0x3e   : > { %5271 = vst [vmem:[#allocation10_spill] sm:$0xff] %v4349_v27 }
  0x40   : > { %584 = vmatpush1.bf16.msra.mxu0 %v3495_v32  ;;  %1730 = vmatpush1.bf16.msra.mxu1 %v3495_v32  ;;  %v4237_v32 = vld [vmem:[%s5148_s4 + $0x270] ss:$8 sps:$4 sm:$0xff]  }
  0x41   : > { %585 = vmatprep.subr.bf16.mxu0 %v3496_v33  ;;  %1731 = vmatprep.subr.bf16.mxu1 %v3496_v33  ;;  %v4244_v33 = vld [vmem:[%s5148_s4 + $0x284] ss:$8 sps:$4 sm:$0xff]  }
  0x44   : > { %586 = vmatpush1.bf16.msra.mxu0 %v3498_v34  ;;  %1732 = vmatpush1.bf16.msra.mxu1 %v3498_v34  ;;  %v4246_v34 = vor.u32 %v1092_v31, %v1088_v30  ;;  %v1914_v30 = vshrl.u32 %v4126_v14, 16  ;;  %v1918_v31 = vrot.slane %v1916_v56, 1  ;;  %v4373_v56 = vld [vmem:[%s5148_s4 + $0x300] ss:$8 sps:$4 sm:$0xff]  }
  0x45   : > { %587 = vmatprep.subr.bf16.mxu0 %v3499_v35  ;;  %1733 = vmatprep.subr.bf16.mxu1 %v3499_v35  ;;  %v4253_v35 = vld [vmem:[%s5148_s4 + $0x280] ss:$8 sps:$4 sm:$0xff]   ;;  %5274 = vst [vmem:[#allocation13_spill] sm:$0xff] %v4373_v56 }
  0x48   : > { %588 = vmatpush1.bf16.msra.mxu0 %v3501_v36  ;;  %1734 = vmatpush1.bf16.msra.mxu1 %v3501_v36  ;;  %v4260_v36 = vld [vmem:[%s5148_s4 + $0x294] ss:$8 sps:$4 sm:$0xff]  }
  0x49   : > { %589 = vmatprep.subr.bf16.mxu0 %v3502_v37  ;;  %1735 = vmatprep.subr.bf16.mxu1 %v3502_v37  ;;  %v4269_v37 = vld [vmem:[%s5148_s4 + $0x290] ss:$8 sps:$4 sm:$0xff]  }
  0x4c   : > { %590 = vmatpush1.bf16.msra.mxu0 %v3504_v38  ;;  %1736 = vmatpush1.bf16.msra.mxu1 %v3504_v38  ;;  %v4276_v38 = vld [vmem:[%s5148_s4 + $0x2a4] ss:$8 sps:$4 sm:$0xff]  }
  0x4d   : > { %722 = vmatprep.subr.bf16.mxu0 %v3505_v39  ;;  %1772 = vmatprep.subr.bf16.mxu1 %v3505_v39  ;;  %v4285_v39 = vld [vmem:[%s5148_s4 + $0x2a0] ss:$8 sps:$4 sm:$0xff]  }
  0x4f   : > { %608 = vmatmul.mubr.bf16.vlgmr.msra.gmra.mrb[0].mxu0 %v3822_v12  ;;  %1754 = vmatmul.mubr.bf16.vlgmr.msra.gmra.mrb[0].mxu1 %v3845_v22  ;;  %v4120_v12 = vld [vmem:[%s5148_s4 + $0x204] ss:$8 sps:$4 sm:$0xff]  }
  0x50   : > { %723 = vmatpush1.bf16.msra.mxu0 %v3507_v40  ;;  %1773 = vmatpush1.bf16.msra.mxu1 %v3507_v40  ;;  %v4186_v22 = vld [vmem:[%s5148_s4 + $0x244] ss:$8 sps:$4 sm:$0xff]   ;;  %v4292_v40 = vld [vmem:[%s5148_s4 + $0x2b4] ss:$8 sps:$4 sm:$0xff]  }
  0x51   : > { %724 = vmatprep.subr.bf16.mxu0 %v3508_v41  ;;  %1774 = vmatprep.subr.bf16.mxu1 %v3508_v41  ;;  %5263 = vst [vmem:[#allocation2_spill] sm:$0xff] %v4292_v40  ;;  %v4299_v41 = vld [vmem:[%s5148_s4 + $0x2b0] ss:$8 sps:$4 sm:$0xff]  }
  0x52   : > { %754 = vmatprep.mubr.bf16.mxu0 %v5151_v2  ;;  %1804 = vmatprep.mubr.bf16.mxu1 %v5151_v2  ;;  %5264 = vst [vmem:[#allocation3_spill] sm:$0xff] %v4299_v41 }
  0x54   : > { %725 = vmatpush1.bf16.msra.mxu0 %v3510_v42  ;;  %1775 = vmatpush1.bf16.msra.mxu1 %v3510_v42  ;;  %v4306_v42 = vld [vmem:[%s5148_s4 + $0x2c4] ss:$8 sps:$4 sm:$0xff]  }
  0x55   : > { %726 = vmatprep.subr.bf16.mxu0 %v3511_v43  ;;  %1776 = vmatprep.subr.bf16.mxu1 %v3511_v43  ;;  %5265 = vst [vmem:[#allocation4_spill] sm:$0xff] %v4306_v42  ;;  %v4313_v43 = vld [vmem:[%s5148_s4 + $0x2c0] ss:$8 sps:$4 sm:$0xff]  }
  0x56   : > { %5266 = vst [vmem:[#allocation5_spill] sm:$0xff] %v4313_v43 }
  0x58   : > { %727 = vmatpush1.bf16.msra.mxu0 %v3513_v44  ;;  %1777 = vmatpush1.bf16.msra.mxu1 %v3513_v44  ;;  %v4320_v44 = vld [vmem:[%s5148_s4 + $0x2d4] ss:$8 sps:$4 sm:$0xff]  }
  0x59   : > { %728 = vmatprep.subr.bf16.mxu0 %v3935_v45  ;;  %1778 = vmatprep.subr.bf16.mxu1 %v3935_v45  ;;  %5267 = vst [vmem:[#allocation6_spill] sm:$0xff] %v4320_v44 }
  0x5c   : > { %729 = vmatpush1.bf16.msra.mxu0 %v3940_v46  ;;  %1779 = vmatpush1.bf16.msra.mxu1 %v3940_v46 }
  0x5d   : > { %730 = vmatprep.subr.bf16.mxu0 %v3947_v47  ;;  %1780 = vmatprep.subr.bf16.mxu1 %v3947_v47 }
  0x60   : > { %731 = vmatpush1.bf16.msra.mxu0 %v3954_v48  ;;  %1781 = vmatpush1.bf16.msra.mxu1 %v3954_v48 }
  0x61   : > { %732 = vmatprep.subr.bf16.mxu0 %v3961_v49  ;;  %1782 = vmatprep.subr.bf16.mxu1 %v3961_v49 }
  0x64   : > { %733 = vmatpush1.bf16.msra.mxu0 %v3968_v50  ;;  %1783 = vmatpush1.bf16.msra.mxu1 %v3968_v50 }
  0x65   : > { %734 = vmatprep.subr.bf16.mxu0 %v3975_v51  ;;  %1784 = vmatprep.subr.bf16.mxu1 %v3975_v51 }
  0x68   : > { %735 = vmatpush1.bf16.msra.mxu0 %v3983_v53  ;;  %1785 = vmatpush1.bf16.msra.mxu1 %v3983_v53 }
  0x69   : > { %736 = vmatprep.subr.bf16.mxu0 %v3990_v54  ;;  %1786 = vmatprep.subr.bf16.mxu1 %v3990_v54 }
  0x6c   : > { %737 = vmatpush1.bf16.msra.mxu0 %v3998_v57  ;;  %1787 = vmatpush1.bf16.msra.mxu1 %v3998_v57 }
  0x6d   : > { %873 = vmatprep.subr.bf16.mxu0 %v4005_v58  ;;  %1819 = vmatprep.subr.bf16.mxu1 %v4005_v58 }
  0x6f   : > { %755 = vmatmul.mubr.bf16.vlgmr.msra.gmra.mrb[0].mxu0 %v3847_v23  ;;  %1805 = vmatmul.mubr.bf16.vlgmr.msra.gmra.mrb[0].mxu1 %v1770_v59  ;;  %v4193_v23 = vld [vmem:[%s5148_s4 + $0x240] ss:$8 sps:$4 sm:$0xff]  }
  0x70   : > { %874 = vmatpush1.bf16.msra.mxu0 %v4012_v60  ;;  %1820 = vmatpush1.bf16.msra.mxu1 %v4012_v60  ;;  %v4342_v59 = vld [vmem:[%s5148_s4 + $0x2e0] ss:$8 sps:$4 sm:$0xff]  }
  0x71   : > { %875 = vmatprep.subr.bf16.mxu0 %v4019_v61  ;;  %1821 = vmatprep.subr.bf16.mxu1 %v4019_v61  ;;  %5270 = vst [vmem:[#allocation9_spill] sm:$0xff] %v4342_v59 }
  0x72   : > { %905 = vmatprep.mubr.bf16.mxu0 %v5151_v2  ;;  %1851 = vmatprep.mubr.bf16.mxu1 %v5151_v2 }
  0x74   : > { %876 = vmatpush1.bf16.msra.mxu0 %v4027_v62  ;;  %1822 = vmatpush1.bf16.msra.mxu1 %v4027_v62 }
  0x75   : > { %877 = vmatprep.subr.bf16.mxu0 %v4034_v63  ;;  %1823 = vmatprep.subr.bf16.mxu1 %v4034_v63 }
  0x78   : > { %878 = vmatpush1.bf16.msra.mxu0 %v4043_v0  ;;  %1824 = vmatpush1.bf16.msra.mxu1 %v4043_v0 }
  0x79   : > { %879 = vmatprep.subr.bf16.mxu0 %v4050_v1  ;;  %1825 = vmatprep.subr.bf16.mxu1 %v4050_v1 }
  0x7c   : > { %880 = vmatpush1.bf16.msra.mxu0 %v4057_v3  ;;  %1826 = vmatpush1.bf16.msra.mxu1 %v4057_v3 }
  0x7d   : > { %881 = vmatprep.subr.bf16.mxu0 %v4064_v4  ;;  %1827 = vmatprep.subr.bf16.mxu1 %v4064_v4 }
  0x80   : > { %882 = vmatpush1.bf16.msra.mxu0 %v4071_v5  ;;  %1828 = vmatpush1.bf16.msra.mxu1 %v4071_v5 }
  0x81   : > { %883 = vmatprep.subr.bf16.mxu0 %v4078_v6  ;;  %1829 = vmatprep.subr.bf16.mxu1 %v4078_v6 }
  0x84   : > { %884 = vmatpush1.bf16.msra.mxu0 %v4085_v7  ;;  %1830 = vmatpush1.bf16.msra.mxu1 %v4085_v7 }
  0x85   : > { %885 = vmatprep.subr.bf16.mxu0 %v4092_v8  ;;  %1831 = vmatprep.subr.bf16.mxu1 %v4092_v8 }
  0x88   : > { %886 = vmatpush1.bf16.msra.mxu0 %v4099_v9  ;;  %1832 = vmatpush1.bf16.msra.mxu1 %v4099_v9 }
  0x89   : > { %887 = vmatprep.subr.bf16.mxu0 %v4106_v10  ;;  %1833 = vmatprep.subr.bf16.mxu1 %v4106_v10 }
  0x8c   : > { %888 = vmatpush1.bf16.msra.mxu0 %v4113_v11  ;;  %1834 = vmatpush1.bf16.msra.mxu1 %v4113_v11 }
  0x8d   : > { %1024 = vmatprep.subr.bf16.mxu0 %v4120_v12  ;;  %1866 = vmatprep.subr.bf16.mxu1 %v4120_v12 }
  0x8f   : > { %906 = vmatmul.mubr.bf16.vlgmr.msra.gmra.mrb[0].mxu0 %v4123_v13  ;;  %1852 = vmatmul.mubr.bf16.vlgmr.msra.gmra.mrb[0].mxu1 %v4126_v14 }
  0x90   : > { %1025 = vmatpush1.bf16.msra.mxu0 %v4133_v15  ;;  %1867 = vmatpush1.bf16.msra.mxu1 %v4133_v15 }
  0x91   : > { %1026 = vmatprep.subr.bf16.mxu0 %v4140_v16  ;;  %1868 = vmatprep.subr.bf16.mxu1 %v4140_v16 }
  0x92   : > { %1056 = vmatprep.mubr.bf16.mxu0 %v5151_v2  ;;  %1898 = vmatprep.mubr.bf16.mxu1 %v5151_v2 }
  0x94   : > { %1027 = vmatpush1.bf16.msra.mxu0 %v4149_v17  ;;  %1869 = vmatpush1.bf16.msra.mxu1 %v4149_v17 }
  0x95   : > { %1028 = vmatprep.subr.bf16.mxu0 %v4156_v18  ;;  %1870 = vmatprep.subr.bf16.mxu1 %v4156_v18 }
  0x98   : > { %1029 = vmatpush1.bf16.msra.mxu0 %v4165_v19  ;;  %1871 = vmatpush1.bf16.msra.mxu1 %v4165_v19 }
  0x99   : > { %1030 = vmatprep.subr.bf16.mxu0 %v4172_v20  ;;  %1872 = vmatprep.subr.bf16.mxu1 %v4172_v20 }
  0x9c   : > { %1031 = vmatpush1.bf16.msra.mxu0 %v4179_v21  ;;  %1873 = vmatpush1.bf16.msra.mxu1 %v4179_v21 }
  0x9d   : > { %1032 = vmatprep.subr.bf16.mxu0 %v4186_v22  ;;  %1874 = vmatprep.subr.bf16.mxu1 %v4186_v22 }
  0xa0   : > { %1033 = vmatpush1.bf16.msra.mxu0 %v4193_v23  ;;  %1875 = vmatpush1.bf16.msra.mxu1 %v4193_v23 }
  0xa1   : > { %1034 = vmatprep.subr.bf16.mxu0 %v4200_v24  ;;  %1876 = vmatprep.subr.bf16.mxu1 %v4200_v24 }
  0xa4   : > { %1035 = vmatpush1.bf16.msra.mxu0 %v4207_v25  ;;  %1877 = vmatpush1.bf16.msra.mxu1 %v4207_v25 }
  0xa5   : > { %1036 = vmatprep.subr.bf16.mxu0 %v4214_v26  ;;  %1878 = vmatprep.subr.bf16.mxu1 %v4214_v26 }
  0xa8   : > { %1037 = vmatpush1.bf16.msra.mxu0 %v4222_v28  ;;  %1879 = vmatpush1.bf16.msra.mxu1 %v4222_v28 }
  0xa9   : > { %1038 = vmatprep.subr.bf16.mxu0 %v4229_v29  ;;  %1880 = vmatprep.subr.bf16.mxu1 %v4229_v29 }
  0xac   : > { %1039 = vmatpush1.bf16.msra.mxu0 %v4237_v32  ;;  %1881 = vmatpush1.bf16.msra.mxu1 %v4237_v32 }
  0xad   : > { %1175 = vmatprep.subr.bf16.mxu0 %v4244_v33  ;;  %1921 = vmatprep.subr.bf16.mxu1 %v4244_v33 }
  0xaf   : > { %1057 = vmatmul.mubr.bf16.vlgmr.msra.gmra.mrb[0].mxu0 %v4126_v14  ;;  %1899 = vmatmul.mubr.bf16.vlgmr.msra.gmra.mrb[0].mxu1 %v4246_v34 }
  0xb0   : > { %1176 = vmatpush1.bf16.msra.mxu0 %v4253_v35  ;;  %1922 = vmatpush1.bf16.msra.mxu1 %v4253_v35 }
  0xb1   : > { %1177 = vmatprep.subr.bf16.mxu0 %v4260_v36  ;;  %1923 = vmatprep.subr.bf16.mxu1 %v4260_v36 }
  0xb2   : > { %1207 = vmatprep.mubr.bf16.mxu0 %v5151_v2  ;;  %1953 = vmatprep.mubr.bf16.mxu1 %v5151_v2  ;;  %v4357_v2 = vld [vmem:[%s5148_s4 + $0x2f0] ss:$8 sps:$4 sm:$0xff]  }
  0xb3   : > { %5272 = vst [vmem:[#allocation11_spill] sm:$0xff] %v4357_v2 }
  0xb4   : > { %1178 = vmatpush1.bf16.msra.mxu0 %v4269_v37  ;;  %1924 = vmatpush1.bf16.msra.mxu1 %v4269_v37 }
  0xb5   : > { %1179 = vmatprep.subr.bf16.mxu0 %v4276_v38  ;;  %1925 = vmatprep.subr.bf16.mxu1 %v4276_v38 }
  0xb8   : > { %1180 = vmatpush1.bf16.msra.mxu0 %v4285_v39  ;;  %1926 = vmatpush1.bf16.msra.mxu1 %v4285_v39 }
  0xb9   : > { %1181 = vmatprep.subr.bf16.mxu0 %v4292_v40  ;;  %1927 = vmatprep.subr.bf16.mxu1 %v4292_v40 }
  0xbc   : > { %1182 = vmatpush1.bf16.msra.mxu0 %v4299_v41  ;;  %1928 = vmatpush1.bf16.msra.mxu1 %v4299_v41 }
  0xbd   : > { %1183 = vmatprep.subr.bf16.mxu0 %v4306_v42  ;;  %1929 = vmatprep.subr.bf16.mxu1 %v4306_v42 }
  0xc0   : > { %1184 = vmatpush1.bf16.msra.mxu0 %v4313_v43  ;;  %1930 = vmatpush1.bf16.msra.mxu1 %v4313_v43 }
  0xc1   : > { %1185 = vmatprep.subr.bf16.mxu0 %v4320_v44  ;;  %1931 = vmatprep.subr.bf16.mxu1 %v4320_v44  ;;  %v4506_v44 = vld [vmem:[%s5148_s4 + $0x394] ss:$8 sps:$4 sm:$0xff]  }
  0xc2   : > { %5292 = vst [vmem:[#allocation30_spill] sm:$0xff] %v4506_v44 }
  0xc4   : > { %1186 = vmatpush1.bf16.msra.mxu0 %v4327_v52  ;;  %1932 = vmatpush1.bf16.msra.mxu1 %v4327_v52  ;;  %v4366_v52 = vor.u32 %v1918_v31, %v1914_v30  ;;  %v4389_v30 = vld [vmem:[%s5148_s4 + $0x310] ss:$8 sps:$4 sm:$0xff]   ;;  %v4396_v31 = vld [vmem:[%s5148_s4 + $0x324] ss:$8 sps:$4 sm:$0xff]  }
  0xc5   : > { %1187 = vmatprep.subr.bf16.mxu0 %v4334_v55  ;;  %1933 = vmatprep.subr.bf16.mxu1 %v4334_v55  ;;  %v4364_v55 = vld [vmem:[%s5148_s4 + $0x304] ss:$8 sps:$4 sm:$0xff]   ;;  %5276 = vst [vmem:[#allocation15_spill] sm:$0xff] %v4389_v30  ;;  %5277 = vst [vmem:[#allocation16_spill] sm:$0xff] %v4396_v31 }
  0xc6   : > { %5273 = vst [vmem:[#allocation12_spill] sm:$0xff] %v4364_v55 }
  0xc8   : > { %1188 = vmatpush1.bf16.msra.mxu0 %v4342_v59  ;;  %1934 = vmatpush1.bf16.msra.mxu1 %v4342_v59  ;;  %v4474_v59 = vld [vmem:[%s3801_s17] sm:$0xfc]  }
  0xc9   : > { %1189 = vmatprep.subr.bf16.mxu0 %v4349_v27  ;;  %1935 = vmatprep.subr.bf16.mxu1 %v4349_v27  ;;  %v4380_v27 = vld [vmem:[%s5148_s4 + $0x314] ss:$8 sps:$4 sm:$0xff]   ;;  %v4492_v43 = vrot.slane %v4474_v59, 2 }
  0xca   : > { %5275 = vst [vmem:[#allocation14_spill] sm:$0xff] %v4380_v27 }
  0xcc   : > { %1190 = vmatpush1.bf16.msra.mxu0 %v4357_v2  ;;  %1936 = vmatpush1.bf16.msra.mxu1 %v4357_v2  ;;  %v4471_v2 = vld [vmem:[%s3813_s26] sm:$0xfc]   ;;  %s321_s26 = scalar_lea.vmem %s5150_s6, %s3315_s15 }
  0xcd   : > { %1327 = vmatprep.subr.bf16.mxu0 %v4364_v55  ;;  %1968 = vmatprep.subr.bf16.mxu1 %v4364_v55  ;;  %v5278_v55 = vmov 0   ;;  %v1546_v42 = vshll.u32 %v4471_v2, 16 }
  0xcf   : > { %1208 = vmatmul.mubr.bf16.vlgmr.msra.gmra.mrb[0].mxu0 %v4246_v34  ;;  %1954 = vmatmul.mubr.bf16.vlgmr.msra.gmra.mrb[0].mxu1 %v4366_v52  ;;  %v1548_v40 = vrot.slane %v1546_v42, 3  ;;  %v4620_v42 = vld [vmem:[%s5148_s4 + $0x400] ss:$8 sps:$4 sm:$0xff]  }
  0xd0   : > { %1328 = vmatpush1.bf16.msra.mxu0 %v4373_v56  ;;  %1969 = vmatpush1.bf16.msra.mxu1 %v4373_v56  ;;  %v4405_v56 = vld [vmem:[%s5148_s4 + $0x320] ss:$8 sps:$4 sm:$0xff]   ;;  %5308 = vst [vmem:[#allocation45_spill] sm:$0xff] %v4620_v42 }
  0xd1   : > { %1329 = vmatprep.subr.bf16.mxu0 %v4380_v27  ;;  %1970 = vmatprep.subr.bf16.mxu1 %v4380_v27  ;;  %5279 = vst [vmem:[#allocation17_spill] sm:$0xff] %v4405_v56  ;;  %v4412_v27 = vld [vmem:[%s5148_s4 + $0x334] ss:$8 sps:$4 sm:$0xff]  }
  0xd2   : > { %1359 = vmatprep.mubr.bf16.mxu0 %v5278_v55  ;;  %2000 = vmatprep.mubr.bf16.mxu1 %v5278_v55  ;;  %5280 = vst [vmem:[#allocation18_spill] sm:$0xff] %v4412_v27 }
  0xd4   : > { %1330 = vmatpush1.bf16.msra.mxu0 %v4389_v30  ;;  %1971 = vmatpush1.bf16.msra.mxu1 %v4389_v30  ;;  %v4419_v30 = vld [vmem:[%s5148_s4 + $0x330] ss:$8 sps:$4 sm:$0xff]  }
  0xd5   : > { %1331 = vmatprep.subr.bf16.mxu0 %v4396_v31  ;;  %1972 = vmatprep.subr.bf16.mxu1 %v4396_v31  ;;  %5281 = vst [vmem:[#allocation19_spill] sm:$0xff] %v4419_v30  ;;  %v4426_v31 = vld [vmem:[%s5148_s4 + $0x344] ss:$8 sps:$4 sm:$0xff]  }
  0xd6   : > { %5282 = vst [vmem:[#allocation20_spill] sm:$0xff] %v4426_v31 }
  0xd8   : > { %1332 = vmatpush1.bf16.msra.mxu0 %v4405_v56  ;;  %1973 = vmatpush1.bf16.msra.mxu1 %v4405_v56  ;;  %v4433_v56 = vld [vmem:[%s5148_s4 + $0x340] ss:$8 sps:$4 sm:$0xff]  }
  0xd9   : > { %1333 = vmatprep.subr.bf16.mxu0 %v4412_v27  ;;  %1974 = vmatprep.subr.bf16.mxu1 %v4412_v27  ;;  %5283 = vst [vmem:[#allocation21_spill] sm:$0xff] %v4433_v56  ;;  %v4440_v27 = vld [vmem:[%s5148_s4 + $0x354] ss:$8 sps:$4 sm:$0xff]  }
  0xda   : > { %5284 = vst [vmem:[#allocation22_spill] sm:$0xff] %v4440_v27 }
  0xdc   : > { %1334 = vmatpush1.bf16.msra.mxu0 %v4419_v30  ;;  %1975 = vmatpush1.bf16.msra.mxu1 %v4419_v30  ;;  %v4447_v30 = vld [vmem:[%s5148_s4 + $0x350] ss:$8 sps:$4 sm:$0xff]  }
  0xdd   : > { %1335 = vmatprep.subr.bf16.mxu0 %v4426_v31  ;;  %1976 = vmatprep.subr.bf16.mxu1 %v4426_v31  ;;  %5285 = vst [vmem:[#allocation23_spill] sm:$0xff] %v4447_v30  ;;  %v4454_v31 = vld [vmem:[%s5148_s4 + $0x364] ss:$8 sps:$4 sm:$0xff]  }
  0xde   : > { %5286 = vst [vmem:[#allocation24_spill] sm:$0xff] %v4454_v31 }
  0xe0   : > { %1336 = vmatpush1.bf16.msra.mxu0 %v4433_v56  ;;  %1977 = vmatpush1.bf16.msra.mxu1 %v4433_v56  ;;  %v4461_v56 = vld [vmem:[%s5148_s4 + $0x360] ss:$8 sps:$4 sm:$0xff]  }
  0xe1   : > { %1337 = vmatprep.subr.bf16.mxu0 %v4440_v27  ;;  %1978 = vmatprep.subr.bf16.mxu1 %v4440_v27  ;;  %5287 = vst [vmem:[#allocation25_spill] sm:$0xff] %v4461_v56  ;;  %v4468_v27 = vld [vmem:[%s5148_s4 + $0x374] ss:$8 sps:$4 sm:$0xff]  }
  0xe2   : > { %5288 = vst [vmem:[#allocation26_spill] sm:$0xff] %v4468_v27 }
  0xe4   : > { %1338 = vmatpush1.bf16.msra.mxu0 %v4447_v30  ;;  %1979 = vmatpush1.bf16.msra.mxu1 %v4447_v30  ;;  %v4481_v30 = vld [vmem:[%s5148_s4 + $0x370] ss:$8 sps:$4 sm:$0xff]  }
  0xe5   : > { %1339 = vmatprep.subr.bf16.mxu0 %v4454_v31  ;;  %1980 = vmatprep.subr.bf16.mxu1 %v4454_v31  ;;  %5289 = vst [vmem:[#allocation27_spill] sm:$0xff] %v4481_v30  ;;  %v4488_v31 = vld [vmem:[%s5148_s4 + $0x384] ss:$8 sps:$4 sm:$0xff]  }
  0xe6   : > { %5290 = vst [vmem:[#allocation28_spill] sm:$0xff] %v4488_v31 }
  0xe8   : > { %1340 = vmatpush1.bf16.msra.mxu0 %v4461_v56  ;;  %1981 = vmatpush1.bf16.msra.mxu1 %v4461_v56  ;;  %v4499_v56 = vld [vmem:[%s5148_s4 + $0x380] ss:$8 sps:$4 sm:$0xff]  }
  0xe9   : > { %1341 = vmatprep.subr.bf16.mxu0 %v4468_v27  ;;  %1982 = vmatprep.subr.bf16.mxu1 %v4468_v27  ;;  %5291 = vst [vmem:[#allocation29_spill] sm:$0xff] %v4499_v56  ;;  %v5293_v27 = vrot.slane %v4471_v2, 2 }
  0xec   : > { %1342 = vmatpush1.bf16.msra.mxu0 %v4481_v30  ;;  %1983 = vmatpush1.bf16.msra.mxu1 %v4481_v30  ;;  %v4516_v30 = vld [vmem:[%s5148_s4 + $0x390] ss:$8 sps:$4 sm:$0xff]  }
  0xed   : > { %1479 = vmatprep.subr.bf16.mxu0 %v4488_v31  ;;  %2015 = vmatprep.subr.bf16.mxu1 %v4488_v31  ;;  %5294 = vst [vmem:[#allocation31_spill] sm:$0xff] %v4516_v30  ;;  %v4523_v31 = vld [vmem:[%s5148_s4 + $0x3a4] ss:$8 sps:$4 sm:$0xff]  }
  0xee   : > { %5295 = vst [vmem:[#allocation32_spill] sm:$0xff] %v4523_v31 }
  0xef   : > { %1360 = vmatmul.mubr.bf16.vlgmr.msra.gmra.mrb[0].mxu0 %v5293_v27  ;;  %2001 = vmatmul.mubr.bf16.vlgmr.msra.gmra.mrb[0].mxu1 %v4492_v43  ;;  %v4532_v27 = vld [vmem:[%s5148_s4 + $0x3a0] ss:$8 sps:$4 sm:$0xff]  }
  0xf0   : > { %1480 = vmatpush1.bf16.msra.mxu0 %v4499_v56  ;;  %2016 = vmatpush1.bf16.msra.mxu1 %v4499_v56  ;;  %5296 = vst [vmem:[#allocation33_spill] sm:$0xff] %v4532_v27  ;;  %v1543_v56 = vshrl.u32 %v4471_v2, 16 }
  0xf1   : > { %1481 = vmatprep.subr.bf16.mxu0 %v4506_v44  ;;  %2017 = vmatprep.subr.bf16.mxu1 %v4506_v44  ;;  %v4539_v44 = vld [vmem:[%s5148_s4 + $0x3b4] ss:$8 sps:$4 sm:$0xff]  }
  0xf2   : > { %1511 = vmatprep.mubr.bf16.mxu0 %v5278_v55  ;;  %2047 = vmatprep.mubr.bf16.mxu1 %v5278_v55  ;;  %5297 = vst [vmem:[#allocation34_spill] sm:$0xff] %v4539_v44  ;;  %v1545_v41 = vrot.slane %v1543_v56, 2 }
  0xf4   : > { %1482 = vmatpush1.bf16.msra.mxu0 %v4516_v30  ;;  %2018 = vmatpush1.bf16.msra.mxu1 %v4516_v30  ;;  %v4546_v30 = vld [vmem:[%s5148_s4 + $0x3b0] ss:$8 sps:$4 sm:$0xff]   ;;  %v4613_v56 = vor.u32 %v1548_v40, %v1545_v41  ;;  %v4643_v41 = vld [vmem:[%s5148_s4 + $0x424] ss:$8 sps:$4 sm:$0xff]  }
  0xf5   : > { %1483 = vmatprep.subr.bf16.mxu0 %v4523_v31  ;;  %2019 = vmatprep.subr.bf16.mxu1 %v4523_v31  ;;  %5298 = vst [vmem:[#allocation35_spill] sm:$0xff] %v4546_v30  ;;  %v4553_v31 = vld [vmem:[%s5148_s4 + $0x3c4] ss:$8 sps:$4 sm:$0xff]   ;;  %v4636_v40 = vld [vmem:[%s5148_s4 + $0x410] ss:$8 sps:$4 sm:$0xff]   ;;  %5311 = vst [vmem:[#allocation48_spill] sm:$0xff] %v4643_v41 }
  0xf6   : > { %5299 = vst [vmem:[#allocation36_spill] sm:$0xff] %v4553_v31  ;;  %5310 = vst [vmem:[#allocation47_spill] sm:$0xff] %v4636_v40 }
  0xf8   : > { %1484 = vmatpush1.bf16.msra.mxu0 %v4532_v27  ;;  %2020 = vmatpush1.bf16.msra.mxu1 %v4532_v27  ;;  %v4560_v27 = vld [vmem:[%s5148_s4 + $0x3c0] ss:$8 sps:$4 sm:$0xff]  }
  0xf9   : > { %1485 = vmatprep.subr.bf16.mxu0 %v4539_v44  ;;  %2021 = vmatprep.subr.bf16.mxu1 %v4539_v44  ;;  %5300 = vst [vmem:[#allocation37_spill] sm:$0xff] %v4560_v27  ;;  %v4567_v44 = vld [vmem:[%s5148_s4 + $0x3d4] ss:$8 sps:$4 sm:$0xff]  }
  0xfa   : > { %5301 = vst [vmem:[#allocation38_spill] sm:$0xff] %v4567_v44 }
  0xfc   : > { %1486 = vmatpush1.bf16.msra.mxu0 %v4546_v30  ;;  %2022 = vmatpush1.bf16.msra.mxu1 %v4546_v30  ;;  %v4574_v30 = vld [vmem:[%s5148_s4 + $0x3d0] ss:$8 sps:$4 sm:$0xff]  }
  0xfd   : > { %1487 = vmatprep.subr.bf16.mxu0 %v4553_v31  ;;  %2023 = vmatprep.subr.bf16.mxu1 %v4553_v31  ;;  %5302 = vst [vmem:[#allocation39_spill] sm:$0xff] %v4574_v30  ;;  %v4581_v31 = vld [vmem:[%s5148_s4 + $0x3e4] ss:$8 sps:$4 sm:$0xff]  }
  0xfe   : > { %5303 = vst [vmem:[#allocation40_spill] sm:$0xff] %v4581_v31 }
 0x100   : > { %1488 = vmatpush1.bf16.msra.mxu0 %v4560_v27  ;;  %2024 = vmatpush1.bf16.msra.mxu1 %v4560_v27  ;;  %v4590_v27 = vld [vmem:[%s5148_s4 + $0x3e0] ss:$8 sps:$4 sm:$0xff]  }
 0x101   : > { %1489 = vmatprep.subr.bf16.mxu0 %v4567_v44  ;;  %2025 = vmatprep.subr.bf16.mxu1 %v4567_v44  ;;  %5304 = vst [vmem:[#allocation41_spill] sm:$0xff] %v4590_v27  ;;  %v4597_v44 = vld [vmem:[%s5148_s4 + $0x3f4] ss:$8 sps:$4 sm:$0xff]  }
 0x102   : > { %5305 = vst [vmem:[#allocation42_spill] sm:$0xff] %v4597_v44 }
 0x104   : > { %1490 = vmatpush1.bf16.msra.mxu0 %v4574_v30  ;;  %2026 = vmatpush1.bf16.msra.mxu1 %v4574_v30  ;;  %v4604_v30 = vld [vmem:[%s5148_s4 + $0x3f0] ss:$8 sps:$4 sm:$0xff]  }
 0x105   : > { %1491 = vmatprep.subr.bf16.mxu0 %v4581_v31  ;;  %2027 = vmatprep.subr.bf16.mxu1 %v4581_v31  ;;  %5306 = vst [vmem:[#allocation43_spill] sm:$0xff] %v4604_v30  ;;  %v4611_v31 = vld [vmem:[%s5148_s4 + $0x404] ss:$8 sps:$4 sm:$0xff]  }
 0x106   : > { %5307 = vst [vmem:[#allocation44_spill] sm:$0xff] %v4611_v31 }
 0x108   : > { %1492 = vmatpush1.bf16.msra.mxu0 %v4590_v27  ;;  %2028 = vmatpush1.bf16.msra.mxu1 %v4590_v27 }
 0x109   : > { %1493 = vmatprep.subr.bf16.mxu0 %v4597_v44  ;;  %2029 = vmatprep.subr.bf16.mxu1 %v4597_v44  ;;  %v4627_v44 = vld [vmem:[%s5148_s4 + $0x414] ss:$8 sps:$4 sm:$0xff]  }
 0x10a   : > { %5309 = vst [vmem:[#allocation46_spill] sm:$0xff] %v4627_v44 }
 0x10c   : > { %1494 = vmatpush1.bf16.msra.mxu0 %v4604_v30  ;;  %2030 = vmatpush1.bf16.msra.mxu1 %v4604_v30  ;;  %v2066_v30 = vshll.u32 %v4474_v59, 16 }
 0x10d   : > { %1631 = vmatprep.subr.bf16.mxu0 %v4611_v31  ;;  %2071 = vmatprep.subr.bf16.mxu1 %v4611_v31  ;;  %v2063_v31 = vshrl.u32 %v4474_v59, 16 }
 0x10e   : > { %v2068_v59 = vrot.slane %v2066_v30, 3  ;;  %v3679_v30 = vld [vmem:[%s5148_s4 + $0x84] ss:$8 sps:$4 sm:$0xff]  }
 0x10f   : > { %1512 = vmatmul.mubr.bf16.vlgmr.msra.gmra.mrb[0].mxu0 %v4492_v43  ;;  %2048 = vmatmul.mubr.bf16.vlgmr.msra.gmra.mrb[0].mxu1 %v4613_v56  ;;  %v2065_v27 = vrot.slane %v2063_v31, 2  ;;  %v3680_v31 = vld [vmem:[%s5148_s4 + $0x80] ss:$8 sps:$4 sm:$0xff]  }
 0x110   : > { %1632 = vmatpush1.bf16.msra.mxu0 %v4620_v42  ;;  %2072 = vmatpush1.bf16.msra.mxu1 %v4620_v42  ;;  %v4652_v42 = vld [vmem:[%s5148_s4 + $0x420] ss:$8 sps:$4 sm:$0xff]  }
 0x111   : > { %1633 = vmatprep.subr.bf16.mxu0 %v4627_v44  ;;  %2073 = vmatprep.subr.bf16.mxu1 %v4627_v44  ;;  %5312 = vst [vmem:[#allocation49_spill] sm:$0xff] %v4652_v42  ;;  %v4659_v44 = vld [vmem:[%s5148_s4 + $0x434] ss:$8 sps:$4 sm:$0xff]  }
 0x112   : > { %1663 = vmatprep.mubr.bf16.mxu0 %v5278_v55  ;;  %2103 = vmatprep.mubr.bf16.mxu1 %v5278_v55  ;;  %5313 = vst [vmem:[#allocation50_spill] sm:$0xff] %v4659_v44 }
 0x114   : > { %1634 = vmatpush1.bf16.msra.mxu0 %v4636_v40  ;;  %2074 = vmatpush1.bf16.msra.mxu1 %v4636_v40  ;;  %v4666_v40 = vld [vmem:[%s5148_s4 + $0x430] ss:$8 sps:$4 sm:$0xff]  }
 0x115   : > { %1635 = vmatprep.subr.bf16.mxu0 %v4643_v41  ;;  %2075 = vmatprep.subr.bf16.mxu1 %v4643_v41  ;;  %5314 = vst [vmem:[#allocation51_spill] sm:$0xff] %v4666_v40  ;;  %v4673_v41 = vld [vmem:[%s5148_s4 + $0x444] ss:$8 sps:$4 sm:$0xff]  }
 0x116   : > { %5315 = vst [vmem:[#allocation52_spill] sm:$0xff] %v4673_v41 }
 0x118   : > { %1636 = vmatpush1.bf16.msra.mxu0 %v4652_v42  ;;  %2076 = vmatpush1.bf16.msra.mxu1 %v4652_v42  ;;  %v4680_v42 = vld [vmem:[%s5148_s4 + $0x440] ss:$8 sps:$4 sm:$0xff]  }
 0x119   : > { %1637 = vmatprep.subr.bf16.mxu0 %v4659_v44  ;;  %2077 = vmatprep.subr.bf16.mxu1 %v4659_v44  ;;  %5316 = vst [vmem:[#allocation53_spill] sm:$0xff] %v4680_v42  ;;  %v4687_v44 = vld [vmem:[%s5148_s4 + $0x454] ss:$8 sps:$4 sm:$0xff]  }
 0x11a   : > { %5317 = vst [vmem:[#allocation54_spill] sm:$0xff] %v4687_v44 }
 0x11c   : > { %1638 = vmatpush1.bf16.msra.mxu0 %v4666_v40  ;;  %2078 = vmatpush1.bf16.msra.mxu1 %v4666_v40  ;;  %v4694_v40 = vld [vmem:[%s5148_s4 + $0x450] ss:$8 sps:$4 sm:$0xff]  }
 0x11d   : > { %1639 = vmatprep.subr.bf16.mxu0 %v4673_v41  ;;  %2079 = vmatprep.subr.bf16.mxu1 %v4673_v41  ;;  %5318 = vst [vmem:[#allocation55_spill] sm:$0xff] %v4694_v40  ;;  %v4701_v41 = vld [vmem:[%s5148_s4 + $0x464] ss:$8 sps:$4 sm:$0xff]  }
 0x11e   : > { %5319 = vst [vmem:[#allocation56_spill] sm:$0xff] %v4701_v41 }
 0x120   : > { %1640 = vmatpush1.bf16.msra.mxu0 %v4680_v42  ;;  %2080 = vmatpush1.bf16.msra.mxu1 %v4680_v42  ;;  %v4710_v42 = vld [vmem:[%s5148_s4 + $0x460] ss:$8 sps:$4 sm:$0xff]  }
 0x121   : > { %1641 = vmatprep.subr.bf16.mxu0 %v4687_v44  ;;  %2081 = vmatprep.subr.bf16.mxu1 %v4687_v44  ;;  %v4717_v44 = vld [vmem:[%s5148_s4 + $0x474] ss:$8 sps:$4 sm:$0xff]  }
 0x124   : > { %1642 = vmatpush1.bf16.msra.mxu0 %v4694_v40  ;;  %2082 = vmatpush1.bf16.msra.mxu1 %v4694_v40  ;;  %v4724_v40 = vld [vmem:[%s5148_s4 + $0x470] ss:$8 sps:$4 sm:$0xff]  }
 0x125   : > { %1643 = vmatprep.subr.bf16.mxu0 %v4701_v41  ;;  %2083 = vmatprep.subr.bf16.mxu1 %v4701_v41  ;;  %v4728_v41 = vor.u32 %v2068_v59, %v2065_v27  ;;  %v3681_v27 = vld [vmem:[%s5148_s4 + $0x94] ss:$8 sps:$4 sm:$0xff]   ;;  %v3682_v59 = vld [vmem:[%s5148_s4 + $0x90] ss:$8 sps:$4 sm:$0xff]  }
 0x128   : > { %1644 = vmatpush1.bf16.msra.mxu0 %v4710_v42  ;;  %2084 = vmatpush1.bf16.msra.mxu1 %v4710_v42 }
 0x129   : > { %1645 = vmatprep.subr.bf16.mxu0 %v4717_v44  ;;  %2085 = vmatprep.subr.bf16.mxu1 %v4717_v44 }
 0x12c   : > { %1646 = vmatpush1.bf16.msra.mxu0 %v4724_v40  ;;  %2086 = vmatpush1.bf16.msra.mxu1 %v4724_v40 }
 0x12d   : > { %2122 = vmatprep.subr.bf16.mxu0 %v3679_v30  ;;  %2568 = vmatprep.subr.bf16.mxu1 %v3679_v30  ;;  %v3683_v30 = vld [vmem:[%s5148_s4 + $0xa4] ss:$8 sps:$4 sm:$0xff]  }
 0x12f   : > { %1664 = vmatmul.mubr.bf16.vlgmr.msra.gmra.mrb[0].mxu0 %v4613_v56  ;;  %2104 = vmatmul.mubr.bf16.vlgmr.msra.gmra.mrb[0].mxu1 %v4728_v41 }
 0x130   : > { %2123 = vmatpush1.bf16.msra.mxu0 %v3680_v31  ;;  %2569 = vmatpush1.bf16.msra.mxu1 %v3680_v31  ;;  %v3684_v31 = vld [vmem:[%s5148_s4 + $0xa0] ss:$8 sps:$4 sm:$0xff]  }
 0x131   : > { %2124 = vmatprep.subr.bf16.mxu0 %v3681_v27  ;;  %2570 = vmatprep.subr.bf16.mxu1 %v3681_v27  ;;  %v3685_v27 = vld [vmem:[%s5148_s4 + $0xb4] ss:$8 sps:$4 sm:$0xff]  }
 0x132   : > { %2154 = vmatprep.mubr.bf16.mxu0 %v5278_v55  ;;  %2600 = vmatprep.mubr.bf16.mxu1 %v5278_v55 }
 0x134   : > { %2125 = vmatpush1.bf16.msra.mxu0 %v3682_v59  ;;  %2571 = vmatpush1.bf16.msra.mxu1 %v3682_v59  ;;  %v3686_v59 = vld [vmem:[%s5148_s4 + $0xb0] ss:$8 sps:$4 sm:$0xff]  }
 0x135   : > { %2126 = vmatprep.subr.bf16.mxu0 %v3683_v30  ;;  %2572 = vmatprep.subr.bf16.mxu1 %v3683_v30  ;;  %v3687_v30 = vld [vmem:[%s5148_s4 + $0xc4] ss:$8 sps:$4 sm:$0xff]  }
 0x138   : > { %2127 = vmatpush1.bf16.msra.mxu0 %v3684_v31  ;;  %2573 = vmatpush1.bf16.msra.mxu1 %v3684_v31  ;;  %v3688_v31 = vld [vmem:[%s5148_s4 + $0xc0] ss:$8 sps:$4 sm:$0xff]  }
 0x139   : > { %2128 = vmatprep.subr.bf16.mxu0 %v3685_v27  ;;  %2574 = vmatprep.subr.bf16.mxu1 %v3685_v27  ;;  %v3689_v27 = vld [vmem:[%s5148_s4 + $0xd4] ss:$8 sps:$4 sm:$0xff]  }
 0x13c   : > { %2129 = vmatpush1.bf16.msra.mxu0 %v3686_v59  ;;  %2575 = vmatpush1.bf16.msra.mxu1 %v3686_v59  ;;  %v3690_v59 = vld [vmem:[%s5148_s4 + $0xd0] ss:$8 sps:$4 sm:$0xff]  }
 0x13d   : > { %2130 = vmatprep.subr.bf16.mxu0 %v3687_v30  ;;  %2576 = vmatprep.subr.bf16.mxu1 %v3687_v30  ;;  %v3691_v30 = vld [vmem:[%s5148_s4 + $0xe4] ss:$8 sps:$4 sm:$0xff]  }
 0x140   : > { %2131 = vmatpush1.bf16.msra.mxu0 %v3688_v31  ;;  %2577 = vmatpush1.bf16.msra.mxu1 %v3688_v31  ;;  %v3692_v31 = vld [vmem:[%s5148_s4 + $0xe0] ss:$8 sps:$4 sm:$0xff]  }
 0x141   : > { %2132 = vmatprep.subr.bf16.mxu0 %v3689_v27  ;;  %2578 = vmatprep.subr.bf16.mxu1 %v3689_v27  ;;  %v3693_v27 = vld [vmem:[%s5148_s4 + $0xf4] ss:$8 sps:$4 sm:$0xff]  }
 0x144   : > { %2133 = vmatpush1.bf16.msra.mxu0 %v3690_v59  ;;  %2579 = vmatpush1.bf16.msra.mxu1 %v3690_v59  ;;  %v3694_v59 = vld [vmem:[%s5148_s4 + $0xf0] ss:$8 sps:$4 sm:$0xff]  }
 0x145   : > { %2134 = vmatprep.subr.bf16.mxu0 %v3691_v30  ;;  %2580 = vmatprep.subr.bf16.mxu1 %v3691_v30  ;;  %v3695_v30 = vld [vmem:[%s5148_s4 + $0x4] ss:$8 sps:$4 sm:$0xff]  }
 0x148   : > { %2135 = vmatpush1.bf16.msra.mxu0 %v3692_v31  ;;  %2581 = vmatpush1.bf16.msra.mxu1 %v3692_v31  ;;  %v3696_v31 = vld [vmem:[%s5148_s4] ss:$8 sps:$4 sm:$0xff]  }
 0x149   : > { %2136 = vmatprep.subr.bf16.mxu0 %v3693_v27  ;;  %2582 = vmatprep.subr.bf16.mxu1 %v3693_v27  ;;  %v3697_v27 = vld [vmem:[%s5148_s4 + $0x14] ss:$8 sps:$4 sm:$0xff]  }
 0x14c   : > { %2137 = vmatpush1.bf16.msra.mxu0 %v3694_v59  ;;  %2583 = vmatpush1.bf16.msra.mxu1 %v3694_v59  ;;  %v3698_v59 = vld [vmem:[%s5148_s4 + $0x10] ss:$8 sps:$4 sm:$0xff]  }
 0x14d   : > { %2165 = vmatprep.subr.bf16.mxu0 %v3695_v30  ;;  %2611 = vmatprep.subr.bf16.mxu1 %v3695_v30  ;;  %v3699_v30 = vld [vmem:[%s5148_s4 + $0x24] ss:$8 sps:$4 sm:$0xff]  }
 0x14f   : > { %2155 = vmatmul.mubr.bf16.vlgmr.msra.gmra.mrb[4].mxu0 %v4126_v14  ;;  %2601 = vmatmul.mubr.bf16.vlgmr.msra.gmra.mrb[4].mxu1 %v4246_v34 }
 0x150   : > { %2166 = vmatpush1.bf16.msra.mxu0 %v3696_v31  ;;  %2612 = vmatpush1.bf16.msra.mxu1 %v3696_v31  ;;  %v3700_v31 = vld [vmem:[%s5148_s4 + $0x20] ss:$8 sps:$4 sm:$0xff]  }
 0x151   : > { %2167 = vmatprep.subr.bf16.mxu0 %v3697_v27  ;;  %2613 = vmatprep.subr.bf16.mxu1 %v3697_v27  ;;  %v3701_v27 = vld [vmem:[%s5148_s4 + $0x34] ss:$8 sps:$4 sm:$0xff]  }
 0x152   : > { %2197 = vmatprep.mubr.bf16.mxu0 %v5278_v55  ;;  %2643 = vmatprep.mubr.bf16.mxu1 %v5278_v55 }
 0x154   : > { %2168 = vmatpush1.bf16.msra.mxu0 %v3698_v59  ;;  %2614 = vmatpush1.bf16.msra.mxu1 %v3698_v59  ;;  %v3702_v59 = vld [vmem:[%s5148_s4 + $0x30] ss:$8 sps:$4 sm:$0xff]  }
 0x155   : > { %2169 = vmatprep.subr.bf16.mxu0 %v3699_v30  ;;  %2615 = vmatprep.subr.bf16.mxu1 %v3699_v30  ;;  %v3703_v30 = vld [vmem:[%s5148_s4 + $0x44] ss:$8 sps:$4 sm:$0xff]  }
 0x158   : > { %2170 = vmatpush1.bf16.msra.mxu0 %v3700_v31  ;;  %2616 = vmatpush1.bf16.msra.mxu1 %v3700_v31  ;;  %v3704_v31 = vld [vmem:[%s5148_s4 + $0x40] ss:$8 sps:$4 sm:$0xff]  }
 0x159   : > { %2171 = vmatprep.subr.bf16.mxu0 %v3701_v27  ;;  %2617 = vmatprep.subr.bf16.mxu1 %v3701_v27  ;;  %v3705_v27 = vld [vmem:[%s5148_s4 + $0x54] ss:$8 sps:$4 sm:$0xff]  }
 0x15c   : > { %2172 = vmatpush1.bf16.msra.mxu0 %v3702_v59  ;;  %2618 = vmatpush1.bf16.msra.mxu1 %v3702_v59  ;;  %v3706_v59 = vld [vmem:[%s5148_s4 + $0x50] ss:$8 sps:$4 sm:$0xff]  }
 0x15d   : > { %2173 = vmatprep.subr.bf16.mxu0 %v3703_v30  ;;  %2619 = vmatprep.subr.bf16.mxu1 %v3703_v30  ;;  %v3707_v30 = vld [vmem:[%s5148_s4 + $0x64] ss:$8 sps:$4 sm:$0xff]  }
 0x160   : > { %2174 = vmatpush1.bf16.msra.mxu0 %v3704_v31  ;;  %2620 = vmatpush1.bf16.msra.mxu1 %v3704_v31  ;;  %v3708_v31 = vld [vmem:[%s5148_s4 + $0x60] ss:$8 sps:$4 sm:$0xff]  }
 0x161   : > { %2175 = vmatprep.subr.bf16.mxu0 %v3705_v27  ;;  %2621 = vmatprep.subr.bf16.mxu1 %v3705_v27  ;;  %v3709_v27 = vld [vmem:[%s5148_s4 + $0x74] ss:$8 sps:$4 sm:$0xff]  }
 0x164   : > { %2176 = vmatpush1.bf16.msra.mxu0 %v3706_v59  ;;  %2622 = vmatpush1.bf16.msra.mxu1 %v3706_v59  ;;  %v3710_v59 = vld [vmem:[%s5148_s4 + $0x70] ss:$8 sps:$4 sm:$0xff]  }
 0x165   : > { %2177 = vmatprep.subr.bf16.mxu0 %v3707_v30  ;;  %2623 = vmatprep.subr.bf16.mxu1 %v3707_v30  ;;  %v3711_v30 = vld [vmem:[%s5148_s4 + $0x104] ss:$8 sps:$4 sm:$0xff]  }
 0x168   : > { %2178 = vmatpush1.bf16.msra.mxu0 %v3708_v31  ;;  %2624 = vmatpush1.bf16.msra.mxu1 %v3708_v31  ;;  %v3712_v31 = vld [vmem:[%s5148_s4 + $0x100] ss:$8 sps:$4 sm:$0xff]  }
 0x169   : > { %2179 = vmatprep.subr.bf16.mxu0 %v3709_v27  ;;  %2625 = vmatprep.subr.bf16.mxu1 %v3709_v27  ;;  %v3713_v27 = vld [vmem:[%s5148_s4 + $0x114] ss:$8 sps:$4 sm:$0xff]  }
 0x16c   : > { %2180 = vmatpush1.bf16.msra.mxu0 %v3710_v59  ;;  %2626 = vmatpush1.bf16.msra.mxu1 %v3710_v59  ;;  %v3716_v59 = vld [vmem:[%s5148_s4 + $0x120] ss:$8 sps:$4 sm:$0xff]  }
 0x16d   : > { %2208 = vmatprep.subr.bf16.mxu0 %v3711_v30  ;;  %2654 = vmatprep.subr.bf16.mxu1 %v3711_v30 }
 0x16f   : > { %2198 = vmatmul.mubr.bf16.vlgmr.msra.gmra.mrb[4].mxu0 %v4123_v13  ;;  %2644 = vmatmul.mubr.bf16.vlgmr.msra.gmra.mrb[4].mxu1 %v4126_v14  ;;  %v3714_v13 = vld [vmem:[%s5148_s4 + $0x110] ss:$8 sps:$4 sm:$0xff]   ;;  %v3715_v14 = vld [vmem:[%s5148_s4 + $0x124] ss:$8 sps:$4 sm:$0xff]  }
 0x170   : > { %2209 = vmatpush1.bf16.msra.mxu0 %v3712_v31  ;;  %2655 = vmatpush1.bf16.msra.mxu1 %v3712_v31 }
 0x171   : > { %2210 = vmatprep.subr.bf16.mxu0 %v3713_v27  ;;  %2656 = vmatprep.subr.bf16.mxu1 %v3713_v27  ;;  %v5358_v27 = vld [vmem:[#allocation39_spill] sm:$0xff] }
 0x172   : > { %2240 = vmatprep.mubr.bf16.mxu0 %v5278_v55  ;;  %2686 = vmatprep.mubr.bf16.mxu1 %v5278_v55 }
 0x174   : > { %2211 = vmatpush1.bf16.msra.mxu0 %v3714_v13  ;;  %2657 = vmatpush1.bf16.msra.mxu1 %v3714_v13  ;;  %v5359_v13 = vld [vmem:[#allocation40_spill] sm:$0xff] }
 0x175   : > { %2212 = vmatprep.subr.bf16.mxu0 %v3715_v14  ;;  %2658 = vmatprep.subr.bf16.mxu1 %v3715_v14 }
 0x178   : > { %2213 = vmatpush1.bf16.msra.mxu0 %v3716_v59  ;;  %2659 = vmatpush1.bf16.msra.mxu1 %v3716_v59 }
 0x179   : > { %2214 = vmatprep.subr.bf16.mxu0 %v3935_v45  ;;  %2660 = vmatprep.subr.bf16.mxu1 %v3935_v45  ;;  %v5320_v45 = vrot.slane %v4471_v2, 2  ;;  %v5321_v2 = vld [vmem:[#allocation2_spill] sm:$0xff] }
 0x17c   : > { %2215 = vmatpush1.bf16.msra.mxu0 %v3940_v46  ;;  %2661 = vmatpush1.bf16.msra.mxu1 %v3940_v46  ;;  %v5322_v46 = vld [vmem:[#allocation3_spill] sm:$0xff] }
 0x17d   : > { %2216 = vmatprep.subr.bf16.mxu0 %v3947_v47  ;;  %2662 = vmatprep.subr.bf16.mxu1 %v3947_v47  ;;  %v5323_v47 = vld [vmem:[#allocation4_spill] sm:$0xff] }
 0x180   : > { %2217 = vmatpush1.bf16.msra.mxu0 %v3954_v48  ;;  %2663 = vmatpush1.bf16.msra.mxu1 %v3954_v48  ;;  %v5324_v48 = vld [vmem:[#allocation5_spill] sm:$0xff] }
 0x181   : > { %2218 = vmatprep.subr.bf16.mxu0 %v3961_v49  ;;  %2664 = vmatprep.subr.bf16.mxu1 %v3961_v49  ;;  %v5325_v49 = vld [vmem:[#allocation6_spill] sm:$0xff] }
 0x184   : > { %2219 = vmatpush1.bf16.msra.mxu0 %v3968_v50  ;;  %2665 = vmatpush1.bf16.msra.mxu1 %v3968_v50  ;;  %v5326_v50 = vld [vmem:[#allocation7_spill] sm:$0xff] }
 0x185   : > { %2220 = vmatprep.subr.bf16.mxu0 %v3975_v51  ;;  %2666 = vmatprep.subr.bf16.mxu1 %v3975_v51  ;;  %v5327_v51 = vld [vmem:[#allocation8_spill] sm:$0xff] }
 0x188   : > { %2221 = vmatpush1.bf16.msra.mxu0 %v3983_v53  ;;  %2667 = vmatpush1.bf16.msra.mxu1 %v3983_v53  ;;  %v5328_v53 = vld [vmem:[#allocation9_spill] sm:$0xff] }
 0x189   : > { %2222 = vmatprep.subr.bf16.mxu0 %v3990_v54  ;;  %2668 = vmatprep.subr.bf16.mxu1 %v3990_v54  ;;  %v5329_v54 = vld [vmem:[#allocation10_spill] sm:$0xff] }
 0x18c   : > { %2223 = vmatpush1.bf16.msra.mxu0 %v3998_v57  ;;  %2669 = vmatpush1.bf16.msra.mxu1 %v3998_v57  ;;  %v5330_v57 = vld [vmem:[#allocation11_spill] sm:$0xff] }
 0x18d   : > { %2255 = vmatprep.subr.bf16.mxu0 %v4005_v58  ;;  %2701 = vmatprep.subr.bf16.mxu1 %v4005_v58  ;;  %v5331_v58 = vld [vmem:[#allocation12_spill] sm:$0xff] }
 0x18f   : > { %2241 = vmatmul.mubr.bf16.vlgmr.msra.gmra.mrb[4].mxu0 %v4246_v34  ;;  %2687 = vmatmul.mubr.bf16.vlgmr.msra.gmra.mrb[4].mxu1 %v4366_v52  ;;  %v5348_v34 = vld [vmem:[#allocation29_spill] sm:$0xff]  ;;  %v5355_v52 = vld [vmem:[#allocation36_spill] sm:$0xff] }
 0x190   : > { %2256 = vmatpush1.bf16.msra.mxu0 %v4012_v60  ;;  %2702 = vmatpush1.bf16.msra.mxu1 %v4012_v60  ;;  %v5332_v60 = vld [vmem:[#allocation13_spill] sm:$0xff] }
 0x191   : > { %2257 = vmatprep.subr.bf16.mxu0 %v4019_v61  ;;  %2703 = vmatprep.subr.bf16.mxu1 %v4019_v61  ;;  %v5333_v61 = vld [vmem:[#allocation14_spill] sm:$0xff] }
 0x192   : > { %2287 = vmatprep.mubr.bf16.mxu0 %v5278_v55  ;;  %2733 = vmatprep.mubr.bf16.mxu1 %v5278_v55 }
 0x194   : > { %2258 = vmatpush1.bf16.msra.mxu0 %v4027_v62  ;;  %2704 = vmatpush1.bf16.msra.mxu1 %v4027_v62  ;;  %v5334_v62 = vld [vmem:[#allocation15_spill] sm:$0xff] }
 0x195   : > { %2259 = vmatprep.subr.bf16.mxu0 %v4034_v63  ;;  %2705 = vmatprep.subr.bf16.mxu1 %v4034_v63  ;;  %v5335_v63 = vld [vmem:[#allocation16_spill] sm:$0xff] }
 0x198   : > { %2260 = vmatpush1.bf16.msra.mxu0 %v4043_v0  ;;  %2706 = vmatpush1.bf16.msra.mxu1 %v4043_v0  ;;  %v5336_v0 = vld [vmem:[#allocation17_spill] sm:$0xff] }
 0x199   : > { %2261 = vmatprep.subr.bf16.mxu0 %v4050_v1  ;;  %2707 = vmatprep.subr.bf16.mxu1 %v4050_v1  ;;  %v5337_v1 = vld [vmem:[#allocation18_spill] sm:$0xff] }
 0x19c   : > { %2262 = vmatpush1.bf16.msra.mxu0 %v4057_v3  ;;  %2708 = vmatpush1.bf16.msra.mxu1 %v4057_v3  ;;  %v5338_v3 = vld [vmem:[#allocation19_spill] sm:$0xff] }
 0x19d   : > { %2263 = vmatprep.subr.bf16.mxu0 %v4064_v4  ;;  %2709 = vmatprep.subr.bf16.mxu1 %v4064_v4  ;;  %v5339_v4 = vld [vmem:[#allocation20_spill] sm:$0xff] }
 0x1a0   : > { %2264 = vmatpush1.bf16.msra.mxu0 %v4071_v5  ;;  %2710 = vmatpush1.bf16.msra.mxu1 %v4071_v5  ;;  %v5340_v5 = vld [vmem:[#allocation21_spill] sm:$0xff] }
 0x1a1   : > { %2265 = vmatprep.subr.bf16.mxu0 %v4078_v6  ;;  %2711 = vmatprep.subr.bf16.mxu1 %v4078_v6  ;;  %v5341_v6 = vld [vmem:[#allocation22_spill] sm:$0xff] }
 0x1a4   : > { %2266 = vmatpush1.bf16.msra.mxu0 %v4085_v7  ;;  %2712 = vmatpush1.bf16.msra.mxu1 %v4085_v7 }
 0x1a5   : > { %2267 = vmatprep.subr.bf16.mxu0 %v4092_v8  ;;  %2713 = vmatprep.subr.bf16.mxu1 %v4092_v8 }
 0x1a8   : > { %2268 = vmatpush1.bf16.msra.mxu0 %v4099_v9  ;;  %2714 = vmatpush1.bf16.msra.mxu1 %v4099_v9 }
 0x1a9   : > { %2269 = vmatprep.subr.bf16.mxu0 %v4106_v10  ;;  %2715 = vmatprep.subr.bf16.mxu1 %v4106_v10 }
 0x1ac   : > { %2270 = vmatpush1.bf16.msra.mxu0 %v4113_v11  ;;  %2716 = vmatpush1.bf16.msra.mxu1 %v4113_v11 }
 0x1ad   : > { %2302 = vmatprep.subr.bf16.mxu0 %v4120_v12  ;;  %2748 = vmatprep.subr.bf16.mxu1 %v4120_v12 }
 0x1af   : > { %2288 = vmatmul.mubr.bf16.vlgmr.msra.gmra.mrb[4].mxu0 %v5320_v45  ;;  %2734 = vmatmul.mubr.bf16.vlgmr.msra.gmra.mrb[4].mxu1 %v4492_v43  ;;  %v5360_v45 = vld [vmem:[#allocation41_spill] sm:$0xff] }
 0x1b0   : > { %2303 = vmatpush1.bf16.msra.mxu0 %v4133_v15  ;;  %2749 = vmatpush1.bf16.msra.mxu1 %v4133_v15 }
 0x1b1   : > { %2304 = vmatprep.subr.bf16.mxu0 %v4140_v16  ;;  %2750 = vmatprep.subr.bf16.mxu1 %v4140_v16 }
 0x1b2   : > { %2334 = vmatprep.mubr.bf16.mxu0 %v5278_v55  ;;  %2780 = vmatprep.mubr.bf16.mxu1 %v5278_v55 }
 0x1b4   : > { %2305 = vmatpush1.bf16.msra.mxu0 %v4149_v17  ;;  %2751 = vmatpush1.bf16.msra.mxu1 %v4149_v17  ;;  %v5342_v17 = vld [vmem:[#allocation23_spill] sm:$0xff] }
 0x1b5   : > { %2306 = vmatprep.subr.bf16.mxu0 %v4156_v18  ;;  %2752 = vmatprep.subr.bf16.mxu1 %v4156_v18 }
 0x1b8   : > { %2307 = vmatpush1.bf16.msra.mxu0 %v4165_v19  ;;  %2753 = vmatpush1.bf16.msra.mxu1 %v4165_v19 }
 0x1b9   : > { %2308 = vmatprep.subr.bf16.mxu0 %v4172_v20  ;;  %2754 = vmatprep.subr.bf16.mxu1 %v4172_v20 }
 0x1bc   : > { %2309 = vmatpush1.bf16.msra.mxu0 %v4179_v21  ;;  %2755 = vmatpush1.bf16.msra.mxu1 %v4179_v21  ;;  %v5343_v21 = vld [vmem:[#allocation24_spill] sm:$0xff] }
 0x1bd   : > { %2310 = vmatprep.subr.bf16.mxu0 %v4186_v22  ;;  %2756 = vmatprep.subr.bf16.mxu1 %v4186_v22 }
 0x1c0   : > { %2311 = vmatpush1.bf16.msra.mxu0 %v4193_v23  ;;  %2757 = vmatpush1.bf16.msra.mxu1 %v4193_v23  ;;  %v3677_v23 = vld [vmem:[%s3881_s20] sm:$0xfc]  }
 0x1c1   : > { %2312 = vmatprep.subr.bf16.mxu0 %v4200_v24  ;;  %2758 = vmatprep.subr.bf16.mxu1 %v4200_v24  ;;  %v5043_v24 = vld [vmem:[%s3887_s24] sm:$0xfc]   ;;  %v2509_v30 = vshrl.u32 %v3677_v23, 16  ;;  %v2512_v31 = vshll.u32 %v3677_v23, 16 }
 0x1c3   : > { %v2511_v14 = vrot.slane %v2509_v30, 2  ;;  %v2514_v59 = vrot.slane %v2512_v31, 3 }
 0x1c4   : > { %2313 = vmatpush1.bf16.msra.mxu0 %v4207_v25  ;;  %2759 = vmatpush1.bf16.msra.mxu1 %v4207_v25  ;;  %v5344_v25 = vld [vmem:[#allocation25_spill] sm:$0xff] }
 0x1c5   : > { %2314 = vmatprep.subr.bf16.mxu0 %v4214_v26  ;;  %2760 = vmatprep.subr.bf16.mxu1 %v4214_v26  ;;  %v5345_v26 = vld [vmem:[#allocation26_spill] sm:$0xff] }
 0x1c8   : > { %2315 = vmatpush1.bf16.msra.mxu0 %v4222_v28  ;;  %2761 = vmatpush1.bf16.msra.mxu1 %v4222_v28  ;;  %v2403_v28 = vrot.slane %v3677_v23, 2  ;;  %v2996_v23 = vld [vmem:[%s5149_s5] sm:$0x3] }
 0x1c9   : > { %2316 = vmatprep.subr.bf16.mxu0 %v4229_v29  ;;  %2762 = vmatprep.subr.bf16.mxu1 %v4229_v29  ;;  %v2459_v29 = vrot.slane %v5043_v24, 2 }
 0x1cc   : > { %2317 = vmatpush1.bf16.msra.mxu0 %v4237_v32  ;;  %2763 = vmatpush1.bf16.msra.mxu1 %v4237_v32  ;;  %v5346_v32 = vld [vmem:[#allocation27_spill] sm:$0xff] }
 0x1cd   : > { %2349 = vmatprep.subr.bf16.mxu0 %v4244_v33  ;;  %2795 = vmatprep.subr.bf16.mxu1 %v4244_v33  ;;  %v5347_v33 = vld [vmem:[#allocation28_spill] sm:$0xff] }
 0x1cf   : > { %2335 = vmatmul.mubr.bf16.vlgmr.msra.gmra.mrb[4].mxu0 %v4492_v43  ;;  %2781 = vmatmul.mubr.bf16.vlgmr.msra.gmra.mrb[4].mxu1 %v4613_v56  ;;  %v5354_v43 = vld [vmem:[#allocation35_spill] sm:$0xff] }
 0x1d0   : > { %2350 = vmatpush1.bf16.msra.mxu0 %v4253_v35  ;;  %2796 = vmatpush1.bf16.msra.mxu1 %v4253_v35  ;;  %v5349_v35 = vld [vmem:[#allocation30_spill] sm:$0xff] }
 0x1d1   : > { %2351 = vmatprep.subr.bf16.mxu0 %v4260_v36  ;;  %2797 = vmatprep.subr.bf16.mxu1 %v4260_v36  ;;  %v5350_v36 = vld [vmem:[#allocation31_spill] sm:$0xff] }
 0x1d2   : > { %2381 = vmatprep.mubr.bf16.mxu0 %v5278_v55  ;;  %2827 = vmatprep.mubr.bf16.mxu1 %v5278_v55 }
 0x1d4   : > { %2352 = vmatpush1.bf16.msra.mxu0 %v4269_v37  ;;  %2798 = vmatpush1.bf16.msra.mxu1 %v4269_v37  ;;  %v5351_v37 = vld [vmem:[#allocation32_spill] sm:$0xff] }
 0x1d5   : > { %2353 = vmatprep.subr.bf16.mxu0 %v4276_v38  ;;  %2799 = vmatprep.subr.bf16.mxu1 %v4276_v38  ;;  %v5352_v38 = vld [vmem:[#allocation33_spill] sm:$0xff] }
 0x1d8   : > { %2354 = vmatpush1.bf16.msra.mxu0 %v4285_v39  ;;  %2800 = vmatpush1.bf16.msra.mxu1 %v4285_v39  ;;  %v5353_v39 = vld [vmem:[#allocation34_spill] sm:$0xff] }
 0x1d9   : > { %2355 = vmatprep.subr.bf16.mxu0 %v5321_v2  ;;  %2801 = vmatprep.subr.bf16.mxu1 %v5321_v2  ;;  %v5361_v2 = vld [vmem:[#allocation42_spill] sm:$0xff] }
 0x1dc   : > { %2356 = vmatpush1.bf16.msra.mxu0 %v5322_v46  ;;  %2802 = vmatpush1.bf16.msra.mxu1 %v5322_v46  ;;  %v2515_v46 = vor.u32 %v2514_v59, %v2511_v14 }
 0x1dd   : > { %2357 = vmatprep.subr.bf16.mxu0 %v5323_v47  ;;  %2803 = vmatprep.subr.bf16.mxu1 %v5323_v47  ;;  %v5362_v47 = vld [vmem:[#allocation43_spill] sm:$0xff] }
 0x1e0   : > { %2358 = vmatpush1.bf16.msra.mxu0 %v5324_v48  ;;  %2804 = vmatpush1.bf16.msra.mxu1 %v5324_v48  ;;  %v5363_v48 = vld [vmem:[#allocation44_spill] sm:$0xff] }
 0x1e1   : > { %2359 = vmatprep.subr.bf16.mxu0 %v5325_v49  ;;  %2805 = vmatprep.subr.bf16.mxu1 %v5325_v49  ;;  %v5364_v49 = vld [vmem:[#allocation45_spill] sm:$0xff] }
 0x1e4   : > { %2360 = vmatpush1.bf16.msra.mxu0 %v5326_v50  ;;  %2806 = vmatpush1.bf16.msra.mxu1 %v5326_v50  ;;  %v5365_v50 = vld [vmem:[#allocation46_spill] sm:$0xff] }
 0x1e5   : > { %2361 = vmatprep.subr.bf16.mxu0 %v5327_v51  ;;  %2807 = vmatprep.subr.bf16.mxu1 %v5327_v51  ;;  %v5366_v51 = vld [vmem:[#allocation47_spill] sm:$0xff] }
 0x1e8   : > { %2362 = vmatpush1.bf16.msra.mxu0 %v5328_v53  ;;  %2808 = vmatpush1.bf16.msra.mxu1 %v5328_v53  ;;  %v5367_v53 = vld [vmem:[#allocation48_spill] sm:$0xff] }
 0x1e9   : > { %2363 = vmatprep.subr.bf16.mxu0 %v5329_v54  ;;  %2809 = vmatprep.subr.bf16.mxu1 %v5329_v54  ;;  %v5368_v54 = vld [vmem:[#allocation49_spill] sm:$0xff] }
 0x1ec   : > { %2364 = vmatpush1.bf16.msra.mxu0 %v5330_v57  ;;  %2810 = vmatpush1.bf16.msra.mxu1 %v5330_v57  ;;  %v5369_v57 = vld [vmem:[#allocation50_spill] sm:$0xff] }
 0x1ed   : > { %2405 = vmatprep.subr.bf16.mxu0 %v5331_v58  ;;  %2842 = vmatprep.subr.bf16.mxu1 %v5331_v58  ;;  %v5370_v58 = vld [vmem:[#allocation51_spill] sm:$0xff] }
 0x1ef   : > { %2382 = vmatmul.mubr.bf16.vlgmr.msra.gmra.mrb[4].mxu0 %v4613_v56  ;;  %2828 = vmatmul.mubr.bf16.vlgmr.msra.gmra.mrb[4].mxu1 %v4728_v41  ;;  %v5356_v56 = vld [vmem:[#allocation37_spill] sm:$0xff]  ;;  %v5357_v41 = vld [vmem:[#allocation38_spill] sm:$0xff] }
 0x1f0   : > { %2406 = vmatpush1.bf16.msra.mxu0 %v5332_v60  ;;  %2843 = vmatpush1.bf16.msra.mxu1 %v5332_v60  ;;  %v5372_v60 = vld [vmem:[#allocation53_spill] sm:$0xff] }
 0x1f1   : > { %2407 = vmatprep.subr.bf16.mxu0 %v5333_v61  ;;  %2844 = vmatprep.subr.bf16.mxu1 %v5333_v61  ;;  %v5373_v61 = vld [vmem:[#allocation54_spill] sm:$0xff] }
 0x1f2   : > { %2437 = vmatprep.mubr.bf16.mxu0 %v5278_v55  ;;  %2874 = vmatprep.mubr.bf16.mxu1 %v5278_v55 }
 0x1f4   : > { %2408 = vmatpush1.bf16.msra.mxu0 %v5334_v62  ;;  %2845 = vmatpush1.bf16.msra.mxu1 %v5334_v62  ;;  %v2937_v62 = vshrl.u32 %v5043_v24, 16 }
 0x1f5   : > { %2409 = vmatprep.subr.bf16.mxu0 %v5335_v63  ;;  %2846 = vmatprep.subr.bf16.mxu1 %v5335_v63  ;;  %v2940_v63 = vshll.u32 %v5043_v24, 16 }
 0x1f8   : > { %2410 = vmatpush1.bf16.msra.mxu0 %v5336_v0  ;;  %2847 = vmatpush1.bf16.msra.mxu1 %v5336_v0  ;;  %v5374_v0 = vld [vmem:[#allocation55_spill] sm:$0xff] }
 0x1f9   : > { %2411 = vmatprep.subr.bf16.mxu0 %v5337_v1  ;;  %2848 = vmatprep.subr.bf16.mxu1 %v5337_v1  ;;  %v5375_v1 = vld [vmem:[#allocation56_spill] sm:$0xff] }
 0x1fc   : > { %2412 = vmatpush1.bf16.msra.mxu0 %v5338_v3  ;;  %2849 = vmatpush1.bf16.msra.mxu1 %v5338_v3  ;;  %v2939_v3 = vrot.slane %v2937_v62, 2 }
 0x1fd   : > { %2413 = vmatprep.subr.bf16.mxu0 %v5339_v4  ;;  %2850 = vmatprep.subr.bf16.mxu1 %v5339_v4  ;;  %v2942_v4 = vrot.slane %v2940_v63, 3 }
 0x200   : > { %2414 = vmatpush1.bf16.msra.mxu0 %v5340_v5  ;;  %2851 = vmatpush1.bf16.msra.mxu1 %v5340_v5  ;;  %v2943_v5 = vor.u32 %v2942_v4, %v2939_v3 }
 0x201   : > { %2415 = vmatprep.subr.bf16.mxu0 %v5341_v6  ;;  %2852 = vmatprep.subr.bf16.mxu1 %v5341_v6  ;;  %v2998_v6 = vlaneseq }
 0x202   : > { %v5013_v7 = vpop.f32.mrb[0].mxu0  ;;  %v5015_v8 = vpop.f32.mrb[0].mxu1 }
 0x203   : > { %v2118_v9 = vmax.f32 %v5013_v7, %v5015_v8  ;;  %v5019_v10 = vpop.f32.mrb[1].mxu0  ;;  %v5021_v11 = vpop.f32.mrb[1].mxu1 }
 0x204   : > { %v2119_v12 = vmax.f32 %v5019_v10, %v5021_v11  ;;  %v5025_v15 = vpop.f32.mrb[2].mxu0  ;;  %v5027_v16 = vpop.f32.mrb[2].mxu1  ;;  %2416 = vmatpush1.bf16.msra.mxu0 %v5342_v17  ;;  %2853 = vmatpush1.bf16.msra.mxu1 %v5342_v17  ;;  %v2999_v17 = vshrl.u32 %v2998_v6, 7 }
 0x205   : > { %v2120_v18 = vmax.f32 %v5025_v15, %v5027_v16  ;;  %v5033_v19 = vpop.f32.mrb[3].mxu0  ;;  %v5035_v20 = vpop.f32.mrb[3].mxu1  ;;  %2417 = vmatprep.subr.bf16.mxu0 %v5343_v21  ;;  %2854 = vmatprep.subr.bf16.mxu1 %v5343_v21 }
 0x206   : > { %v2121_v22 = vmax.f32 %v5033_v19, %v5035_v20  ;;  %v3000_v21 = vsub.s32 0, %v2999_v17  ;;  %v3004_v24 = vsub.s32 1, %v2999_v17  ;;  %v3036_v20 = vld [vmem:[%s321_s26 + $0x8] sm:$0x33] }
 0x208   : > { %2418 = vmatpush1.bf16.msra.mxu0 %v5344_v25  ;;  %2855 = vmatpush1.bf16.msra.mxu1 %v5344_v25 }
 0x209   : > { %2419 = vmatprep.subr.bf16.mxu0 %v5345_v26  ;;  %2856 = vmatprep.subr.bf16.mxu1 %v5345_v26  ;;  %v3001_v26 = vrot.slane %v2996_v23, %v3000_v21 }
 0x20c   : > { %2420 = vmatpush1.bf16.msra.mxu0 %v5346_v32  ;;  %2857 = vmatpush1.bf16.msra.mxu1 %v5346_v32  ;;  %v3005_v32 = vrot.slane %v2996_v23, %v3004_v24 }
 0x20d   : > { %2461 = vmatprep.subr.bf16.mxu0 %v5347_v33  ;;  %2889 = vmatprep.subr.bf16.mxu1 %v5347_v33 }
 0x20f   : > { %2438 = vmatmul.mubr.bf16.vlgmr.msra.gmra.mrb[4].mxu0 %v2403_v28  ;;  %2875 = vmatmul.mubr.bf16.vlgmr.msra.gmra.mrb[4].mxu1 %v2459_v29 }
 0x210   : > { %2462 = vmatpush1.bf16.msra.mxu0 %v5348_v34  ;;  %2890 = vmatpush1.bf16.msra.mxu1 %v5348_v34 }
 0x211   : > { %2463 = vmatprep.subr.bf16.mxu0 %v5349_v35  ;;  %2891 = vmatprep.subr.bf16.mxu1 %v5349_v35 }
 0x212   : > { %2493 = vmatprep.mubr.bf16.mxu0 %v5278_v55  ;;  %2921 = vmatprep.mubr.bf16.mxu1 %v5278_v55 }
 0x214   : > { %2464 = vmatpush1.bf16.msra.mxu0 %v5350_v36  ;;  %2892 = vmatpush1.bf16.msra.mxu1 %v5350_v36 }
 0x215   : > { %2465 = vmatprep.subr.bf16.mxu0 %v5351_v37  ;;  %2893 = vmatprep.subr.bf16.mxu1 %v5351_v37 }
 0x218   : > { %2466 = vmatpush1.bf16.msra.mxu0 %v5352_v38  ;;  %2894 = vmatpush1.bf16.msra.mxu1 %v5352_v38 }
 0x219   : > { %2467 = vmatprep.subr.bf16.mxu0 %v5353_v39  ;;  %2895 = vmatprep.subr.bf16.mxu1 %v5353_v39 }
 0x21c   : > { %2468 = vmatpush1.bf16.msra.mxu0 %v5354_v43  ;;  %2896 = vmatpush1.bf16.msra.mxu1 %v5354_v43 }
 0x21d   : > { %2469 = vmatprep.subr.bf16.mxu0 %v5355_v52  ;;  %2897 = vmatprep.subr.bf16.mxu1 %v5355_v52 }
 0x220   : > { %2470 = vmatpush1.bf16.msra.mxu0 %v5356_v56  ;;  %2898 = vmatpush1.bf16.msra.mxu1 %v5356_v56 }
 0x221   : > { %2471 = vmatprep.subr.bf16.mxu0 %v5357_v41  ;;  %2899 = vmatprep.subr.bf16.mxu1 %v5357_v41 }
 0x224   : > { %2472 = vmatpush1.bf16.msra.mxu0 %v5358_v27  ;;  %2900 = vmatpush1.bf16.msra.mxu1 %v5358_v27 }
 0x225   : > { %2473 = vmatprep.subr.bf16.mxu0 %v5359_v13  ;;  %2901 = vmatprep.subr.bf16.mxu1 %v5359_v13 }
 0x228   : > { %2474 = vmatpush1.bf16.msra.mxu0 %v5360_v45  ;;  %2902 = vmatpush1.bf16.msra.mxu1 %v5360_v45 }
 0x229   : > { %2475 = vmatprep.subr.bf16.mxu0 %v5361_v2  ;;  %2903 = vmatprep.subr.bf16.mxu1 %v5361_v2 }
 0x22c   : > { %2476 = vmatpush1.bf16.msra.mxu0 %v5362_v47  ;;  %2904 = vmatpush1.bf16.msra.mxu1 %v5362_v47 }
 0x22d   : > { %2517 = vmatprep.subr.bf16.mxu0 %v5363_v48  ;;  %2945 = vmatprep.subr.bf16.mxu1 %v5363_v48 }
 0x22f   : > { %2494 = vmatmul.mubr.bf16.vlgmr.msra.gmra.mrb[4].mxu0 %v2459_v29  ;;  %2922 = vmatmul.mubr.bf16.vlgmr.msra.gmra.mrb[4].mxu1 %v2515_v46 }
 0x230   : > { %2518 = vmatpush1.bf16.msra.mxu0 %v5364_v49  ;;  %2946 = vmatpush1.bf16.msra.mxu1 %v5364_v49 }
 0x231   : > { %2519 = vmatprep.subr.bf16.mxu0 %v5365_v50  ;;  %2947 = vmatprep.subr.bf16.mxu1 %v5365_v50 }
 0x232   : > { %2549 = vmatprep.mubr.bf16.mxu0 %v5278_v55  ;;  %2977 = vmatprep.mubr.bf16.mxu1 %v5278_v55  ;;  %v5371_v55 = vld [vmem:[#allocation52_spill] sm:$0xff] }
 0x234   : > { %2520 = vmatpush1.bf16.msra.mxu0 %v5366_v51  ;;  %2948 = vmatpush1.bf16.msra.mxu1 %v5366_v51 }
 0x235   : > { %2521 = vmatprep.subr.bf16.mxu0 %v5367_v53  ;;  %2949 = vmatprep.subr.bf16.mxu1 %v5367_v53 }
 0x238   : > { %2522 = vmatpush1.bf16.msra.mxu0 %v5368_v54  ;;  %2950 = vmatpush1.bf16.msra.mxu1 %v5368_v54 }
 0x239   : > { %2523 = vmatprep.subr.bf16.mxu0 %v5369_v57  ;;  %2951 = vmatprep.subr.bf16.mxu1 %v5369_v57 }
 0x23c   : > { %2524 = vmatpush1.bf16.msra.mxu0 %v5370_v58  ;;  %2952 = vmatpush1.bf16.msra.mxu1 %v5370_v58 }
 0x23d   : > { %2525 = vmatprep.subr.bf16.mxu0 %v5371_v55  ;;  %2953 = vmatprep.subr.bf16.mxu1 %v5371_v55 }
 0x240   : > { %2526 = vmatpush1.bf16.msra.mxu0 %v5372_v60  ;;  %2954 = vmatpush1.bf16.msra.mxu1 %v5372_v60 }
 0x241   : > { %2527 = vmatprep.subr.bf16.mxu0 %v5373_v61  ;;  %2955 = vmatprep.subr.bf16.mxu1 %v5373_v61 }
 0x244   : > { %2528 = vmatpush1.bf16.msra.mxu0 %v5374_v0  ;;  %2956 = vmatpush1.bf16.msra.mxu1 %v5374_v0 }
 0x245   : > { %2529 = vmatprep.subr.bf16.mxu0 %v5375_v1  ;;  %2957 = vmatprep.subr.bf16.mxu1 %v5375_v1 }
 0x248   : > { %2530 = vmatpush1.bf16.msra.mxu0 %v4710_v42  ;;  %2958 = vmatpush1.bf16.msra.mxu1 %v4710_v42 }
 0x249   : > { %2531 = vmatprep.subr.bf16.mxu0 %v4717_v44  ;;  %2959 = vmatprep.subr.bf16.mxu1 %v4717_v44 }
 0x24c   : > { %2532 = vmatpush1.bf16.msra.mxu0 %v4724_v40  ;;  %2960 = vmatpush1.bf16.msra.mxu1 %v4724_v40 }
 0x24f   : > { %2550 = vmatmul.mubr.bf16.vlgmr.msra.gmra.mrb[4].mxu0 %v2515_v46  ;;  %2978 = vmatmul.mubr.bf16.vlgmr.msra.gmra.mrb[4].mxu1 %v2943_v5 }
 0x322   : > { %v2551_v42 = vpop.f32.mrb[4].mxu0  ;;  %v2979_v25 = vpop.f32.mrb[4].mxu1 }
 0x323   : > { %v2564_v44 = vmax.f32 %v2118_v9, %v2551_v42  ;;  %v2553_v28 = vpop.f32.mrb[5].mxu0  ;;  %v2981_v40 = vpop.f32.mrb[5].mxu1 }
 0x324   : > { %v2565_v29 = vmax.f32 %v2119_v12, %v2553_v28  ;;  %v2555_v33 = vpop.f32.mrb[6].mxu0  ;;  %v2983_v34 = vpop.f32.mrb[6].mxu1 }
 0x325   : > { %v2992_v35 = vmax.f32 %v2564_v44, %v2979_v25  ;;  %v2566_v36 = vmax.f32 %v2120_v18, %v2555_v33  ;;  %v2557_v37 = vpop.f32.mrb[7].mxu0  ;;  %v2985_v38 = vpop.f32.mrb[7].mxu1 }
 0x326   : > { %v2993_v7 = vmax.f32 %v2565_v29, %v2981_v40  ;;  %v2567_v8 = vmax.f32 %v2121_v22, %v2557_v37 }
 0x327   : > { %v3008_v9 = vadd.f32 %v3001_v26, %v2992_v35  ;;  %v2994_v39 = vmax.f32 %v2566_v36, %v2983_v34 }
 0x328   : > { %v3009_v10 = vadd.f32 %v3005_v32, %v2993_v7  ;;  %v2995_v11 = vmax.f32 %v2567_v8, %v2985_v38 }
 0x329   : > { %v3012_v12 = vmax.f32 %v3008_v9, 0.0  ;;  %v3010_v43 = vadd.f32 %v3001_v26, %v2994_v39 }
 0x32a   : > { %v3013_v52 = vmax.f32 %v3009_v10, 0.0  ;;  %v3011_v56 = vadd.f32 %v3005_v32, %v2995_v11 }
 0x32b   : > { %v3014_v15 = vmax.f32 %v3010_v43, 0.0 }
 0x32c   : > { %v3316_v16 = vpack.c.bf16 %v3013_v52, %v3012_v12  ;;  %v3015_v18 = vmax.f32 %v3011_v56, 0.0 }
 0x32e   : > { %3028 = vst [vmem:[%s321_s26] sm:$0xff] %v3316_v16  ;;  %v3317_v19 = vpack.c.bf16 %v3015_v18, %v3014_v15 }
 0x330   : > { %v3037_v22 = vsel %vm3035_vm6, %v3317_v19, %v3036_v20 }
 0x331   : > { %3038 = vst [vmem:[%s321_s26 + $0x8] sm:$0x33] %v3037_v22 }
 0x338   : > { %v3046_v41 = vld [vmem:[%s321_s26 + $0x8] sm:$0xee] }
 0x339   : > { %v3047_v30 = vsel %vm3045_vm13, 0, %v3046_v41 }
 0x33a   : > { %3048 = vst [vmem:[%s321_s26 + $0x8] sm:$0xee] %v3047_v30 }
 0x33b PF: > { %s16_s21 = sadd.s32 1, %s3723_s21  }
 0x33c   : > { %p13_p4 = scmp.ge.s32.totalorder %s16_s21, 4  }
 0x33e   :  { %15 = sbr.rel (!%p13_p4) target bundleno = 1 (0x1), region = 83 }

// kernel: forward.7
= control target key start
LH: loop header
LB: loop body
LE: loop exit
PB: predicated region body
PF: predicated region fallthrough
CT: control target
= control target key end

     0   :  { %s3940_s30 = smov 0   ;;  %s4992_s0 = inlined_call_operand.vmem [shape: bf16[16,2304], index: 0, kind: input, shape index: {}]   ;;  %s4993_s1 = inlined_call_operand.vmem [shape: bf16[2304,256], index: 1, kind: input, shape index: {}]   ;;  %s4994_s2 = inlined_call_operand.vmem [shape: f32[1,256], index: 2, kind: input, shape index: {}]   ;;  %s4995_s3 = inlined_call_operand.vmem [shape: bf16[256,128], index: 3, kind: input, shape index: {}]   ;;  %s4996_s4 = inlined_call_operand.vmem [shape: f32[1,128], index: 4, kind: input, shape index: {}]   ;;  %s4997_s5 = inlined_call_operand.vmem [shape: bf16[128,64], index: 5, kind: input, shape index: {}]   ;;  %s4998_s6 = inlined_call_operand.vmem [shape: f32[1,64], index: 6, kind: input, shape index: {}]   ;;  %s4999_s7 = inlined_call_operand.vmem [shape: bf16[64,128], index: 7, kind: input, shape index: {}]   ;;  %s5000_s8 = inlined_call_operand.vmem [shape: f32[1,128], index: 8, kind: input, shape index: {}]   ;;  %s5001_s9 = inlined_call_operand.vmem [shape: f32[16,128], index: 9, kind: output, shape index: {}]  }
   0x1 LB: > { %s2944_s10 = sadd.s32 4294967295, %s3886_s30   ;;  %p2948_p0 = scmp.ge.s32.totalorder %s3886_s30, 1  ;;  %s3886_s30 = sphi %s3940_s30, %s19_s30  }
   0x2   : > { %p287_p1 = scmp.lt.s32.totalorder %s3886_s30, 3 }
   0x4   : > { %p288_p2 = pnand %p2948_p0, %p287_p1 }
   0x5   : > { %v3402_v0 = vld [vmem:[%s4993_s1 + $0x4] ss:$8 sps:$4 sm:$0xff] (!%p288_p2)   ;;  %v3406_v2 = vld [vmem:[%s4993_s1] ss:$8 sps:$4 sm:$0xff] (!%p288_p2)   ;;  %v3408_v4 = vld [vmem:[%s4993_s1 + $0x14] ss:$8 sps:$4 sm:$0xff] (!%p288_p2)  }
   0x6   : > { %291 = sbr.rel (%p288_p2) target bundleno = 1201 (0x4b1), region = 56  ;;  %v3404_v1 = vld [vmem:[%s4993_s1 + $0x404] ss:$8 sps:$4 sm:$0xff] (!%p288_p2)   ;;  %2144 = vmatprep.subr.bf16.mxu1 (!%p288_p2), %v3402_v0  ;;  %v3407_v3 = vld [vmem:[%s4993_s1 + $0x400] ss:$8 sps:$4 sm:$0xff] (!%p288_p2)   ;;  %p322_p3 = scmp.lt.s32.totalorder (!%p288_p2), %s2944_s10, 1 }
   0x7   : > { %2308 = vmatprep.subr.bf16.mxu0 (!%p288_p2), %v3404_v1  ;;  %2145 = vmatpush1.bf16.msra.mxu1 (!%p288_p2), %v3406_v2  ;;  %v3410_v5 = vld [vmem:[%s4993_s1 + $0x414] ss:$8 sps:$4 sm:$0xff] (!%p288_p2)   ;;  %v3412_v6 = vld [vmem:[%s4993_s1 + $0x10] ss:$8 sps:$4 sm:$0xff] (!%p288_p2)   ;;  %v3414_v8 = vld [vmem:[%s4993_s1 + $0x24] ss:$8 sps:$4 sm:$0xff] (!%p288_p2)  }
   0x8   : > { %2309 = vmatpush1.bf16.msra.mxu0 (!%p288_p2), %v3407_v3  ;;  %2146 = vmatprep.subr.bf16.mxu1 (!%p288_p2), %v3408_v4  ;;  %v3413_v7 = vld [vmem:[%s4993_s1 + $0x410] ss:$8 sps:$4 sm:$0xff] (!%p288_p2)   ;;  %v3416_v9 = vld [vmem:[%s4993_s1 + $0x424] ss:$8 sps:$4 sm:$0xff] (!%p288_p2)   ;;  %v3418_v10 = vld [vmem:[%s4993_s1 + $0x20] ss:$8 sps:$4 sm:$0xff] (!%p288_p2)  }
   0x9   : > { %2310 = vmatprep.subr.bf16.mxu0 (!%p288_p2), %v3410_v5  ;;  %v3419_v11 = vld [vmem:[%s4993_s1 + $0x420] ss:$8 sps:$4 sm:$0xff] (!%p288_p2)   ;;  %v3420_v12 = vld [vmem:[%s4993_s1 + $0x34] ss:$8 sps:$4 sm:$0xff] (!%p288_p2)   ;;  %v3424_v14 = vld [vmem:[%s4993_s1 + $0x30] ss:$8 sps:$4 sm:$0xff] (!%p288_p2)  }
   0xa   : > { %v3422_v13 = vld [vmem:[%s4993_s1 + $0x434] ss:$8 sps:$4 sm:$0xff] (!%p288_p2)   ;;  %v3425_v15 = vld [vmem:[%s4993_s1 + $0x430] ss:$8 sps:$4 sm:$0xff] (!%p288_p2)   ;;  %v3426_v16 = vld [vmem:[%s4993_s1 + $0x44] ss:$8 sps:$4 sm:$0xff] (!%p288_p2)  }
   0xb   : > { %2147 = vmatpush1.bf16.msra.mxu1 (!%p288_p2), %v3412_v6  ;;  %v3428_v17 = vld [vmem:[%s4993_s1 + $0x444] ss:$8 sps:$4 sm:$0xff] (!%p288_p2)   ;;  %v3430_v18 = vld [vmem:[%s4993_s1 + $0x40] ss:$8 sps:$4 sm:$0xff] (!%p288_p2)   ;;  %v3432_v20 = vld [vmem:[%s4993_s1 + $0x54] ss:$8 sps:$4 sm:$0xff] (!%p288_p2)  }
   0xc   : > { %2311 = vmatpush1.bf16.msra.mxu0 (!%p288_p2), %v3413_v7  ;;  %2148 = vmatprep.subr.bf16.mxu1 (!%p288_p2), %v3414_v8  ;;  %v3431_v19 = vld [vmem:[%s4993_s1 + $0x440] ss:$8 sps:$4 sm:$0xff] (!%p288_p2)   ;;  %v3434_v21 = vld [vmem:[%s4993_s1 + $0x454] ss:$8 sps:$4 sm:$0xff] (!%p288_p2)   ;;  %v3436_v22 = vld [vmem:[%s4993_s1 + $0x50] ss:$8 sps:$4 sm:$0xff] (!%p288_p2)  }
   0xd   : > { %2312 = vmatprep.subr.bf16.mxu0 %v3416_v9  ;;  %v3437_v23 = vld [vmem:[%s4993_s1 + $0x450] ss:$8 sps:$4 sm:$0xff]   ;;  %v3438_v24 = vld [vmem:[%s4993_s1 + $0x64] ss:$8 sps:$4 sm:$0xff]   ;;  %v3442_v26 = vld [vmem:[%s4993_s1 + $0x60] ss:$8 sps:$4 sm:$0xff]  }
   0xe   : > { %v3440_v25 = vld [vmem:[%s4993_s1 + $0x464] ss:$8 sps:$4 sm:$0xff]   ;;  %v3443_v27 = vld [vmem:[%s4993_s1 + $0x460] ss:$8 sps:$4 sm:$0xff]   ;;  %v3444_v28 = vld [vmem:[%s4993_s1 + $0x74] ss:$8 sps:$4 sm:$0xff]  }
   0xf   : > { %2149 = vmatpush1.bf16.msra.mxu1 %v3418_v10  ;;  %v3446_v29 = vld [vmem:[%s4993_s1 + $0x474] ss:$8 sps:$4 sm:$0xff]   ;;  %v3448_v30 = vld [vmem:[%s4993_s1 + $0x70] ss:$8 sps:$4 sm:$0xff]   ;;  %v3450_v32 = vld [vmem:[%s4993_s1 + $0x84] ss:$8 sps:$4 sm:$0xff]  }
  0x10   : > { %2313 = vmatpush1.bf16.msra.mxu0 %v3419_v11  ;;  %2150 = vmatprep.subr.bf16.mxu1 %v3420_v12  ;;  %v3449_v31 = vld [vmem:[%s4993_s1 + $0x470] ss:$8 sps:$4 sm:$0xff]   ;;  %v3452_v33 = vld [vmem:[%s4993_s1 + $0x484] ss:$8 sps:$4 sm:$0xff]   ;;  %v3454_v34 = vld [vmem:[%s4993_s1 + $0x80] ss:$8 sps:$4 sm:$0xff]  }
  0x11   : > { %2314 = vmatprep.subr.bf16.mxu0 %v3422_v13  ;;  %v3455_v35 = vld [vmem:[%s4993_s1 + $0x480] ss:$8 sps:$4 sm:$0xff]   ;;  %s5003_s10 = smov (!%p322_p3, %s2944_s10), 1  ;;  %v3456_v36 = vld [vmem:[%s4993_s1 + $0x94] ss:$8 sps:$4 sm:$0xff]   ;;  %vm3889_vm0 = vmmov 0  }
  0x12   : > { %v3458_v37 = vld [vmem:[%s4993_s1 + $0x494] ss:$8 sps:$4 sm:$0xff]   ;;  %v3460_v38 = vld [vmem:[%s4993_s1 + $0x90] ss:$8 sps:$4 sm:$0xff]   ;;  %s3391_s13 = smul.u32 72, %s5003_s10  ;;  %vm2846_vm1 = vcmask 523264  }
  0x13   : > { %2151 = vmatpush1.bf16.msra.mxu1 %v3424_v14  ;;  %v3461_v39 = vld [vmem:[%s4993_s1 + $0x490] ss:$8 sps:$4 sm:$0xff]   ;;  %v3462_v40 = vld [vmem:[%s4993_s1 + $0xa4] ss:$8 sps:$4 sm:$0xff]   ;;  %v3466_v42 = vld [vmem:[%s4993_s1 + $0xa0] ss:$8 sps:$4 sm:$0xff]  }
  0x14   : > { %2315 = vmatpush1.bf16.msra.mxu0 %v3425_v15  ;;  %2152 = vmatprep.subr.bf16.mxu1 %v3426_v16  ;;  %v3464_v41 = vld [vmem:[%s4993_s1 + $0x4a4] ss:$8 sps:$4 sm:$0xff]   ;;  %v3467_v43 = vld [vmem:[%s4993_s1 + $0x4a0] ss:$8 sps:$4 sm:$0xff]   ;;  %s4090_s26 = scalar_lea.vmem %s4992_s0, %s3391_s13  ;;  %v3468_v44 = vld [vmem:[%s4993_s1 + $0xb4] ss:$8 sps:$4 sm:$0xff]  }
  0x15   : > { %2316 = vmatprep.subr.bf16.mxu0 %v3428_v17  ;;  %v3470_v45 = vld [vmem:[%s4993_s1 + $0x4b4] ss:$8 sps:$4 sm:$0xff]   ;;  %v332_v46 = vld [vmem:[%s4090_s26] sm:$0xff]  ;;  %v3472_v47 = vld [vmem:[%s4993_s1 + $0xb0] ss:$8 sps:$4 sm:$0xff]   ;;  %s2950_s11 = sshll.u32 %s5003_s10, 3 }
  0x16   : > { %v2952_v48 = vcombine.high %v332_v46, %v332_v46  ;;  %v3473_v49 = vld [vmem:[%s4993_s1 + $0x4b0] ss:$8 sps:$4 sm:$0xff]   ;;  %v336_v50 = vld [vmem:[%s4090_s26 + $0x20] sm:$0xff]  ;;  %v3480_v56 = vld [vmem:[%s4993_s1 + $0xd4] ss:$8 sps:$4 sm:$0xff]   ;;  %v2951_v6 = vcombine.low %v332_v46, %v332_v46  ;;  %s330_s16 = scalar_lea.vmem %s5001_s9, %s2950_s11 }
  0x17   : > { %2153 = vmatpush1.bf16.msra.mxu1 %v3430_v18  ;;  %v3474_v51 = vld [vmem:[%s4993_s1 + $0xc4] ss:$8 sps:$4 sm:$0xff]   ;;  %v2960_v53 = vcombine.high %v336_v50, %v336_v50  ;;  %v3478_v54 = vld [vmem:[%s4993_s1 + $0xc0] ss:$8 sps:$4 sm:$0xff]   ;;  %v3482_v57 = vld [vmem:[%s4993_s1 + $0x4d4] ss:$8 sps:$4 sm:$0xff]   ;;  %v2959_v7 = vcombine.low %v336_v50, %v336_v50 }
  0x18   : > { %2317 = vmatpush1.bf16.msra.mxu0 %v3431_v19  ;;  %2154 = vmatprep.subr.bf16.mxu1 %v3432_v20  ;;  %v3476_v52 = vld [vmem:[%s4993_s1 + $0x4c4] ss:$8 sps:$4 sm:$0xff]   ;;  %v3479_v55 = vld [vmem:[%s4993_s1 + $0x4c0] ss:$8 sps:$4 sm:$0xff]   ;;  %v3484_v58 = vld [vmem:[%s4993_s1 + $0xd0] ss:$8 sps:$4 sm:$0xff]  }
  0x19   : > { %2318 = vmatprep.subr.bf16.mxu0 %v3434_v21  ;;  %2176 = vmatprep.mubr.bf16.mxu1 %v2952_v48  ;;  %v3485_v59 = vld [vmem:[%s4993_s1 + $0x4d0] ss:$8 sps:$4 sm:$0xff]   ;;  %v3486_v60 = vld [vmem:[%s4993_s1 + $0xe4] ss:$8 sps:$4 sm:$0xff]   ;;  %v3490_v62 = vld [vmem:[%s4993_s1 + $0xe0] ss:$8 sps:$4 sm:$0xff]  }
  0x1a   : > { %2340 = vmatprep.mubr.bf16.mxu0 %v2960_v53  ;;  %v3488_v61 = vld [vmem:[%s4993_s1 + $0x4e4] ss:$8 sps:$4 sm:$0xff]   ;;  %v3491_v63 = vld [vmem:[%s4993_s1 + $0x4e0] ss:$8 sps:$4 sm:$0xff]   ;;  %v3492_v0 = vld [vmem:[%s4993_s1 + $0xf4] ss:$8 sps:$4 sm:$0xff]  }
  0x1b   : > { %2155 = vmatpush1.bf16.msra.mxu1 %v3436_v22  ;;  %v3494_v1 = vld [vmem:[%s4993_s1 + $0x4f4] ss:$8 sps:$4 sm:$0xff]   ;;  %v3496_v2 = vld [vmem:[%s4993_s1 + $0xf0] ss:$8 sps:$4 sm:$0xff]   ;;  %v3502_v4 = vld [vmem:[%s4993_s1 + $0x104] ss:$8 sps:$4 sm:$0xff]  }
  0x1c   : > { %2319 = vmatpush1.bf16.msra.mxu0 %v3437_v23  ;;  %2156 = vmatprep.subr.bf16.mxu1 %v3438_v24  ;;  %v3497_v3 = vld [vmem:[%s4993_s1 + $0x4f0] ss:$8 sps:$4 sm:$0xff]   ;;  %v3507_v5 = vld [vmem:[%s4993_s1 + $0x504] ss:$8 sps:$4 sm:$0xff]   ;;  %v3500_v8 = vld [vmem:[%s4993_s1 + $0x100] ss:$8 sps:$4 sm:$0xff]  }
  0x1d   : > { %2320 = vmatprep.subr.bf16.mxu0 %v3440_v25  ;;  %v3505_v9 = vld [vmem:[%s4993_s1 + $0x500] ss:$8 sps:$4 sm:$0xff]   ;;  %v3510_v10 = vld [vmem:[%s4993_s1 + $0x114] ss:$8 sps:$4 sm:$0xff]   ;;  %v3508_v12 = vld [vmem:[%s4993_s1 + $0x110] ss:$8 sps:$4 sm:$0xff]  }
  0x1e   : > { %v3513_v11 = vld [vmem:[%s4993_s1 + $0x514] ss:$8 sps:$4 sm:$0xff]   ;;  %v3511_v13 = vld [vmem:[%s4993_s1 + $0x510] ss:$8 sps:$4 sm:$0xff]   ;;  %v3516_v14 = vld [vmem:[%s4993_s1 + $0x124] ss:$8 sps:$4 sm:$0xff]  }
  0x1f   : > { %2157 = vmatpush1.bf16.msra.mxu1 %v3442_v26  ;;  %v3519_v15 = vld [vmem:[%s4993_s1 + $0x524] ss:$8 sps:$4 sm:$0xff]   ;;  %v3514_v16 = vld [vmem:[%s4993_s1 + $0x120] ss:$8 sps:$4 sm:$0xff]   ;;  %v3522_v18 = vld [vmem:[%s4993_s1 + $0x134] ss:$8 sps:$4 sm:$0xff]  }
  0x20   : > { %2321 = vmatpush1.bf16.msra.mxu0 %v3443_v27  ;;  %2158 = vmatprep.subr.bf16.mxu1 %v3444_v28  ;;  %v3517_v17 = vld [vmem:[%s4993_s1 + $0x520] ss:$8 sps:$4 sm:$0xff]   ;;  %v3525_v19 = vld [vmem:[%s4993_s1 + $0x534] ss:$8 sps:$4 sm:$0xff]   ;;  %v3520_v20 = vld [vmem:[%s4993_s1 + $0x130] ss:$8 sps:$4 sm:$0xff]  }
  0x21   : > { %2322 = vmatprep.subr.bf16.mxu0 %v3446_v29  ;;  %v3523_v21 = vld [vmem:[%s4993_s1 + $0x530] ss:$8 sps:$4 sm:$0xff]   ;;  %v3528_v22 = vld [vmem:[%s4993_s1 + $0x144] ss:$8 sps:$4 sm:$0xff]   ;;  %v3526_v24 = vld [vmem:[%s4993_s1 + $0x140] ss:$8 sps:$4 sm:$0xff]  }
  0x22   : > { %v3531_v23 = vld [vmem:[%s4993_s1 + $0x544] ss:$8 sps:$4 sm:$0xff]   ;;  %v3529_v25 = vld [vmem:[%s4993_s1 + $0x540] ss:$8 sps:$4 sm:$0xff]   ;;  %v3534_v26 = vld [vmem:[%s4993_s1 + $0x154] ss:$8 sps:$4 sm:$0xff]  }
  0x23   : > { %2159 = vmatpush1.bf16.msra.mxu1 %v3448_v30  ;;  %v3537_v27 = vld [vmem:[%s4993_s1 + $0x554] ss:$8 sps:$4 sm:$0xff]   ;;  %v3532_v28 = vld [vmem:[%s4993_s1 + $0x150] ss:$8 sps:$4 sm:$0xff]   ;;  %v3540_v30 = vld [vmem:[%s4993_s1 + $0x164] ss:$8 sps:$4 sm:$0xff]  }
  0x24   : > { %2323 = vmatpush1.bf16.msra.mxu0 %v3449_v31  ;;  %2160 = vmatprep.subr.bf16.mxu1 %v3450_v32  ;;  %v3535_v29 = vld [vmem:[%s4993_s1 + $0x550] ss:$8 sps:$4 sm:$0xff]   ;;  %v3543_v31 = vld [vmem:[%s4993_s1 + $0x564] ss:$8 sps:$4 sm:$0xff]   ;;  %v3558_v46 = vld [vmem:[%s4993_s1 + $0x194] ss:$8 sps:$4 sm:$0xff]  }
  0x25   : > { %2324 = vmatprep.subr.bf16.mxu0 %v3452_v33  ;;  %v4233_v32 = vld [vmem:[%s4090_s26 + $0x8] sm:$0xff]  ;;  %v3556_v48 = vld [vmem:[%s4993_s1 + $0x190] ss:$8 sps:$4 sm:$0xff]  }
  0x26   : > { %v3538_v33 = vld [vmem:[%s4993_s1 + $0x160] ss:$8 sps:$4 sm:$0xff]   ;;  %v3564_v50 = vld [vmem:[%s4993_s1 + $0x1a4] ss:$8 sps:$4 sm:$0xff]  }
  0x27   : > { %2161 = vmatpush1.bf16.msra.mxu1 %v3454_v34  ;;  %v3541_v34 = vld [vmem:[%s4993_s1 + $0x560] ss:$8 sps:$4 sm:$0xff]  }
  0x28   : > { %2325 = vmatpush1.bf16.msra.mxu0 %v3455_v35  ;;  %2162 = vmatprep.subr.bf16.mxu1 %v3456_v36  ;;  %v2954_v35 = vcombine.high %v4233_v32, %v4233_v32  ;;  %v4244_v36 = vld [vmem:[%s4090_s26 + $0x28] sm:$0xff] }
  0x29   : > { %2326 = vmatprep.subr.bf16.mxu0 %v3458_v37  ;;  %v3546_v37 = vld [vmem:[%s4993_s1 + $0x174] ss:$8 sps:$4 sm:$0xff]   ;;  %v3565_v53 = vld [vmem:[%s4993_s1 + $0x5a0] ss:$8 sps:$4 sm:$0xff]  }
  0x2b   : > { %2163 = vmatpush1.bf16.msra.mxu1 %v3460_v38  ;;  %v2962_v38 = vcombine.high %v4244_v36, %v4244_v36 }
  0x2c   : > { %2327 = vmatpush1.bf16.msra.mxu0 %v3461_v39  ;;  %2164 = vmatprep.subr.bf16.mxu1 %v3462_v40  ;;  %v3549_v39 = vld [vmem:[%s4993_s1 + $0x574] ss:$8 sps:$4 sm:$0xff]   ;;  %v3544_v40 = vld [vmem:[%s4993_s1 + $0x170] ss:$8 sps:$4 sm:$0xff]  }
  0x2d   : > { %2328 = vmatprep.subr.bf16.mxu0 %v3464_v41  ;;  %v3547_v41 = vld [vmem:[%s4993_s1 + $0x570] ss:$8 sps:$4 sm:$0xff]  }
  0x2f   : > { %2165 = vmatpush1.bf16.msra.mxu1 %v3466_v42  ;;  %v3552_v42 = vld [vmem:[%s4993_s1 + $0x184] ss:$8 sps:$4 sm:$0xff]  }
  0x30   : > { %2329 = vmatpush1.bf16.msra.mxu0 %v3467_v43  ;;  %2166 = vmatprep.subr.bf16.mxu1 %v3468_v44  ;;  %v3555_v43 = vld [vmem:[%s4993_s1 + $0x584] ss:$8 sps:$4 sm:$0xff]   ;;  %v3550_v44 = vld [vmem:[%s4993_s1 + $0x180] ss:$8 sps:$4 sm:$0xff]  }
  0x31   : > { %2330 = vmatprep.subr.bf16.mxu0 %v3470_v45  ;;  %v3553_v45 = vld [vmem:[%s4993_s1 + $0x580] ss:$8 sps:$4 sm:$0xff]  }
  0x33   : > { %2167 = vmatpush1.bf16.msra.mxu1 %v3472_v47  ;;  %v3561_v47 = vld [vmem:[%s4993_s1 + $0x594] ss:$8 sps:$4 sm:$0xff]  }
  0x34   : > { %2331 = vmatpush1.bf16.msra.mxu0 %v3473_v49  ;;  %2168 = vmatprep.subr.bf16.mxu1 %v3474_v51  ;;  %v3559_v49 = vld [vmem:[%s4993_s1 + $0x590] ss:$8 sps:$4 sm:$0xff]   ;;  %v3567_v51 = vld [vmem:[%s4993_s1 + $0x5a4] ss:$8 sps:$4 sm:$0xff]  }
  0x35   : > { %2332 = vmatprep.subr.bf16.mxu0 %v3476_v52  ;;  %v3562_v52 = vld [vmem:[%s4993_s1 + $0x1a0] ss:$8 sps:$4 sm:$0xff]  }
  0x37   : > { %2169 = vmatpush1.bf16.msra.mxu1 %v3478_v54  ;;  %v3570_v54 = vld [vmem:[%s4993_s1 + $0x1b4] ss:$8 sps:$4 sm:$0xff]  }
  0x38   : > { %2333 = vmatpush1.bf16.msra.mxu0 %v3479_v55  ;;  %2170 = vmatprep.subr.bf16.mxu1 %v3480_v56  ;;  %v3573_v55 = vld [vmem:[%s4993_s1 + $0x5b4] ss:$8 sps:$4 sm:$0xff]   ;;  %v3568_v56 = vld [vmem:[%s4993_s1 + $0x1b0] ss:$8 sps:$4 sm:$0xff]  }
  0x39   : > { %2334 = vmatprep.subr.bf16.mxu0 %v3482_v57  ;;  %v3571_v57 = vld [vmem:[%s4993_s1 + $0x5b0] ss:$8 sps:$4 sm:$0xff]  }
  0x3b   : > { %2171 = vmatpush1.bf16.msra.mxu1 %v3484_v58  ;;  %v3576_v58 = vld [vmem:[%s4993_s1 + $0x1c4] ss:$8 sps:$4 sm:$0xff]  }
  0x3c   : > { %2335 = vmatpush1.bf16.msra.mxu0 %v3485_v59  ;;  %2172 = vmatprep.subr.bf16.mxu1 %v3486_v60  ;;  %v3579_v59 = vld [vmem:[%s4993_s1 + $0x5c4] ss:$8 sps:$4 sm:$0xff]   ;;  %v3574_v60 = vld [vmem:[%s4993_s1 + $0x1c0] ss:$8 sps:$4 sm:$0xff]  }
  0x3d   : > { %2336 = vmatprep.subr.bf16.mxu0 %v3488_v61  ;;  %v3577_v61 = vld [vmem:[%s4993_s1 + $0x5c0] ss:$8 sps:$4 sm:$0xff]  }
  0x3f   : > { %2173 = vmatpush1.bf16.msra.mxu1 %v3490_v62  ;;  %v3582_v62 = vld [vmem:[%s4993_s1 + $0x1d4] ss:$8 sps:$4 sm:$0xff]  }
  0x40   : > { %2337 = vmatpush1.bf16.msra.mxu0 %v3491_v63  ;;  %2174 = vmatprep.subr.bf16.mxu1 %v3492_v0  ;;  %v3585_v63 = vld [vmem:[%s4993_s1 + $0x5d4] ss:$8 sps:$4 sm:$0xff]   ;;  %v3580_v0 = vld [vmem:[%s4993_s1 + $0x1d0] ss:$8 sps:$4 sm:$0xff]  }
  0x41   : > { %2338 = vmatprep.subr.bf16.mxu0 %v3494_v1  ;;  %v3583_v1 = vld [vmem:[%s4993_s1 + $0x5d0] ss:$8 sps:$4 sm:$0xff]  }
  0x43   : > { %2175 = vmatpush1.bf16.msra.mxu1 %v3496_v2  ;;  %v3588_v2 = vld [vmem:[%s4993_s1 + $0x1e4] ss:$8 sps:$4 sm:$0xff]  }
  0x44   : > { %2339 = vmatpush1.bf16.msra.mxu0 %v3497_v3  ;;  %2185 = vmatprep.subr.bf16.mxu1 %v3502_v4  ;;  %v3591_v3 = vld [vmem:[%s4993_s1 + $0x5e4] ss:$8 sps:$4 sm:$0xff]   ;;  %v3586_v4 = vld [vmem:[%s4993_s1 + $0x1e0] ss:$8 sps:$4 sm:$0xff]  }
  0x45   : > { %2349 = vmatprep.subr.bf16.mxu0 %v3507_v5  ;;  %v3589_v5 = vld [vmem:[%s4993_s1 + $0x5e0] ss:$8 sps:$4 sm:$0xff]  }
  0x46   : > { %2177 = vmatmul.mubr.bf16.vlgmr.msra.gmra.mrb[0].mxu1 %v2951_v6  ;;  %v3594_v6 = vld [vmem:[%s4993_s1 + $0x1f4] ss:$8 sps:$4 sm:$0xff]  }
  0x47   : > { %2341 = vmatmul.mubr.bf16.vlgmr.msra.gmra.mrb[0].mxu0 %v2959_v7  ;;  %2186 = vmatpush1.bf16.msra.mxu1 %v3500_v8  ;;  %v3597_v7 = vld [vmem:[%s4993_s1 + $0x5f4] ss:$8 sps:$4 sm:$0xff]   ;;  %v3592_v8 = vld [vmem:[%s4993_s1 + $0x1f0] ss:$8 sps:$4 sm:$0xff]  }
  0x48   : > { %2350 = vmatpush1.bf16.msra.mxu0 %v3505_v9  ;;  %2187 = vmatprep.subr.bf16.mxu1 %v3510_v10  ;;  %v3595_v9 = vld [vmem:[%s4993_s1 + $0x5f0] ss:$8 sps:$4 sm:$0xff]   ;;  %v3602_v10 = vld [vmem:[%s4993_s1 + $0x204] ss:$8 sps:$4 sm:$0xff]  }
  0x49   : > { %2351 = vmatprep.subr.bf16.mxu0 %v3513_v11  ;;  %2217 = vmatprep.mubr.bf16.mxu1 %v2954_v35  ;;  %v3607_v11 = vld [vmem:[%s4993_s1 + $0x604] ss:$8 sps:$4 sm:$0xff]   ;;  %v3629_v35 = vld [vmem:[%s4993_s1 + $0x640] ss:$8 sps:$4 sm:$0xff]  }
  0x4a   : > { %2381 = vmatprep.mubr.bf16.mxu0 %v2962_v38  ;;  %v3632_v38 = vld [vmem:[%s4993_s1 + $0x250] ss:$8 sps:$4 sm:$0xff]  }
  0x4b   : > { %2188 = vmatpush1.bf16.msra.mxu1 %v3508_v12  ;;  %v2953_v12 = vcombine.low %v4233_v32, %v4233_v32  ;;  %v3628_v32 = vld [vmem:[%s4993_s1 + $0x244] ss:$8 sps:$4 sm:$0xff]  }
  0x4c   : > { %2352 = vmatpush1.bf16.msra.mxu0 %v3511_v13  ;;  %2189 = vmatprep.subr.bf16.mxu1 %v3516_v14  ;;  %v3600_v13 = vld [vmem:[%s4993_s1 + $0x200] ss:$8 sps:$4 sm:$0xff]   ;;  %v2961_v14 = vcombine.low %v4244_v36, %v4244_v36  ;;  %v3634_v36 = vld [vmem:[%s4993_s1 + $0x254] ss:$8 sps:$4 sm:$0xff]  }
  0x4d   : > { %2353 = vmatprep.subr.bf16.mxu0 %v3519_v15  ;;  %v3605_v15 = vld [vmem:[%s4993_s1 + $0x600] ss:$8 sps:$4 sm:$0xff]  }
  0x4f   : > { %2190 = vmatpush1.bf16.msra.mxu1 %v3514_v16  ;;  %v3610_v16 = vld [vmem:[%s4993_s1 + $0x214] ss:$8 sps:$4 sm:$0xff]  }
  0x50   : > { %2354 = vmatpush1.bf16.msra.mxu0 %v3517_v17  ;;  %2191 = vmatprep.subr.bf16.mxu1 %v3522_v18  ;;  %v3613_v17 = vld [vmem:[%s4993_s1 + $0x614] ss:$8 sps:$4 sm:$0xff]  }
  0x51   : > { %2355 = vmatprep.subr.bf16.mxu0 %v3525_v19  ;;  %v4379_v18 = vld [vmem:[%s4090_s26 + $0x10] sm:$0xff] }
  0x52   : > { %v2956_v19 = vcombine.high %v4379_v18, %v4379_v18 }
  0x53   : > { %2192 = vmatpush1.bf16.msra.mxu1 %v3520_v20  ;;  %v4384_v20 = vld [vmem:[%s4090_s26 + $0x30] sm:$0xff] }
  0x54   : > { %2356 = vmatpush1.bf16.msra.mxu0 %v3523_v21  ;;  %2193 = vmatprep.subr.bf16.mxu1 %v3528_v22  ;;  %v3608_v21 = vld [vmem:[%s4993_s1 + $0x210] ss:$8 sps:$4 sm:$0xff]  }
  0x55   : > { %2357 = vmatprep.subr.bf16.mxu0 %v3531_v23  ;;  %v3611_v22 = vld [vmem:[%s4993_s1 + $0x610] ss:$8 sps:$4 sm:$0xff]   ;;  %v2964_v23 = vcombine.high %v4384_v20, %v4384_v20 }
  0x57   : > { %2194 = vmatpush1.bf16.msra.mxu1 %v3526_v24  ;;  %v3616_v24 = vld [vmem:[%s4993_s1 + $0x224] ss:$8 sps:$4 sm:$0xff]  }
  0x58   : > { %2358 = vmatpush1.bf16.msra.mxu0 %v3529_v25  ;;  %2195 = vmatprep.subr.bf16.mxu1 %v3534_v26  ;;  %v3619_v25 = vld [vmem:[%s4993_s1 + $0x624] ss:$8 sps:$4 sm:$0xff]   ;;  %v3614_v26 = vld [vmem:[%s4993_s1 + $0x220] ss:$8 sps:$4 sm:$0xff]  }
  0x59   : > { %2359 = vmatprep.subr.bf16.mxu0 %v3537_v27  ;;  %v3617_v27 = vld [vmem:[%s4993_s1 + $0x620] ss:$8 sps:$4 sm:$0xff]  }
  0x5b   : > { %2196 = vmatpush1.bf16.msra.mxu1 %v3532_v28  ;;  %v3622_v28 = vld [vmem:[%s4993_s1 + $0x234] ss:$8 sps:$4 sm:$0xff]  }
  0x5c   : > { %2360 = vmatpush1.bf16.msra.mxu0 %v3535_v29  ;;  %2197 = vmatprep.subr.bf16.mxu1 %v3540_v30  ;;  %v3625_v29 = vld [vmem:[%s4993_s1 + $0x634] ss:$8 sps:$4 sm:$0xff]   ;;  %v3620_v30 = vld [vmem:[%s4993_s1 + $0x230] ss:$8 sps:$4 sm:$0xff]  }
  0x5d   : > { %2361 = vmatprep.subr.bf16.mxu0 %v3543_v31  ;;  %v3623_v31 = vld [vmem:[%s4993_s1 + $0x630] ss:$8 sps:$4 sm:$0xff]  }
  0x5f   : > { %2198 = vmatpush1.bf16.msra.mxu1 %v3538_v33  ;;  %v3631_v33 = vld [vmem:[%s4993_s1 + $0x644] ss:$8 sps:$4 sm:$0xff]  }
  0x60   : > { %2362 = vmatpush1.bf16.msra.mxu0 %v3541_v34  ;;  %2199 = vmatprep.subr.bf16.mxu1 %v3546_v37  ;;  %v3626_v34 = vld [vmem:[%s4993_s1 + $0x240] ss:$8 sps:$4 sm:$0xff]   ;;  %v3637_v37 = vld [vmem:[%s4993_s1 + $0x654] ss:$8 sps:$4 sm:$0xff]  }
  0x61   : > { %2363 = vmatprep.subr.bf16.mxu0 %v3549_v39  ;;  %v3635_v39 = vld [vmem:[%s4993_s1 + $0x650] ss:$8 sps:$4 sm:$0xff]  }
  0x63   : > { %2200 = vmatpush1.bf16.msra.mxu1 %v3544_v40  ;;  %v3640_v40 = vld [vmem:[%s4993_s1 + $0x264] ss:$8 sps:$4 sm:$0xff]  }
  0x64   : > { %2364 = vmatpush1.bf16.msra.mxu0 %v3547_v41  ;;  %2201 = vmatprep.subr.bf16.mxu1 %v3552_v42  ;;  %v3643_v41 = vld [vmem:[%s4993_s1 + $0x664] ss:$8 sps:$4 sm:$0xff]   ;;  %v3638_v42 = vld [vmem:[%s4993_s1 + $0x260] ss:$8 sps:$4 sm:$0xff]  }
  0x65   : > { %2365 = vmatprep.subr.bf16.mxu0 %v3555_v43  ;;  %v3641_v43 = vld [vmem:[%s4993_s1 + $0x660] ss:$8 sps:$4 sm:$0xff]  }
  0x67   : > { %2202 = vmatpush1.bf16.msra.mxu1 %v3550_v44  ;;  %v3646_v44 = vld [vmem:[%s4993_s1 + $0x274] ss:$8 sps:$4 sm:$0xff]  }
  0x68   : > { %2366 = vmatpush1.bf16.msra.mxu0 %v3553_v45  ;;  %2203 = vmatprep.subr.bf16.mxu1 %v3558_v46  ;;  %v3649_v45 = vld [vmem:[%s4993_s1 + $0x674] ss:$8 sps:$4 sm:$0xff]   ;;  %v3644_v46 = vld [vmem:[%s4993_s1 + $0x270] ss:$8 sps:$4 sm:$0xff]  }
  0x69   : > { %2367 = vmatprep.subr.bf16.mxu0 %v3561_v47  ;;  %v3647_v47 = vld [vmem:[%s4993_s1 + $0x670] ss:$8 sps:$4 sm:$0xff]  }
  0x6b   : > { %2204 = vmatpush1.bf16.msra.mxu1 %v3556_v48  ;;  %v3652_v48 = vld [vmem:[%s4993_s1 + $0x284] ss:$8 sps:$4 sm:$0xff]  }
  0x6c   : > { %2368 = vmatpush1.bf16.msra.mxu0 %v3559_v49  ;;  %2205 = vmatprep.subr.bf16.mxu1 %v3564_v50  ;;  %v3655_v49 = vld [vmem:[%s4993_s1 + $0x684] ss:$8 sps:$4 sm:$0xff]   ;;  %v3650_v50 = vld [vmem:[%s4993_s1 + $0x280] ss:$8 sps:$4 sm:$0xff]  }
  0x6d   : > { %2369 = vmatprep.subr.bf16.mxu0 %v3567_v51  ;;  %v3653_v51 = vld [vmem:[%s4993_s1 + $0x680] ss:$8 sps:$4 sm:$0xff]  }
  0x6f   : > { %2206 = vmatpush1.bf16.msra.mxu1 %v3562_v52  ;;  %v3658_v52 = vld [vmem:[%s4993_s1 + $0x294] ss:$8 sps:$4 sm:$0xff]  }
  0x70   : > { %2370 = vmatpush1.bf16.msra.mxu0 %v3565_v53  ;;  %2207 = vmatprep.subr.bf16.mxu1 %v3570_v54  ;;  %v3661_v53 = vld [vmem:[%s4993_s1 + $0x694] ss:$8 sps:$4 sm:$0xff]   ;;  %v3656_v54 = vld [vmem:[%s4993_s1 + $0x290] ss:$8 sps:$4 sm:$0xff]  }
  0x71   : > { %2371 = vmatprep.subr.bf16.mxu0 %v3573_v55  ;;  %v3659_v55 = vld [vmem:[%s4993_s1 + $0x690] ss:$8 sps:$4 sm:$0xff]  }
  0x73   : > { %2208 = vmatpush1.bf16.msra.mxu1 %v3568_v56  ;;  %v3664_v56 = vld [vmem:[%s4993_s1 + $0x2a4] ss:$8 sps:$4 sm:$0xff]  }
  0x74   : > { %2372 = vmatpush1.bf16.msra.mxu0 %v3571_v57  ;;  %2209 = vmatprep.subr.bf16.mxu1 %v3576_v58  ;;  %v3667_v57 = vld [vmem:[%s4993_s1 + $0x6a4] ss:$8 sps:$4 sm:$0xff]   ;;  %v3662_v58 = vld [vmem:[%s4993_s1 + $0x2a0] ss:$8 sps:$4 sm:$0xff]  }
  0x75   : > { %2373 = vmatprep.subr.bf16.mxu0 %v3579_v59  ;;  %v3665_v59 = vld [vmem:[%s4993_s1 + $0x6a0] ss:$8 sps:$4 sm:$0xff]  }
  0x77   : > { %2210 = vmatpush1.bf16.msra.mxu1 %v3574_v60  ;;  %v3670_v60 = vld [vmem:[%s4993_s1 + $0x2b4] ss:$8 sps:$4 sm:$0xff]  }
  0x78   : > { %2374 = vmatpush1.bf16.msra.mxu0 %v3577_v61  ;;  %2211 = vmatprep.subr.bf16.mxu1 %v3582_v62  ;;  %v3673_v61 = vld [vmem:[%s4993_s1 + $0x6b4] ss:$8 sps:$4 sm:$0xff]   ;;  %v3668_v62 = vld [vmem:[%s4993_s1 + $0x2b0] ss:$8 sps:$4 sm:$0xff]  }
  0x79   : > { %2375 = vmatprep.subr.bf16.mxu0 %v3585_v63  ;;  %v3671_v63 = vld [vmem:[%s4993_s1 + $0x6b0] ss:$8 sps:$4 sm:$0xff]  }
  0x7b   : > { %2212 = vmatpush1.bf16.msra.mxu1 %v3580_v0  ;;  %v3676_v0 = vld [vmem:[%s4993_s1 + $0x2c4] ss:$8 sps:$4 sm:$0xff]  }
  0x7c   : > { %2376 = vmatpush1.bf16.msra.mxu0 %v3583_v1  ;;  %2213 = vmatprep.subr.bf16.mxu1 %v3588_v2  ;;  %v3679_v1 = vld [vmem:[%s4993_s1 + $0x6c4] ss:$8 sps:$4 sm:$0xff]   ;;  %v3674_v2 = vld [vmem:[%s4993_s1 + $0x2c0] ss:$8 sps:$4 sm:$0xff]  }
  0x7d   : > { %2377 = vmatprep.subr.bf16.mxu0 %v3591_v3  ;;  %v3677_v3 = vld [vmem:[%s4993_s1 + $0x6c0] ss:$8 sps:$4 sm:$0xff]  }
  0x7f   : > { %2214 = vmatpush1.bf16.msra.mxu1 %v3586_v4  ;;  %v3682_v4 = vld [vmem:[%s4993_s1 + $0x2d4] ss:$8 sps:$4 sm:$0xff]  }
  0x80   : > { %2378 = vmatpush1.bf16.msra.mxu0 %v3589_v5  ;;  %2215 = vmatprep.subr.bf16.mxu1 %v3594_v6  ;;  %v3685_v5 = vld [vmem:[%s4993_s1 + $0x6d4] ss:$8 sps:$4 sm:$0xff]   ;;  %v3680_v6 = vld [vmem:[%s4993_s1 + $0x2d0] ss:$8 sps:$4 sm:$0xff]  }
  0x81   : > { %2379 = vmatprep.subr.bf16.mxu0 %v3597_v7  ;;  %v3683_v7 = vld [vmem:[%s4993_s1 + $0x6d0] ss:$8 sps:$4 sm:$0xff]  }
  0x83   : > { %2216 = vmatpush1.bf16.msra.mxu1 %v3592_v8  ;;  %v3688_v8 = vld [vmem:[%s4993_s1 + $0x2e4] ss:$8 sps:$4 sm:$0xff]  }
  0x84   : > { %2380 = vmatpush1.bf16.msra.mxu0 %v3595_v9  ;;  %2226 = vmatprep.subr.bf16.mxu1 %v3602_v10  ;;  %v3691_v9 = vld [vmem:[%s4993_s1 + $0x6e4] ss:$8 sps:$4 sm:$0xff]   ;;  %v3686_v10 = vld [vmem:[%s4993_s1 + $0x2e0] ss:$8 sps:$4 sm:$0xff]  }
  0x85   : > { %2390 = vmatprep.subr.bf16.mxu0 %v3607_v11  ;;  %v3689_v11 = vld [vmem:[%s4993_s1 + $0x6e0] ss:$8 sps:$4 sm:$0xff]  }
  0x86   : > { %2218 = vmatmul.mubr.bf16.vlgmr.msra.gmra.mrb[0].mxu1 %v2953_v12  ;;  %v3694_v12 = vld [vmem:[%s4993_s1 + $0x2f4] ss:$8 sps:$4 sm:$0xff]  }
  0x87   : > { %2382 = vmatmul.mubr.bf16.vlgmr.msra.gmra.mrb[0].mxu0 %v2961_v14  ;;  %2227 = vmatpush1.bf16.msra.mxu1 %v3600_v13  ;;  %v3697_v13 = vld [vmem:[%s4993_s1 + $0x6f4] ss:$8 sps:$4 sm:$0xff]   ;;  %v3692_v14 = vld [vmem:[%s4993_s1 + $0x2f0] ss:$8 sps:$4 sm:$0xff]  }
  0x88   : > { %2391 = vmatpush1.bf16.msra.mxu0 %v3605_v15  ;;  %2228 = vmatprep.subr.bf16.mxu1 %v3610_v16  ;;  %v3695_v15 = vld [vmem:[%s4993_s1 + $0x6f0] ss:$8 sps:$4 sm:$0xff]   ;;  %v3702_v16 = vld [vmem:[%s4993_s1 + $0x304] ss:$8 sps:$4 sm:$0xff]  }
  0x89   : > { %2392 = vmatprep.subr.bf16.mxu0 %v3613_v17  ;;  %2258 = vmatprep.mubr.bf16.mxu1 %v2956_v19  ;;  %v3707_v17 = vld [vmem:[%s4993_s1 + $0x704] ss:$8 sps:$4 sm:$0xff]   ;;  %v3700_v19 = vld [vmem:[%s4993_s1 + $0x300] ss:$8 sps:$4 sm:$0xff]  }
  0x8a   : > { %2422 = vmatprep.mubr.bf16.mxu0 %v2964_v23  ;;  %v2963_v23 = vcombine.low %v4384_v20, %v4384_v20  ;;  %v3711_v20 = vld [vmem:[%s4993_s1 + $0x710] ss:$8 sps:$4 sm:$0xff]  }
  0x8b   : > { %2229 = vmatpush1.bf16.msra.mxu1 %v3608_v21  ;;  %v3705_v21 = vld [vmem:[%s4993_s1 + $0x700] ss:$8 sps:$4 sm:$0xff]  }
  0x8c   : > { %2393 = vmatpush1.bf16.msra.mxu0 %v3611_v22  ;;  %2230 = vmatprep.subr.bf16.mxu1 %v3616_v24  ;;  %v2955_v22 = vcombine.low %v4379_v18, %v4379_v18  ;;  %v4579_v24 = vld [vmem:[%s4090_s26 + $0x18] sm:$0xff] }
  0x8d   : > { %2394 = vmatprep.subr.bf16.mxu0 %v3619_v25  ;;  %v4582_v25 = vld [vmem:[%s4090_s26 + $0x38] sm:$0xff] }
  0x8e   : > { %v3708_v18 = vld [vmem:[%s4993_s1 + $0x310] ss:$8 sps:$4 sm:$0xff]  }
  0x8f   : > { %2231 = vmatpush1.bf16.msra.mxu1 %v3614_v26  ;;  %v3710_v26 = vld [vmem:[%s4993_s1 + $0x314] ss:$8 sps:$4 sm:$0xff]  }
  0x90   : > { %2395 = vmatpush1.bf16.msra.mxu0 %v3617_v27  ;;  %2232 = vmatprep.subr.bf16.mxu1 %v3622_v28  ;;  %v3713_v27 = vld [vmem:[%s4993_s1 + $0x714] ss:$8 sps:$4 sm:$0xff]   ;;  %v2958_v28 = vcombine.high %v4579_v24, %v4579_v24 }
  0x91   : > { %2396 = vmatprep.subr.bf16.mxu0 %v3625_v29  ;;  %v2966_v29 = vcombine.high %v4582_v25, %v4582_v25 }
  0x93   : > { %2233 = vmatpush1.bf16.msra.mxu1 %v3620_v30  ;;  %v3716_v30 = vld [vmem:[%s4993_s1 + $0x324] ss:$8 sps:$4 sm:$0xff]  }
  0x94   : > { %2397 = vmatpush1.bf16.msra.mxu0 %v3623_v31  ;;  %2234 = vmatprep.subr.bf16.mxu1 %v3628_v32  ;;  %v3719_v31 = vld [vmem:[%s4993_s1 + $0x724] ss:$8 sps:$4 sm:$0xff]   ;;  %v3714_v32 = vld [vmem:[%s4993_s1 + $0x320] ss:$8 sps:$4 sm:$0xff]  }
  0x95   : > { %2398 = vmatprep.subr.bf16.mxu0 %v3631_v33  ;;  %v3717_v33 = vld [vmem:[%s4993_s1 + $0x720] ss:$8 sps:$4 sm:$0xff]  }
  0x97   : > { %2235 = vmatpush1.bf16.msra.mxu1 %v3626_v34  ;;  %v3722_v34 = vld [vmem:[%s4993_s1 + $0x334] ss:$8 sps:$4 sm:$0xff]  }
  0x98   : > { %2399 = vmatpush1.bf16.msra.mxu0 %v3629_v35  ;;  %2236 = vmatprep.subr.bf16.mxu1 %v3634_v36  ;;  %v3725_v35 = vld [vmem:[%s4993_s1 + $0x734] ss:$8 sps:$4 sm:$0xff]   ;;  %v3720_v36 = vld [vmem:[%s4993_s1 + $0x330] ss:$8 sps:$4 sm:$0xff]  }
  0x99   : > { %2400 = vmatprep.subr.bf16.mxu0 %v3637_v37  ;;  %v3723_v37 = vld [vmem:[%s4993_s1 + $0x730] ss:$8 sps:$4 sm:$0xff]  }
  0x9b   : > { %2237 = vmatpush1.bf16.msra.mxu1 %v3632_v38  ;;  %v3728_v38 = vld [vmem:[%s4993_s1 + $0x344] ss:$8 sps:$4 sm:$0xff]  }
  0x9c   : > { %2401 = vmatpush1.bf16.msra.mxu0 %v3635_v39  ;;  %2238 = vmatprep.subr.bf16.mxu1 %v3640_v40  ;;  %v3731_v39 = vld [vmem:[%s4993_s1 + $0x744] ss:$8 sps:$4 sm:$0xff]   ;;  %v3726_v40 = vld [vmem:[%s4993_s1 + $0x340] ss:$8 sps:$4 sm:$0xff]  }
  0x9d   : > { %2402 = vmatprep.subr.bf16.mxu0 %v3643_v41  ;;  %v3729_v41 = vld [vmem:[%s4993_s1 + $0x740] ss:$8 sps:$4 sm:$0xff]  }
  0x9f   : > { %2239 = vmatpush1.bf16.msra.mxu1 %v3638_v42  ;;  %v3734_v42 = vld [vmem:[%s4993_s1 + $0x354] ss:$8 sps:$4 sm:$0xff]  }
  0xa0   : > { %2403 = vmatpush1.bf16.msra.mxu0 %v3641_v43  ;;  %2240 = vmatprep.subr.bf16.mxu1 %v3646_v44  ;;  %v3737_v43 = vld [vmem:[%s4993_s1 + $0x754] ss:$8 sps:$4 sm:$0xff]   ;;  %v3732_v44 = vld [vmem:[%s4993_s1 + $0x350] ss:$8 sps:$4 sm:$0xff]  }
  0xa1   : > { %2404 = vmatprep.subr.bf16.mxu0 %v3649_v45  ;;  %v3735_v45 = vld [vmem:[%s4993_s1 + $0x750] ss:$8 sps:$4 sm:$0xff]  }
  0xa3   : > { %2241 = vmatpush1.bf16.msra.mxu1 %v3644_v46  ;;  %v3740_v46 = vld [vmem:[%s4993_s1 + $0x364] ss:$8 sps:$4 sm:$0xff]  }
  0xa4   : > { %2405 = vmatpush1.bf16.msra.mxu0 %v3647_v47  ;;  %2242 = vmatprep.subr.bf16.mxu1 %v3652_v48  ;;  %v3743_v47 = vld [vmem:[%s4993_s1 + $0x764] ss:$8 sps:$4 sm:$0xff]   ;;  %v3738_v48 = vld [vmem:[%s4993_s1 + $0x360] ss:$8 sps:$4 sm:$0xff]  }
  0xa5   : > { %2406 = vmatprep.subr.bf16.mxu0 %v3655_v49  ;;  %v3741_v49 = vld [vmem:[%s4993_s1 + $0x760] ss:$8 sps:$4 sm:$0xff]  }
  0xa7   : > { %2243 = vmatpush1.bf16.msra.mxu1 %v3650_v50  ;;  %v3746_v50 = vld [vmem:[%s4993_s1 + $0x374] ss:$8 sps:$4 sm:$0xff]  }
  0xa8   : > { %2407 = vmatpush1.bf16.msra.mxu0 %v3653_v51  ;;  %2244 = vmatprep.subr.bf16.mxu1 %v3658_v52  ;;  %v3749_v51 = vld [vmem:[%s4993_s1 + $0x774] ss:$8 sps:$4 sm:$0xff]   ;;  %v3744_v52 = vld [vmem:[%s4993_s1 + $0x370] ss:$8 sps:$4 sm:$0xff]  }
  0xa9   : > { %2408 = vmatprep.subr.bf16.mxu0 %v3661_v53  ;;  %v3747_v53 = vld [vmem:[%s4993_s1 + $0x770] ss:$8 sps:$4 sm:$0xff]  }
  0xab   : > { %2245 = vmatpush1.bf16.msra.mxu1 %v3656_v54  ;;  %v3752_v54 = vld [vmem:[%s4993_s1 + $0x384] ss:$8 sps:$4 sm:$0xff]  }
  0xac   : > { %2409 = vmatpush1.bf16.msra.mxu0 %v3659_v55  ;;  %2246 = vmatprep.subr.bf16.mxu1 %v3664_v56  ;;  %v3755_v55 = vld [vmem:[%s4993_s1 + $0x784] ss:$8 sps:$4 sm:$0xff]   ;;  %v3750_v56 = vld [vmem:[%s4993_s1 + $0x380] ss:$8 sps:$4 sm:$0xff]  }
  0xad   : > { %2410 = vmatprep.subr.bf16.mxu0 %v3667_v57  ;;  %v3753_v57 = vld [vmem:[%s4993_s1 + $0x780] ss:$8 sps:$4 sm:$0xff]  }
  0xaf   : > { %2247 = vmatpush1.bf16.msra.mxu1 %v3662_v58  ;;  %v3758_v58 = vld [vmem:[%s4993_s1 + $0x394] ss:$8 sps:$4 sm:$0xff]  }
  0xb0   : > { %2411 = vmatpush1.bf16.msra.mxu0 %v3665_v59  ;;  %2248 = vmatprep.subr.bf16.mxu1 %v3670_v60  ;;  %v3761_v59 = vld [vmem:[%s4993_s1 + $0x794] ss:$8 sps:$4 sm:$0xff]   ;;  %v3756_v60 = vld [vmem:[%s4993_s1 + $0x390] ss:$8 sps:$4 sm:$0xff]  }
  0xb1   : > { %2412 = vmatprep.subr.bf16.mxu0 %v3673_v61  ;;  %v3759_v61 = vld [vmem:[%s4993_s1 + $0x790] ss:$8 sps:$4 sm:$0xff]  }
  0xb3   : > { %2249 = vmatpush1.bf16.msra.mxu1 %v3668_v62  ;;  %v3764_v62 = vld [vmem:[%s4993_s1 + $0x3a4] ss:$8 sps:$4 sm:$0xff]  }
  0xb4   : > { %2413 = vmatpush1.bf16.msra.mxu0 %v3671_v63  ;;  %2250 = vmatprep.subr.bf16.mxu1 %v3676_v0  ;;  %v3767_v63 = vld [vmem:[%s4993_s1 + $0x7a4] ss:$8 sps:$4 sm:$0xff]   ;;  %v3762_v0 = vld [vmem:[%s4993_s1 + $0x3a0] ss:$8 sps:$4 sm:$0xff]  }
  0xb5   : > { %2414 = vmatprep.subr.bf16.mxu0 %v3679_v1  ;;  %v3765_v1 = vld [vmem:[%s4993_s1 + $0x7a0] ss:$8 sps:$4 sm:$0xff]  }
  0xb7   : > { %2251 = vmatpush1.bf16.msra.mxu1 %v3674_v2  ;;  %v3770_v2 = vld [vmem:[%s4993_s1 + $0x3b4] ss:$8 sps:$4 sm:$0xff]  }
  0xb8   : > { %2415 = vmatpush1.bf16.msra.mxu0 %v3677_v3  ;;  %2252 = vmatprep.subr.bf16.mxu1 %v3682_v4  ;;  %v3773_v3 = vld [vmem:[%s4993_s1 + $0x7b4] ss:$8 sps:$4 sm:$0xff]   ;;  %v3768_v4 = vld [vmem:[%s4993_s1 + $0x3b0] ss:$8 sps:$4 sm:$0xff]  }
  0xb9   : > { %2416 = vmatprep.subr.bf16.mxu0 %v3685_v5  ;;  %v3771_v5 = vld [vmem:[%s4993_s1 + $0x7b0] ss:$8 sps:$4 sm:$0xff]  }
  0xbb   : > { %2253 = vmatpush1.bf16.msra.mxu1 %v3680_v6  ;;  %v3776_v6 = vld [vmem:[%s4993_s1 + $0x3c4] ss:$8 sps:$4 sm:$0xff]  }
  0xbc   : > { %2417 = vmatpush1.bf16.msra.mxu0 %v3683_v7  ;;  %2254 = vmatprep.subr.bf16.mxu1 %v3688_v8  ;;  %v3779_v7 = vld [vmem:[%s4993_s1 + $0x7c4] ss:$8 sps:$4 sm:$0xff]   ;;  %v3774_v8 = vld [vmem:[%s4993_s1 + $0x3c0] ss:$8 sps:$4 sm:$0xff]  }
  0xbd   : > { %2418 = vmatprep.subr.bf16.mxu0 %v3691_v9  ;;  %v3777_v9 = vld [vmem:[%s4993_s1 + $0x7c0] ss:$8 sps:$4 sm:$0xff]  }
  0xbf   : > { %2255 = vmatpush1.bf16.msra.mxu1 %v3686_v10  ;;  %v3782_v10 = vld [vmem:[%s4993_s1 + $0x3d4] ss:$8 sps:$4 sm:$0xff]  }
  0xc0   : > { %2419 = vmatpush1.bf16.msra.mxu0 %v3689_v11  ;;  %2256 = vmatprep.subr.bf16.mxu1 %v3694_v12  ;;  %v3785_v11 = vld [vmem:[%s4993_s1 + $0x7d4] ss:$8 sps:$4 sm:$0xff]   ;;  %v3780_v12 = vld [vmem:[%s4993_s1 + $0x3d0] ss:$8 sps:$4 sm:$0xff]  }
  0xc1   : > { %2420 = vmatprep.subr.bf16.mxu0 %v3697_v13  ;;  %v3783_v13 = vld [vmem:[%s4993_s1 + $0x7d0] ss:$8 sps:$4 sm:$0xff]  }
  0xc3   : > { %2257 = vmatpush1.bf16.msra.mxu1 %v3692_v14  ;;  %v3788_v14 = vld [vmem:[%s4993_s1 + $0x3e4] ss:$8 sps:$4 sm:$0xff]  }
  0xc4   : > { %2421 = vmatpush1.bf16.msra.mxu0 %v3695_v15  ;;  %2267 = vmatprep.subr.bf16.mxu1 %v3702_v16  ;;  %v3791_v15 = vld [vmem:[%s4993_s1 + $0x7e4] ss:$8 sps:$4 sm:$0xff]   ;;  %v3786_v16 = vld [vmem:[%s4993_s1 + $0x3e0] ss:$8 sps:$4 sm:$0xff]  }
  0xc5   : > { %2431 = vmatprep.subr.bf16.mxu0 %v3707_v17  ;;  %v3789_v17 = vld [vmem:[%s4993_s1 + $0x7e0] ss:$8 sps:$4 sm:$0xff]  }
  0xc6   : > { %2259 = vmatmul.mubr.bf16.vlgmr.msra.gmra.mrb[0].mxu1 %v2955_v22  ;;  %v3792_v22 = vld [vmem:[%s4993_s1 + $0x3f0] ss:$8 sps:$4 sm:$0xff]  }
  0xc7   : > { %2423 = vmatmul.mubr.bf16.vlgmr.msra.gmra.mrb[0].mxu0 %v2963_v23  ;;  %2268 = vmatpush1.bf16.msra.mxu1 %v3700_v19  ;;  %v3794_v19 = vld [vmem:[%s4993_s1 + $0x3f4] ss:$8 sps:$4 sm:$0xff]   ;;  %v3795_v23 = vld [vmem:[%s4993_s1 + $0x7f0] ss:$8 sps:$4 sm:$0xff]  }
  0xc8   : > { %2432 = vmatpush1.bf16.msra.mxu0 %v3705_v21  ;;  %2269 = vmatprep.subr.bf16.mxu1 %v3710_v26  ;;  %v3797_v21 = vld [vmem:[%s4993_s1 + $0x7f4] ss:$8 sps:$4 sm:$0xff]   ;;  %v3804_v26 = vld [vmem:[%s4993_s1 + $0x804] ss:$8 sps:$4 sm:$0xff]  }
  0xc9   : > { %2433 = vmatprep.subr.bf16.mxu0 %v3713_v27  ;;  %2299 = vmatprep.mubr.bf16.mxu1 %v2958_v28  ;;  %v4772_v27 = vld [vmem:[%s4090_s26 + $0x40] sm:$0xff] }
  0xca   : > { %2463 = vmatprep.mubr.bf16.mxu0 %v2966_v29  ;;  %v3802_v28 = vld [vmem:[%s4993_s1 + $0x800] ss:$8 sps:$4 sm:$0xff]   ;;  %v2968_v29 = vcombine.high %v4772_v27, %v4772_v27 }
  0xcb   : > { %2270 = vmatpush1.bf16.msra.mxu1 %v3708_v18  ;;  %v2957_v18 = vcombine.low %v4579_v24, %v4579_v24  ;;  %v3805_v24 = vld [vmem:[%s4993_s1 + $0x810] ss:$8 sps:$4 sm:$0xff]  }
  0xcc   : > { %2434 = vmatpush1.bf16.msra.mxu0 %v3711_v20  ;;  %2271 = vmatprep.subr.bf16.mxu1 %v3716_v30  ;;  %v2965_v20 = vcombine.low %v4582_v25, %v4582_v25  ;;  %v3807_v30 = vld [vmem:[%s4993_s1 + $0x814] ss:$8 sps:$4 sm:$0xff]   ;;  %v3810_v25 = vld [vmem:[%s4993_s1 + $0x824] ss:$8 sps:$4 sm:$0xff]  }
  0xcd   : > { %2435 = vmatprep.subr.bf16.mxu0 %v3719_v31  ;;  %v3808_v31 = vld [vmem:[%s4993_s1 + $0x820] ss:$8 sps:$4 sm:$0xff]  }
  0xcf   : > { %2272 = vmatpush1.bf16.msra.mxu1 %v3714_v32  ;;  %v3813_v32 = vld [vmem:[%s4993_s1 + $0x834] ss:$8 sps:$4 sm:$0xff]  }
  0xd0   : > { %2436 = vmatpush1.bf16.msra.mxu0 %v3717_v33  ;;  %2273 = vmatprep.subr.bf16.mxu1 %v3722_v34  ;;  %v3811_v33 = vld [vmem:[%s4993_s1 + $0x830] ss:$8 sps:$4 sm:$0xff]   ;;  %v3816_v34 = vld [vmem:[%s4993_s1 + $0x844] ss:$8 sps:$4 sm:$0xff]  }
  0xd1   : > { %2437 = vmatprep.subr.bf16.mxu0 %v3725_v35  ;;  %v3814_v35 = vld [vmem:[%s4993_s1 + $0x840] ss:$8 sps:$4 sm:$0xff]  }
  0xd3   : > { %2274 = vmatpush1.bf16.msra.mxu1 %v3720_v36  ;;  %v3819_v36 = vld [vmem:[%s4993_s1 + $0x854] ss:$8 sps:$4 sm:$0xff]  }
  0xd4   : > { %2438 = vmatpush1.bf16.msra.mxu0 %v3723_v37  ;;  %2275 = vmatprep.subr.bf16.mxu1 %v3728_v38  ;;  %v3817_v37 = vld [vmem:[%s4993_s1 + $0x850] ss:$8 sps:$4 sm:$0xff]   ;;  %v3822_v38 = vld [vmem:[%s4993_s1 + $0x864] ss:$8 sps:$4 sm:$0xff]  }
  0xd5   : > { %2439 = vmatprep.subr.bf16.mxu0 %v3731_v39  ;;  %v3820_v39 = vld [vmem:[%s4993_s1 + $0x860] ss:$8 sps:$4 sm:$0xff]  }
  0xd7   : > { %2276 = vmatpush1.bf16.msra.mxu1 %v3726_v40  ;;  %v3825_v40 = vld [vmem:[%s4993_s1 + $0x874] ss:$8 sps:$4 sm:$0xff]  }
  0xd8   : > { %2440 = vmatpush1.bf16.msra.mxu0 %v3729_v41  ;;  %2277 = vmatprep.subr.bf16.mxu1 %v3734_v42  ;;  %v3823_v41 = vld [vmem:[%s4993_s1 + $0x870] ss:$8 sps:$4 sm:$0xff]   ;;  %v3828_v42 = vld [vmem:[%s4993_s1 + $0x884] ss:$8 sps:$4 sm:$0xff]  }
  0xd9   : > { %2441 = vmatprep.subr.bf16.mxu0 %v3737_v43  ;;  %v3826_v43 = vld [vmem:[%s4993_s1 + $0x880] ss:$8 sps:$4 sm:$0xff]  }
  0xdb   : > { %2278 = vmatpush1.bf16.msra.mxu1 %v3732_v44  ;;  %v3831_v44 = vld [vmem:[%s4993_s1 + $0x894] ss:$8 sps:$4 sm:$0xff]  }
  0xdc   : > { %2442 = vmatpush1.bf16.msra.mxu0 %v3735_v45  ;;  %2279 = vmatprep.subr.bf16.mxu1 %v3740_v46  ;;  %v3829_v45 = vld [vmem:[%s4993_s1 + $0x890] ss:$8 sps:$4 sm:$0xff]   ;;  %v3834_v46 = vld [vmem:[%s4993_s1 + $0x8a4] ss:$8 sps:$4 sm:$0xff]  }
  0xdd   : > { %2443 = vmatprep.subr.bf16.mxu0 %v3743_v47  ;;  %v3832_v47 = vld [vmem:[%s4993_s1 + $0x8a0] ss:$8 sps:$4 sm:$0xff]  }
  0xdf   : > { %2280 = vmatpush1.bf16.msra.mxu1 %v3738_v48  ;;  %v3837_v48 = vld [vmem:[%s4993_s1 + $0x8b4] ss:$8 sps:$4 sm:$0xff]  }
  0xe0   : > { %2444 = vmatpush1.bf16.msra.mxu0 %v3741_v49  ;;  %2281 = vmatprep.subr.bf16.mxu1 %v3746_v50  ;;  %v3835_v49 = vld [vmem:[%s4993_s1 + $0x8b0] ss:$8 sps:$4 sm:$0xff]   ;;  %v3840_v50 = vld [vmem:[%s4993_s1 + $0x8c4] ss:$8 sps:$4 sm:$0xff]  }
  0xe1   : > { %2445 = vmatprep.subr.bf16.mxu0 %v3749_v51  ;;  %v3838_v51 = vld [vmem:[%s4993_s1 + $0x8c0] ss:$8 sps:$4 sm:$0xff]  }
  0xe3   : > { %2282 = vmatpush1.bf16.msra.mxu1 %v3744_v52  ;;  %v3843_v52 = vld [vmem:[%s4993_s1 + $0x8d4] ss:$8 sps:$4 sm:$0xff]  }
  0xe4   : > { %2446 = vmatpush1.bf16.msra.mxu0 %v3747_v53  ;;  %2283 = vmatprep.subr.bf16.mxu1 %v3752_v54  ;;  %v3841_v53 = vld [vmem:[%s4993_s1 + $0x8d0] ss:$8 sps:$4 sm:$0xff]   ;;  %v3846_v54 = vld [vmem:[%s4993_s1 + $0x8e4] ss:$8 sps:$4 sm:$0xff]  }
  0xe5   : > { %2447 = vmatprep.subr.bf16.mxu0 %v3755_v55  ;;  %v3844_v55 = vld [vmem:[%s4993_s1 + $0x8e0] ss:$8 sps:$4 sm:$0xff]  }
  0xe7   : > { %2284 = vmatpush1.bf16.msra.mxu1 %v3750_v56  ;;  %v3849_v56 = vld [vmem:[%s4993_s1 + $0x8f4] ss:$8 sps:$4 sm:$0xff]  }
  0xe8   : > { %2448 = vmatpush1.bf16.msra.mxu0 %v3753_v57  ;;  %2285 = vmatprep.subr.bf16.mxu1 %v3758_v58  ;;  %v3847_v57 = vld [vmem:[%s4993_s1 + $0x8f0] ss:$8 sps:$4 sm:$0xff]   ;;  %v2967_v58 = vcombine.low %v4772_v27, %v4772_v27 }
  0xe9   : > { %2449 = vmatprep.subr.bf16.mxu0 %v3761_v59  ;;  %v3852_v59 = vld [vmem:[%s4995_s3 + $0x40] sm:$0xff]  }
  0xeb   : > { %2286 = vmatpush1.bf16.msra.mxu1 %v3756_v60  ;;  %v3853_v60 = vld [vmem:[%s4995_s3] sm:$0xff]  }
  0xec   : > { %2450 = vmatpush1.bf16.msra.mxu0 %v3759_v61  ;;  %2287 = vmatprep.subr.bf16.mxu1 %v3764_v62  ;;  %v3854_v61 = vld [vmem:[%s4995_s3 + $0x48] sm:$0xff]  }
  0xed   : > { %2451 = vmatprep.subr.bf16.mxu0 %v3767_v63  ;;  %v3855_v62 = vld [vmem:[%s4995_s3 + $0x8] sm:$0xff]   ;;  %v3856_v63 = vld [vmem:[%s4995_s3 + $0x50] sm:$0xff]  }
  0xef   : > { %2288 = vmatpush1.bf16.msra.mxu1 %v3762_v0  ;;  %v3857_v0 = vld [vmem:[%s4995_s3 + $0x10] sm:$0xff]  }
  0xf0   : > { %2452 = vmatpush1.bf16.msra.mxu0 %v3765_v1  ;;  %2289 = vmatprep.subr.bf16.mxu1 %v3770_v2  ;;  %v3858_v1 = vld [vmem:[%s4995_s3 + $0x58] sm:$0xff]  }
  0xf1   : > { %2453 = vmatprep.subr.bf16.mxu0 %v3773_v3  ;;  %v3859_v2 = vld [vmem:[%s4995_s3 + $0x18] sm:$0xff]   ;;  %v3860_v3 = vld [vmem:[%s4995_s3 + $0x60] sm:$0xff]  }
  0xf3   : > { %2290 = vmatpush1.bf16.msra.mxu1 %v3768_v4  ;;  %v3861_v4 = vld [vmem:[%s4995_s3 + $0x20] sm:$0xff]  }
  0xf4   : > { %2454 = vmatpush1.bf16.msra.mxu0 %v3771_v5  ;;  %2291 = vmatprep.subr.bf16.mxu1 %v3776_v6  ;;  %v3862_v5 = vld [vmem:[%s4995_s3 + $0x68] sm:$0xff]  }
  0xf5   : > { %2455 = vmatprep.subr.bf16.mxu0 %v3779_v7  ;;  %v3863_v6 = vld [vmem:[%s4995_s3 + $0x28] sm:$0xff]   ;;  %v3864_v7 = vld [vmem:[%s4995_s3 + $0x70] sm:$0xff]  }
  0xf7   : > { %2292 = vmatpush1.bf16.msra.mxu1 %v3774_v8  ;;  %v3865_v8 = vld [vmem:[%s4995_s3 + $0x30] sm:$0xff]  }
  0xf8   : > { %2456 = vmatpush1.bf16.msra.mxu0 %v3777_v9  ;;  %2293 = vmatprep.subr.bf16.mxu1 %v3782_v10  ;;  %v3866_v9 = vld [vmem:[%s4995_s3 + $0x78] sm:$0xff]  }
  0xf9   : > { %2457 = vmatprep.subr.bf16.mxu0 %v3785_v11  ;;  %v3867_v10 = vld [vmem:[%s4995_s3 + $0x38] sm:$0xff]   ;;  %v3888_v11 = vmov 0.0  }
  0xfb   : > { %2294 = vmatpush1.bf16.msra.mxu1 %v3780_v12 }
  0xfc   : > { %2458 = vmatpush1.bf16.msra.mxu0 %v3783_v13  ;;  %2295 = vmatprep.subr.bf16.mxu1 %v3788_v14 }
  0xfd   : > { %2459 = vmatprep.subr.bf16.mxu0 %v3791_v15 }
  0xff   : > { %2296 = vmatpush1.bf16.msra.mxu1 %v3786_v16  ;;  %v631_v16 = vlaneseq }
 0x100   : > { %2460 = vmatpush1.bf16.msra.mxu0 %v3789_v17  ;;  %2297 = vmatprep.subr.bf16.mxu1 %v3794_v19 }
 0x101   : > { %2461 = vmatprep.subr.bf16.mxu0 %v3797_v21  ;;  %v632_v17 = vshrl.u32 %v631_v16, 7  ;;  %v629_v21 = vld [vmem:[%s4994_s2] sm:$0x3] }
 0x103   : > { %2298 = vmatpush1.bf16.msra.mxu1 %v3792_v22  ;;  %v633_v19 = vsub.s32 0, %v632_v17  ;;  %v637_v22 = vsub.s32 1, %v632_v17 }
 0x104   : > { %2462 = vmatpush1.bf16.msra.mxu0 %v3795_v23  ;;  %3291 = vmatprep.subr.bf16.mxu1 %v3852_v59 }
 0x105   : > { %2472 = vmatprep.subr.bf16.mxu0 %v3804_v26  ;;  %v634_v23 = vrot.slane %v629_v21, %v633_v19  ;;  %v638_v26 = vrot.slane %v629_v21, %v637_v22 }
 0x106   : > { %2300 = vmatmul.mubr.bf16.vlgmr.msra.gmra.mrb[0].mxu1 %v2957_v18 }
 0x107   : > { %2464 = vmatmul.mubr.bf16.vlgmr.msra.gmra.mrb[0].mxu0 %v2965_v20  ;;  %3292 = vmatpush3.bf16.msra.mxu1 %v3853_v60 }
 0x108   : > { %2473 = vmatpush1.bf16.msra.mxu0 %v3802_v28  ;;  %2504 = vmatprep.mubr.bf16.mxu0 %v2968_v29 }
 0x109   : > { %2474 = vmatprep.subr.bf16.mxu0 %v3807_v30  ;;  %3293 = vmatprep.subr.bf16.mxu1 %v3854_v61 }
 0x10b   : > { %3294 = vmatpush3.bf16.msra.mxu1 %v3855_v62 }
 0x10c   : > { %2475 = vmatpush1.bf16.msra.mxu0 %v3805_v24  ;;  %3295 = vmatprep.subr.bf16.mxu1 %v3856_v63 }
 0x10d   : > { %2476 = vmatprep.subr.bf16.mxu0 %v3810_v25 }
 0x10f   : > { %3296 = vmatpush3.bf16.msra.mxu1 %v3857_v0  ;;  %v3283_v0 = vld [vmem:[%s5000_s8] ss:$0 sm:$0xff] }
 0x110   : > { %2477 = vmatpush1.bf16.msra.mxu0 %v3808_v31  ;;  %3297 = vmatprep.subr.bf16.mxu1 %v3858_v1 }
 0x111   : > { %2478 = vmatprep.subr.bf16.mxu0 %v3813_v32 }
 0x113   : > { %3298 = vmatpush3.bf16.msra.mxu1 %v3859_v2 }
 0x114   : > { %2479 = vmatpush1.bf16.msra.mxu0 %v3811_v33  ;;  %3299 = vmatprep.subr.bf16.mxu1 %v3860_v3 }
 0x115   : > { %2480 = vmatprep.subr.bf16.mxu0 %v3816_v34  ;;  %v3868_v34 = vld [vmem:[%s4997_s5] sm:$0xff]  }
 0x117   : > { %3300 = vmatpush3.bf16.msra.mxu1 %v3861_v4 }
 0x118   : > { %2481 = vmatpush1.bf16.msra.mxu0 %v3814_v35  ;;  %3301 = vmatprep.subr.bf16.mxu1 %v3862_v5 }
 0x119   : > { %2482 = vmatprep.subr.bf16.mxu0 %v3819_v36  ;;  %v3869_v36 = vld [vmem:[%s4997_s5 + $0x8] sm:$0xff]  }
 0x11b   : > { %3302 = vmatpush3.bf16.msra.mxu1 %v3863_v6 }
 0x11c   : > { %2483 = vmatpush1.bf16.msra.mxu0 %v3817_v37  ;;  %3303 = vmatprep.subr.bf16.mxu1 %v3864_v7  ;;  %v3870_v37 = vld [vmem:[%s4997_s5 + $0x10] sm:$0xff]  }
 0x11d   : > { %2484 = vmatprep.subr.bf16.mxu0 %v3822_v38  ;;  %v3871_v38 = vld [vmem:[%s4997_s5 + $0x18] sm:$0xff]  }
 0x11f   : > { %3304 = vmatpush3.bf16.msra.mxu1 %v3865_v8 }
 0x120   : > { %2485 = vmatpush1.bf16.msra.mxu0 %v3820_v39  ;;  %3305 = vmatprep.subr.bf16.mxu1 %v3866_v9  ;;  %v3872_v39 = vld [vmem:[%s4997_s5 + $0x20] sm:$0xff]  }
 0x121   : > { %2486 = vmatprep.subr.bf16.mxu0 %v3825_v40  ;;  %v3873_v40 = vld [vmem:[%s4997_s5 + $0x28] sm:$0xff]  }
 0x123   : > { %3306 = vmatpush3.bf16.msra.mxu1 %v3867_v10 }
 0x124   : > { %2487 = vmatpush1.bf16.msra.mxu0 %v3823_v41  ;;  %3327 = vmatprep.subr.bf16.mxu1 %v3888_v11  ;;  %v3874_v41 = vld [vmem:[%s4997_s5 + $0x30] sm:$0xff]  }
 0x125   : > { %2488 = vmatprep.subr.bf16.mxu0 %v3828_v42  ;;  %v3875_v42 = vld [vmem:[%s4997_s5 + $0x38] sm:$0xff]  }
 0x128   : > { %2489 = vmatpush1.bf16.msra.mxu0 %v3826_v43 }
 0x129   : > { %2490 = vmatprep.subr.bf16.mxu0 %v3831_v44  ;;  %v3257_v44 = vld [vmem:[%s4996_s4] ss:$0 sm:$0xff] }
 0x12c   : > { %2491 = vmatpush1.bf16.msra.mxu0 %v3829_v45 }
 0x12d   : > { %2492 = vmatprep.subr.bf16.mxu0 %v3834_v46 }
 0x130   : > { %2493 = vmatpush1.bf16.msra.mxu0 %v3832_v47 }
 0x131   : > { %2494 = vmatprep.subr.bf16.mxu0 %v3837_v48 }
 0x134   : > { %2495 = vmatpush1.bf16.msra.mxu0 %v3835_v49 }
 0x135   : > { %2496 = vmatprep.subr.bf16.mxu0 %v3840_v50 }
 0x138   : > { %2497 = vmatpush1.bf16.msra.mxu0 %v3838_v51  ;;  %v3876_v51 = vld [vmem:[%s4999_s7] sm:$0xff]  }
 0x139   : > { %2498 = vmatprep.subr.bf16.mxu0 %v3843_v52 }
 0x13c   : > { %2499 = vmatpush1.bf16.msra.mxu0 %v3841_v53  ;;  %v3877_v53 = vld [vmem:[%s4999_s7 + $0x8] sm:$0xff]  }
 0x13d   : > { %2500 = vmatprep.subr.bf16.mxu0 %v3846_v54  ;;  %v3878_v54 = vld [vmem:[%s4999_s7 + $0x10] sm:$0xff]  }
 0x140   : > { %2501 = vmatpush1.bf16.msra.mxu0 %v3844_v55  ;;  %v3879_v55 = vld [vmem:[%s4999_s7 + $0x18] sm:$0xff]  }
 0x141   : > { %2502 = vmatprep.subr.bf16.mxu0 %v3849_v56  ;;  %v3274_v56 = vld [vmem:[%s4998_s6] ss:$0 sm:$0xff] }
 0x144   : > { %2503 = vmatpush1.bf16.msra.mxu0 %v3847_v57 }
 0x147   : > { %2505 = vmatmul.mubr.bf16.vlgmr.msra.gmra.mrb[0].mxu0 %v2967_v58 }
 0x1d9   : > { %v2301_v12 = vpop.f32.mrb[0].mxu1 }
 0x1da   : > { %v2303_v13 = vpop.f32.mrb[1].mxu1  ;;  %v3359_v27 = vadd.f32 %v2301_v12, %v634_v23 }
 0x1db   : > { %v2305_v14 = vpop.f32.mrb[2].mxu1  ;;  %v3361_v18 = vadd.f32 %v2303_v13, %v638_v26 }
 0x1dc   : > { %v2306_v15 = vpop.f32.mrb[3].mxu1 }
 0x21a   : > { %v2506_v20 = vpop.f32.mrb[0].mxu0 }
 0x21b   : > { %v3360_v28 = vadd.f32 %v3359_v27, %v2506_v20  ;;  %v2508_v29 = vpop.f32.mrb[1].mxu0 }
 0x21c   : > { %v3362_v30 = vadd.f32 %v3361_v18, %v2508_v29  ;;  %v2510_v24 = vpop.f32.mrb[2].mxu0 }
 0x21d   : > { %v2513_v25 = vmax.f32 %v3360_v28, 0.0  ;;  %v2511_v31 = vpop.f32.mrb[3].mxu0 }
 0x21e   : > { %v2514_v32 = vmax.f32 %v3362_v30, 0.0 }
 0x21f   : > { %v2515_v35 = vpack.c.bf16 %v2513_v25, %v2513_v25 }
 0x220   : > { %v2516_v33 = vpack.c.bf16 %v2514_v32, %v2514_v32 }
 0x222   : > { %2684 = vmatprep.mubr.bf16.mxu1 %v2516_v33 }
 0x223   : > { %2685 = vmatmul.mubr.bf16.vlgmr.msra.gmra.mrb[4].mxu1 %v2515_v35 }
 0x224   : > { %3328 = vmatpush3.bf16.msra.mxu1 %v3868_v34  ;;  %3343 = vmatprep.mubr.msk.bf16.mxu1 %vm3889_vm0, %v3888_v11 }
 0x225   : > { %3329 = vmatprep.subr.bf16.mxu1 %v3888_v11 }
 0x228   : > { %3330 = vmatpush3.bf16.msra.mxu1 %v3869_v36 }
 0x229   : > { %3331 = vmatprep.subr.bf16.mxu1 %v3888_v11 }
 0x22c   : > { %3332 = vmatpush3.bf16.msra.mxu1 %v3870_v37 }
 0x22d   : > { %3333 = vmatprep.subr.bf16.mxu1 %v3888_v11 }
 0x230   : > { %3334 = vmatpush3.bf16.msra.mxu1 %v3871_v38 }
 0x231   : > { %3335 = vmatprep.subr.bf16.mxu1 %v3888_v11 }
 0x234   : > { %3336 = vmatpush3.bf16.msra.mxu1 %v3872_v39 }
 0x235   : > { %3337 = vmatprep.subr.bf16.mxu1 %v3888_v11 }
 0x238   : > { %3338 = vmatpush3.bf16.msra.mxu1 %v3873_v40 }
 0x239   : > { %3339 = vmatprep.subr.bf16.mxu1 %v3888_v11 }
 0x23c   : > { %3340 = vmatpush3.bf16.msra.mxu1 %v3874_v41 }
 0x23d   : > { %3341 = vmatprep.subr.bf16.mxu1 %v3888_v11 }
 0x240   : > { %3342 = vmatpush3.bf16.msra.mxu1 %v3875_v42 }
 0x241   : > { %3347 = vmatprep.subr.bf16.mxu1 %v3888_v11 }
 0x2f6   : > { %v3307_v43 = vpop.f32.mrb[4].mxu1 }
 0x2f7   : > { %v3308_v45 = vpop.f32.mrb[5].mxu1 }
 0x2f8   : > { %v3309_v46 = vadd.f32 %v3308_v45, %v3307_v43  ;;  %v3310_v47 = vpop.f32.mrb[6].mxu1 }
 0x2f9   : > { %v3311_v48 = vpop.f32.mrb[7].mxu1 }
 0x2fa   : > { %v2687_v49 = vadd.f32 %v3309_v46, %v3257_v44 }
 0x2fc   : > { %v2692_v50 = vmax.f32 %v2687_v49, 0.0 }
 0x2fe   : > { %v2693_v52 = vpack.c.bf16 %v2692_v50, %v2692_v50 }
 0x300   : > { %3344 = vmatmul.mubr.bf16.vlgmr.msra.gmra.mrb[8].mxu1 %v2693_v52 }
 0x301   : > { %3348 = vmatpush3.bf16.msra.mxu1 %v3876_v51  ;;  %3355 = vmatprep.mubr.msk.bf16.mxu1 %vm3889_vm0, %v3888_v11 }
 0x302   : > { %3349 = vmatprep.subr.bf16.mxu1 %v3888_v11 }
 0x305   : > { %3350 = vmatpush3.bf16.msra.mxu1 %v3877_v53 }
 0x306   : > { %3351 = vmatprep.subr.bf16.mxu1 %v3888_v11 }
 0x309   : > { %3352 = vmatpush3.bf16.msra.mxu1 %v3878_v54 }
 0x30a   : > { %3353 = vmatprep.subr.bf16.mxu1 %v3888_v11 }
 0x30d   : > { %3354 = vmatpush3.bf16.msra.mxu1 %v3879_v55 }
 0x3d3   : > { %v2799_v57 = vpop.f32.mrb[8].mxu1 }
 0x3d4   : > { %v2800_v58 = vadd.f32 %v3274_v56, %v2799_v57  ;;  %v3345_v59 = vpop.f32.mrb[9].mxu1 }
 0x3d5   : > { %v2802_v60 = vpop.f32.mrb[10].mxu1 }
 0x3d6   : > { %v2805_v61 = vmax.f32 %v2800_v58, 0.0  ;;  %v3346_v62 = vpop.f32.mrb[11].mxu1 }
 0x3d8   : > { %v2806_v63 = vpack.c.bf16 %v2805_v61, %v2805_v61 }
 0x3da   : > { %3356 = vmatmul.mubr.msk.bf16.vlgmr.msra.gmra.mrb[12].mxu1 %vm2846_vm1, %v2806_v63 }
 0x4ad   : > { %v2884_v1 = vpop.f32.mrb[12].mxu1 }
 0x4ae   : > { %v2885_v2 = vadd.f32 %v3283_v0, %v2884_v1  ;;  %v3357_v3 = vpop.f32.mrb[13].mxu1 }
 0x4af   : > { %v2887_v4 = vpop.f32.mrb[14].mxu1 }
 0x4b0   : > { %2890 = vst [vmem:[%s330_s16] sm:$0xff] %v2885_v2  ;;  %v3358_v5 = vpop.f32.mrb[15].mxu1 }
 0x4b1 PF: > { %s19_s30 = sadd.s32 1, %s3886_s30  }
 0x4b2   : > { %p16_p4 = scmp.ge.s32.totalorder %s19_s30, 4  }
 0x4b4   :  { %18 = sbr.rel (!%p16_p4) target bundleno = 1 (0x1), region = 86 }

</bundles_post_ra>
